<compile_context>
chip_gen: v7x
topology: tpu7x:2x2x1
jax: 0.10.0
libtpu: 0.0.40
codegen_flags: <defaults>
</compile_context>

<pallas_src>
import functools

import jax
import jax.numpy as jnp
from jax.experimental import pallas as pl
from jax.experimental.pallas import tpu as pltpu


VMEM_LIMIT = 32 * 1024 * 1024  # explicit budget; working set is ~1-2 MB, safe on v7x too


def _round_up(x, m):
    return ((x + m - 1) // m) * m


def _row_tiling(rows):
    """Return (padded_rows, row_tile).

    rows <= 512 : one full-extent block, minimal (16-row) padding.
    rows  > 512 : 256/512-row tiles -> >=2 parallel grid blocks (v7x megacore) and
                  per-grid-step overhead amortized; padding bounded by one tile.
    """
    if rows <= 512:
        rpad = _round_up(rows, 16)
        return rpad, rpad
    tile = 256 if rows <= 2048 else 512
    return _round_up(rows, tile), tile


# ----------------------------------------------------------------------------- kernels
def _mlp3_kernel(*args, n_in, layer_norm, out_scale, compute_dtype, eps=1e-5):
    """Fused (sum_k x_k @ W0_k) + b0 -> ReLU -> Linear -> ReLU -> Linear
    (+ optional LayerNorm, + optional output scale) on a row tile.

    Matmul operands are in `compute_dtype` (bf16 on the hot path, a no-op cast when the
    inputs already are bf16); bias / ReLU / LayerNorm math and all accumulation are f32.
    """
    x_refs = args[:n_in]
    w0_refs = args[n_in:2 * n_in]
    (b0_ref, w1_ref, b1_ref, w2_ref, b2_ref, g_ref, beta_ref, o_ref) = args[2 * n_in:]

    h = None
    for xr, wr in zip(x_refs, w0_refs):
        part = jnp.dot(xr[...].astype(compute_dtype), wr[...],
                       preferred_element_type=jnp.float32)
        h = part if h is None else h + part
    h = jnp.maximum(h + b0_ref[...], 0.0)

    h = jnp.dot(h.astype(compute_dtype), w1_ref[...],
                preferred_element_type=jnp.float32) + b1_ref[...]
    h = jnp.maximum(h, 0.0)

    y = jnp.dot(h.astype(compute_dtype), w2_ref[...],
                preferred_element_type=jnp.float32) + b2_ref[...]

    if layer_norm:
        mu = jnp.mean(y, axis=-1, keepdims=True)
        var = jnp.mean((y - mu) ** 2, axis=-1, keepdims=True)
        y = (y - mu) * jax.lax.rsqrt(var + eps) * g_ref[...] + beta_ref[...]
    if out_scale != 1.0:
        y = y * out_scale
    o_ref[...] = y.astype(o_ref.dtype)


def _scatter_add_kernel(recv_ref, edge_ref, out_ref, acc_ref, *, tile_n):
    """scattered[n, :] += sum_e [receivers[e] == n] * edges[e, :]  (one-hot MXU matmul).

    One-hot mask is exact 0/1 bf16; accumulation is f32 in a VMEM scratch; the final
    write-back casts to out_ref.dtype (bf16 on the hot path).
    """
    e_blk = pl.program_id(1)

    @pl.when(e_blk == 0)
    def _():
        acc_ref[...] = jnp.zeros_like(acc_ref)

    recv = recv_ref[...]                                             # (1, tile_e) int32
    node_ids = (jax.lax.broadcasted_iota(jnp.int32, (tile_n, 1), 0)
                + pl.program_id(0) * tile_n)                         # (tile_n, 1)
    onehot = (node_ids == recv).astype(jnp.bfloat16)                 # (tile_n, tile_e)
    acc_ref[...] += jnp.dot(onehot, edge_ref[...].astype(jnp.bfloat16),
                            preferred_element_type=jnp.float32)

    @pl.when(e_blk == pl.num_programs(1) - 1)
    def _():
        out_ref[...] = acc_ref[...].astype(out_ref.dtype)


# ----------------------------------------------------------------------------- wrappers
def mlp3_apply(xs, w0_list, p, *, tile_r, out_dtype=jnp.float32, out_scale=1.0,
               compute_dtype=jnp.float32):
    """Apply a fused 3-layer MLP to row-concatenated inputs WITHOUT materializing the concat.

    xs:       list of [R, d_k] arrays (R already padded to a multiple of tile_r).
    w0_list:  list of [d_k, hid] f32 first-layer weight row-blocks matching xs.
    p:        params dict with b0, w1, b1, w2, b2, gamma, beta, layer_norm.
    """
    r = xs[0].shape[0]
    assert r % tile_r == 0
    hid = p["w1"].shape[0]
    dout = p["w2"].shape[1]
    n_in = len(xs)
    cd = compute_dtype

    w0s = [w.astype(cd) for w in w0_list]   # pre-cast weights (halves weight DMA in bf16)
    w1 = p["w1"].astype(cd)
    w2 = p["w2"].astype(cd)

    kernel = functools.partial(_mlp3_kernel, n_in=n_in, layer_norm=p["layer_norm"],
                               out_scale=out_scale, compute_dtype=cd)
    full = lambda i: (0, 0)
    row = lambda i: (i, 0)
    in_specs = (
        [pl.BlockSpec((tile_r, x.shape[1]), row) for x in xs]
        + [pl.BlockSpec(tuple(w.shape), full) for w in w0s]
        + [pl.BlockSpec((1, hid), full),        # b0
           pl.BlockSpec((hid, hid), full),      # w1
           pl.BlockSpec((1, hid), full),        # b1
           pl.BlockSpec((hid, dout), full),     # w2
           pl.BlockSpec((1, dout), full),       # b2
           pl.BlockSpec((1, dout), full),       # gamma
           pl.BlockSpec((1, dout), full)]       # beta
    )
    return pl.pallas_call(
        kernel,
        out_shape=jax.ShapeDtypeStruct((r, dout), out_dtype),
        grid_spec=pltpu.PrefetchScalarGridSpec(
            num_scalar_prefetch=0,
            grid=(r // tile_r,),
            in_specs=in_specs,
            out_specs=pl.BlockSpec((tile_r, dout), row),
        ),
        compiler_params=pltpu.CompilerParams(
            dimension_semantics=("parallel",),
            vmem_limit_bytes=VMEM_LIMIT),
    )(*xs, *w0s, p["b0"], w1, p["b1"], w2, p["b2"], p["gamma"], p["beta"])


def scatter_add(recv_row, edges, npad, *, tile_n, tile_e, out_dtype=jnp.bfloat16):
    """zeros([npad, D]).scatter_add(0, receivers, edges) via Pallas one-hot matmul.

    recv_row: (1, epad) int32, padded entries set to -1 (never match a node id).
    edges:    (epad, D) bf16/f32, rows already padded.
    """
    epad, d = edges.shape
    assert npad % tile_n == 0 and epad % tile_e == 0

    return pl.pallas_call(
        functools.partial(_scatter_add_kernel, tile_n=tile_n),
        out_shape=jax.ShapeDtypeStruct((npad, d), out_dtype),
        grid_spec=pltpu.PrefetchScalarGridSpec(
            num_scalar_prefetch=0,
            grid=(npad // tile_n, epad // tile_e),
            in_specs=[
                pl.BlockSpec((1, tile_e), lambda n, e: (0, e)),
                pl.BlockSpec((tile_e, d), lambda n, e: (e, 0)),
            ],
            out_specs=pl.BlockSpec((tile_n, d), lambda n, e: (n, 0)),
            scratch_shapes=[pltpu.VMEM((tile_n, d), jnp.float32)],
        ),
        compiler_params=pltpu.CompilerParams(
            dimension_semantics=("parallel", "arbitrary"),
            vmem_limit_bytes=VMEM_LIMIT),
    )(recv_row, edges)


# ----------------------------------------------------------------------------- params
def _init_linear(key, din, dout):
    kw, kb = jax.random.split(key)
    bound = 1.0 / (din ** 0.5)
    w = jax.random.uniform(kw, (din, dout), jnp.float32, -bound, bound)
    b = jax.random.uniform(kb, (1, dout), jnp.float32, -bound, bound)
    return w, b


def _init_mlp(key, din, hidden_dim, dout, layer_norm):
    k0, k1, k2 = jax.random.split(key, 3)
    w0, b0 = _init_linear(k0, din, hidden_dim)
    w1, b1 = _init_linear(k1, hidden_dim, hidden_dim)
    w2, b2 = _init_linear(k2, hidden_dim, dout)
    return {"w0": w0, "b0": b0, "w1": w1, "b1": b1, "w2": w2, "b2": b2,
            "gamma": jnp.ones((1, dout), jnp.float32),
            "beta": jnp.zeros((1, dout), jnp.float32),
            "layer_norm": layer_norm}


def init_graph_network(key, *, node_dim=6, edge_dim=1, mp_steps=8,
                       proc_hidden_dim=128, encoder_hidden_dim=16,
                       decoder_hidden_dim=16, dim=3, ve_dim=128, ee_dim=128):
    keys = jax.random.split(key, 3 + 2 * max(mp_steps, 1))
    params = {
        "node_encoder": _init_mlp(keys[0], node_dim, encoder_hidden_dim, ve_dim, True),
        "edge_encoder": _init_mlp(keys[1], edge_dim, encoder_hidden_dim, ee_dim, True),
        "decoder": _init_mlp(keys[2], ve_dim, decoder_hidden_dim, dim, False),
        "edge_proc": [], "node_proc": [],
    }
    for i in range(mp_steps):
        params["edge_proc"].append(
            _init_mlp(keys[3 + 2 * i], ee_dim + 2 * ve_dim, proc_hidden_dim, ee_dim, True))
        params["node_proc"].append(
            _init_mlp(keys[4 + 2 * i], ee_dim + ve_dim, proc_hidden_dim, ve_dim, True))
    return params


# ----------------------------------------------------------------------------- forward
def graph_network_forward(params, nodes, edges, senders, receivers):
    n_nodes, _ = nodes.shape
    n_edges, _ = edges.shape
    npad, tile_n = _row_tiling(n_nodes)
    epad, tile_e = _row_tiling(n_edges)

    # --- pad once, hoisted out of the message-passing loop -----------------------------
    nodes_p = jnp.pad(nodes, ((0, npad - n_nodes), (0, 0)))
    edges_p = jnp.pad(edges, ((0, epad - n_edges), (0, 0)))
    senders = senders.astype(jnp.int32)
    receivers = receivers.astype(jnp.int32)
    send_g = jnp.zeros((epad,), jnp.int32).at[:n_edges].set(senders)          # gather pad=0
    recv_g = jnp.zeros((epad,), jnp.int32).at[:n_edges].set(receivers)        # gather pad=0
    recv_s = jnp.full((1, epad), -1, jnp.int32).at[0, :n_edges].set(receivers)  # scatter

    # --- encode (tiny K, runs once: f32 compute, bf16 latent output) --------------------
    pe = params["node_encoder"]
    nodes_p = mlp3_apply([nodes_p], [pe["w0"]], pe, tile_r=tile_n,
                         out_dtype=jnp.bfloat16)
    pe = params["edge_encoder"]
    edges_p = mlp3_apply([edges_p], [pe["w0"]], pe, tile_r=tile_e,
                         out_dtype=jnp.bfloat16)

    ve = nodes_p.shape[1]
    ee = edges_p.shape[1]

    # --- process (message passing); all latents live in HBM as bf16 ---------------------
    for i, (ep, np_) in enumerate(zip(params["edge_proc"], params["node_proc"])):
        # phi_e: gather sender/receiver node states (bf16 table -> bf16 gathered rows),
        # fused edge MLP with split w0 (no [E, ee+2*ve] concat tensor in HBM).
        s = jnp.take(nodes_p, send_g, axis=0)
        r = jnp.take(nodes_p, recv_g, axis=0)
        w0e = ep["w0"][:ee]
        if i > 0:
            # Fold the previous step's aliased `edges += edges` (exact x2) into the edge
            # block of this step's first-layer weight: dot(2e, W) == dot(e, 2W).
            w0e = w0e * 2.0
        w0s = ep["w0"][ee:ee + ve]
        w0r = ep["w0"][ee + ve:]
        edges_p = mlp3_apply([edges_p, s, r], [w0e, w0s, w0r], ep, tile_r=tile_e,
                             compute_dtype=jnp.bfloat16, out_dtype=jnp.bfloat16)

        # phi_v: scatter-add the FRESH (undoubled) edge states onto receiver nodes
        # (matches reference ordering: phi_v runs before the aliased doubling),
        # then fused node MLP with split w0.
        scattered = scatter_add(recv_s, edges_p, npad, tile_n=tile_n, tile_e=tile_e)
        w0n = np_["w0"][:ve]
        w0sc = np_["w0"][ve:]
        # out_scale=2.0 folds the aliased `nodes += nodes` (exact x2, post-LayerNorm)
        # into the epilogue — exact in bf16 as well.
        nodes_p = mlp3_apply([nodes_p, scattered], [w0n, w0sc], np_, tile_r=tile_n,
                             out_scale=2.0, compute_dtype=jnp.bfloat16,
                             out_dtype=jnp.bfloat16)
        # (Final-step edge doubling is dropped: edges are not consumed after the last step.)

    # --- decode (f32 compute for the final output) ---------------------------------------
    pd = params["decoder"]
    out = mlp3_apply([nodes_p], [pd["w0"]], pd, tile_r=tile_n, out_dtype=jnp.float32)
    return out[:n_nodes]


# ----------------------------------------------------------------------------- main
if __name__ == "__main__":
    key = jax.random.PRNGKey(0)
    N, E = 64, 128                 # small graph
    node_dim, edge_dim, out_dim = 6, 1, 3
    mp_steps = 2                   # small number of message-passing steps for the demo

    k_n, k_e, k_s, k_r, k_p = jax.random.split(key, 5)
    nodes = jax.random.normal(k_n, (N, node_dim), jnp.float32)
    edges = jax.random.normal(k_e, (E, edge_dim), jnp.float32)
    senders = jax.random.randint(k_s, (E,), 0, N, jnp.int32)
    receivers = jax.random.randint(k_r, (E,), 0, N, jnp.int32)

    params = init_graph_network(k_p, node_dim=node_dim, edge_dim=edge_dim,
                                mp_steps=mp_steps, dim=out_dim)

    fwd = jax.jit(lambda n, e, s, r: graph_network_forward(params, n, e, s, r))
    out = fwd(nodes, edges, senders, receivers)
    out = jax.block_until_ready(out)
    assert out.shape == (N, out_dim)
    assert bool(jnp.all(jnp.isfinite(out)))
    print("KERNEL_OK")
</pallas_src>

<mosaic_0001>
module attributes {stable_mosaic.version = 11 : i64} {
  func.func @_mlp3_kernel(%arg0: i32, %arg1: memref<128x1xf32, #tpu.memory_space<vmem>>, %arg2: memref<1x16xf32, #tpu.memory_space<vmem>>, %arg3: memref<1x16xf32, #tpu.memory_space<vmem>>, %arg4: memref<16x16xf32, #tpu.memory_space<vmem>>, %arg5: memref<1x16xf32, #tpu.memory_space<vmem>>, %arg6: memref<16x128xf32, #tpu.memory_space<vmem>>, %arg7: memref<1x128xf32, #tpu.memory_space<vmem>>, %arg8: memref<1x128xf32, #tpu.memory_space<vmem>>, %arg9: memref<1x128xf32, #tpu.memory_space<vmem>>, %arg10: memref<128x128xbf16, #tpu.memory_space<vmem>>) attributes {dimension_semantics = [#tpu.dimension_semantics<parallel>], iteration_bounds = array<i64: 1>, scalar_prefetch = 0 : i64, scratch_operands = 0 : i64, tpu.core_type = #tpu.core_type<tc>, window_params = [{transform_indices = @transform_0, window_bounds = array<i64: 128, 1>}, {pipeline_mode = #tpu.pipeline_mode<synchronous>, transform_indices = @transform_1, window_bounds = array<i64: 1, 16>}, {pipeline_mode = #tpu.pipeline_mode<synchronous>, transform_indices = @transform_2, window_bounds = array<i64: 1, 16>}, {pipeline_mode = #tpu.pipeline_mode<synchronous>, transform_indices = @transform_3, window_bounds = array<i64: 16, 16>}, {pipeline_mode = #tpu.pipeline_mode<synchronous>, transform_indices = @transform_4, window_bounds = array<i64: 1, 16>}, {pipeline_mode = #tpu.pipeline_mode<synchronous>, transform_indices = @transform_5, window_bounds = array<i64: 16, 128>}, {pipeline_mode = #tpu.pipeline_mode<synchronous>, transform_indices = @transform_6, window_bounds = array<i64: 1, 128>}, {pipeline_mode = #tpu.pipeline_mode<synchronous>, transform_indices = @transform_7, window_bounds = array<i64: 1, 128>}, {pipeline_mode = #tpu.pipeline_mode<synchronous>, transform_indices = @transform_8, window_bounds = array<i64: 1, 128>}, {transform_indices = @transform_9, window_bounds = array<i64: 128, 128>}]} {
    %c0 = arith.constant 0 : index
    %c0_0 = arith.constant 0 : index
    %0 = vector.load %arg1[%c0, %c0_0] : memref<128x1xf32, #tpu.memory_space<vmem>>, vector<128x1xf32>
    %c0_1 = arith.constant 0 : index
    %c0_2 = arith.constant 0 : index
    %1 = vector.load %arg2[%c0_1, %c0_2] : memref<1x16xf32, #tpu.memory_space<vmem>>, vector<1x16xf32>
    %cst = arith.constant dense<0.000000e+00> : vector<128x16xf32>
    %2 = tpu.matmul %0, %1, %cst {dimension_numbers = #tpu.dot_dimension_numbers<[1], [0], [0], [1], [0, 0, 1, 1], [], []>} : vector<128x1xf32>, vector<1x16xf32>, vector<128x16xf32> -> vector<128x16xf32>
    %c0_3 = arith.constant 0 : index
    %c0_4 = arith.constant 0 : index
    %3 = vector.load %arg3[%c0_3, %c0_4] : memref<1x16xf32, #tpu.memory_space<vmem>>, vector<1x16xf32>
    %4 = vector.broadcast %3 : vector<1x16xf32> to vector<128x16xf32>
    %5 = arith.addf %2, %4 : vector<128x16xf32>
    %cst_5 = arith.constant 0.000000e+00 : f32
    %6 = vector.broadcast %cst_5 : f32 to vector<128x16xf32>
    %7 = arith.maximumf %5, %6 : vector<128x16xf32>
    %c0_6 = arith.constant 0 : index
    %c0_7 = arith.constant 0 : index
    %8 = vector.load %arg4[%c0_6, %c0_7] : memref<16x16xf32, #tpu.memory_space<vmem>>, vector<16x16xf32>
    %cst_8 = arith.constant dense<0.000000e+00> : vector<128x16xf32>
    %9 = tpu.matmul %7, %8, %cst_8 {dimension_numbers = #tpu.dot_dimension_numbers<[1], [0], [0], [1], [0, 0, 1, 1], [], []>} : vector<128x16xf32>, vector<16x16xf32>, vector<128x16xf32> -> vector<128x16xf32>
    %c0_9 = arith.constant 0 : index
    %c0_10 = arith.constant 0 : index
    %10 = vector.load %arg5[%c0_9, %c0_10] : memref<1x16xf32, #tpu.memory_space<vmem>>, vector<1x16xf32>
    %11 = vector.broadcast %10 : vector<1x16xf32> to vector<128x16xf32>
    %12 = arith.addf %9, %11 : vector<128x16xf32>
    %cst_11 = arith.constant 0.000000e+00 : f32
    %13 = vector.broadcast %cst_11 : f32 to vector<128x16xf32>
    %14 = arith.maximumf %12, %13 : vector<128x16xf32>
    %c0_12 = arith.constant 0 : index
    %c0_13 = arith.constant 0 : index
    %15 = vector.load %arg6[%c0_12, %c0_13] : memref<16x128xf32, #tpu.memory_space<vmem>>, vector<16x128xf32>
    %cst_14 = arith.constant dense<0.000000e+00> : vector<128x128xf32>
    %16 = tpu.matmul %14, %15, %cst_14 {dimension_numbers = #tpu.dot_dimension_numbers<[1], [0], [0], [1], [0, 0, 1, 1], [], []>} : vector<128x16xf32>, vector<16x128xf32>, vector<128x128xf32> -> vector<128x128xf32>
    %c0_15 = arith.constant 0 : index
    %c0_16 = arith.constant 0 : index
    %17 = vector.load %arg7[%c0_15, %c0_16] : memref<1x128xf32, #tpu.memory_space<vmem>>, vector<1x128xf32>
    %18 = vector.broadcast %17 : vector<1x128xf32> to vector<128x128xf32>
    %19 = arith.addf %16, %18 : vector<128x128xf32>
    %cst_17 = arith.constant dense<0.000000e+00> : vector<128xf32>
    %20 = vector.multi_reduction <add>, %19, %cst_17 [1] : vector<128x128xf32> to vector<128xf32>
    %21 = vector.shape_cast %20 : vector<128xf32> to vector<128x1xf32>
    %cst_18 = arith.constant 1.280000e+02 : f32
    %22 = vector.broadcast %cst_18 : f32 to vector<128x1xf32>
    %23 = arith.divf %21, %22 : vector<128x1xf32>
    %24 = vector.broadcast %23 : vector<128x1xf32> to vector<128x128xf32>
    %25 = arith.subf %19, %24 : vector<128x128xf32>
    %26 = arith.mulf %25, %25 : vector<128x128xf32>
    %cst_19 = arith.constant dense<0.000000e+00> : vector<128xf32>
    %27 = vector.multi_reduction <add>, %26, %cst_19 [1] : vector<128x128xf32> to vector<128xf32>
    %28 = vector.shape_cast %27 : vector<128xf32> to vector<128x1xf32>
    %cst_20 = arith.constant 1.280000e+02 : f32
    %29 = vector.broadcast %cst_20 : f32 to vector<128x1xf32>
    %30 = arith.divf %28, %29 : vector<128x1xf32>
    %31 = vector.broadcast %23 : vector<128x1xf32> to vector<128x128xf32>
    %32 = arith.subf %19, %31 : vector<128x128xf32>
    %cst_21 = arith.constant 9.99999974E-6 : f32
    %33 = vector.broadcast %cst_21 : f32 to vector<128x1xf32>
    %34 = arith.addf %30, %33 : vector<128x1xf32>
    %35 = math.rsqrt %34 : vector<128x1xf32>
    %36 = vector.broadcast %35 : vector<128x1xf32> to vector<128x128xf32>
    %37 = arith.mulf %32, %36 : vector<128x128xf32>
    %c0_22 = arith.constant 0 : index
    %c0_23 = arith.constant 0 : index
    %38 = vector.load %arg8[%c0_22, %c0_23] : memref<1x128xf32, #tpu.memory_space<vmem>>, vector<1x128xf32>
    %39 = vector.broadcast %38 : vector<1x128xf32> to vector<128x128xf32>
    %40 = arith.mulf %37, %39 : vector<128x128xf32>
    %c0_24 = arith.constant 0 : index
    %c0_25 = arith.constant 0 : index
    %41 = vector.load %arg9[%c0_24, %c0_25] : memref<1x128xf32, #tpu.memory_space<vmem>>, vector<1x128xf32>
    %42 = vector.broadcast %41 : vector<1x128xf32> to vector<128x128xf32>
    %43 = arith.addf %40, %42 : vector<128x128xf32>
    %44 = arith.truncf %43 : vector<128x128xf32> to vector<128x128xbf16>
    %c0_26 = arith.constant 0 : index
    %c0_27 = arith.constant 0 : index
    %45 = vector.load %arg10[%c0_26, %c0_27] : memref<128x128xbf16, #tpu.memory_space<vmem>>, vector<128x128xbf16>
    tpu.vector_store %arg10[%c0_26, %c0_27], %44 {strides = array<i32>} : memref<128x128xbf16, #tpu.memory_space<vmem>>, vector<128x128xbf16>,
    return
  }
  func.func @transform_0(%arg0: i32) -> (i32, i32) {
    %c0_i32 = arith.constant 0 : i32
    %c0_i32_0 = arith.constant 0 : i32
    return %arg0, %c0_i32 : i32, i32
  }
  func.func @transform_1(%arg0: i32) -> (i32, i32) {
    %c0_i32 = arith.constant 0 : i32
    %c0_i32_0 = arith.constant 0 : i32
    %c0_i32_1 = arith.constant 0 : i32
    return %c0_i32, %c0_i32_0 : i32, i32
  }
  func.func @transform_2(%arg0: i32) -> (i32, i32) {
    %c0_i32 = arith.constant 0 : i32
    %c0_i32_0 = arith.constant 0 : i32
    %c0_i32_1 = arith.constant 0 : i32
    return %c0_i32, %c0_i32_0 : i32, i32
  }
  func.func @transform_3(%arg0: i32) -> (i32, i32) {
    %c0_i32 = arith.constant 0 : i32
    %c0_i32_0 = arith.constant 0 : i32
    %c0_i32_1 = arith.constant 0 : i32
    return %c0_i32, %c0_i32_0 : i32, i32
  }
  func.func @transform_4(%arg0: i32) -> (i32, i32) {
    %c0_i32 = arith.constant 0 : i32
    %c0_i32_0 = arith.constant 0 : i32
    %c0_i32_1 = arith.constant 0 : i32
    return %c0_i32, %c0_i32_0 : i32, i32
  }
  func.func @transform_5(%arg0: i32) -> (i32, i32) {
    %c0_i32 = arith.constant 0 : i32
    %c0_i32_0 = arith.constant 0 : i32
    %c0_i32_1 = arith.constant 0 : i32
    return %c0_i32, %c0_i32_0 : i32, i32
  }
  func.func @transform_6(%arg0: i32) -> (i32, i32) {
    %c0_i32 = arith.constant 0 : i32
    %c0_i32_0 = arith.constant 0 : i32
    %c0_i32_1 = arith.constant 0 : i32
    return %c0_i32, %c0_i32_0 : i32, i32
  }
  func.func @transform_7(%arg0: i32) -> (i32, i32) {
    %c0_i32 = arith.constant 0 : i32
    %c0_i32_0 = arith.constant 0 : i32
    %c0_i32_1 = arith.constant 0 : i32
    return %c0_i32, %c0_i32_0 : i32, i32
  }
  func.func @transform_8(%arg0: i32) -> (i32, i32) {
    %c0_i32 = arith.constant 0 : i32
    %c0_i32_0 = arith.constant 0 : i32
    %c0_i32_1 = arith.constant 0 : i32
    return %c0_i32, %c0_i32_0 : i32, i32
  }
  func.func @transform_9(%arg0: i32) -> (i32, i32) {
    %c0_i32 = arith.constant 0 : i32
    %c0_i32_0 = arith.constant 0 : i32
    return %arg0, %c0_i32 : i32, i32
  }
}

module attributes {stable_mosaic.version = 11 : i64} {
  func.func @_mlp3_kernel(%arg0: i32, %arg1: memref<64x6xf32, #tpu.memory_space<vmem>>, %arg2: memref<6x16xf32, #tpu.memory_space<vmem>>, %arg3: memref<1x16xf32, #tpu.memory_space<vmem>>, %arg4: memref<16x16xf32, #tpu.memory_space<vmem>>, %arg5: memref<1x16xf32, #tpu.memory_space<vmem>>, %arg6: memref<16x128xf32, #tpu.memory_space<vmem>>, %arg7: memref<1x128xf32, #tpu.memory_space<vmem>>, %arg8: memref<1x128xf32, #tpu.memory_space<vmem>>, %arg9: memref<1x128xf32, #tpu.memory_space<vmem>>, %arg10: memref<64x128xbf16, #tpu.memory_space<vmem>>) attributes {dimension_semantics = [#tpu.dimension_semantics<parallel>], iteration_bounds = array<i64: 1>, scalar_prefetch = 0 : i64, scratch_operands = 0 : i64, tpu.core_type = #tpu.core_type<tc>, window_params = [{transform_indices = @transform_0, window_bounds = array<i64: 64, 6>}, {pipeline_mode = #tpu.pipeline_mode<synchronous>, transform_indices = @transform_1, window_bounds = array<i64: 6, 16>}, {pipeline_mode = #tpu.pipeline_mode<synchronous>, transform_indices = @transform_2, window_bounds = array<i64: 1, 16>}, {pipeline_mode = #tpu.pipeline_mode<synchronous>, transform_indices = @transform_3, window_bounds = array<i64: 16, 16>}, {pipeline_mode = #tpu.pipeline_mode<synchronous>, transform_indices = @transform_4, window_bounds = array<i64: 1, 16>}, {pipeline_mode = #tpu.pipeline_mode<synchronous>, transform_indices = @transform_5, window_bounds = array<i64: 16, 128>}, {pipeline_mode = #tpu.pipeline_mode<synchronous>, transform_indices = @transform_6, window_bounds = array<i64: 1, 128>}, {pipeline_mode = #tpu.pipeline_mode<synchronous>, transform_indices = @transform_7, window_bounds = array<i64: 1, 128>}, {pipeline_mode = #tpu.pipeline_mode<synchronous>, transform_indices = @transform_8, window_bounds = array<i64: 1, 128>}, {transform_indices = @transform_9, window_bounds = array<i64: 64, 128>}]} {
    %c0 = arith.constant 0 : index
    %c0_0 = arith.constant 0 : index
    %0 = vector.load %arg1[%c0, %c0_0] : memref<64x6xf32, #tpu.memory_space<vmem>>, vector<64x6xf32>
    %c0_1 = arith.constant 0 : index
    %c0_2 = arith.constant 0 : index
    %1 = vector.load %arg2[%c0_1, %c0_2] : memref<6x16xf32, #tpu.memory_space<vmem>>, vector<6x16xf32>
    %cst = arith.constant dense<0.000000e+00> : vector<64x16xf32>
    %2 = tpu.matmul %0, %1, %cst {dimension_numbers = #tpu.dot_dimension_numbers<[1], [0], [0], [1], [0, 0, 1, 1], [], []>} : vector<64x6xf32>, vector<6x16xf32>, vector<64x16xf32> -> vector<64x16xf32>
    %c0_3 = arith.constant 0 : index
    %c0_4 = arith.constant 0 : index
    %3 = vector.load %arg3[%c0_3, %c0_4] : memref<1x16xf32, #tpu.memory_space<vmem>>, vector<1x16xf32>
    %4 = vector.broadcast %3 : vector<1x16xf32> to vector<64x16xf32>
    %5 = arith.addf %2, %4 : vector<64x16xf32>
    %cst_5 = arith.constant 0.000000e+00 : f32
    %6 = vector.broadcast %cst_5 : f32 to vector<64x16xf32>
    %7 = arith.maximumf %5, %6 : vector<64x16xf32>
    %c0_6 = arith.constant 0 : index
    %c0_7 = arith.constant 0 : index
    %8 = vector.load %arg4[%c0_6, %c0_7] : memref<16x16xf32, #tpu.memory_space<vmem>>, vector<16x16xf32>
    %cst_8 = arith.constant dense<0.000000e+00> : vector<64x16xf32>
    %9 = tpu.matmul %7, %8, %cst_8 {dimension_numbers = #tpu.dot_dimension_numbers<[1], [0], [0], [1], [0, 0, 1, 1], [], []>} : vector<64x16xf32>, vector<16x16xf32>, vector<64x16xf32> -> vector<64x16xf32>
    %c0_9 = arith.constant 0 : index
    %c0_10 = arith.constant 0 : index
    %10 = vector.load %arg5[%c0_9, %c0_10] : memref<1x16xf32, #tpu.memory_space<vmem>>, vector<1x16xf32>
    %11 = vector.broadcast %10 : vector<1x16xf32> to vector<64x16xf32>
    %12 = arith.addf %9, %11 : vector<64x16xf32>
    %cst_11 = arith.constant 0.000000e+00 : f32
    %13 = vector.broadcast %cst_11 : f32 to vector<64x16xf32>
    %14 = arith.maximumf %12, %13 : vector<64x16xf32>
    %c0_12 = arith.constant 0 : index
    %c0_13 = arith.constant 0 : index
    %15 = vector.load %arg6[%c0_12, %c0_13] : memref<16x128xf32, #tpu.memory_space<vmem>>, vector<16x128xf32>
    %cst_14 = arith.constant dense<0.000000e+00> : vector<64x128xf32>
    %16 = tpu.matmul %14, %15, %cst_14 {dimension_numbers = #tpu.dot_dimension_numbers<[1], [0], [0], [1], [0, 0, 1, 1], [], []>} : vector<64x16xf32>, vector<16x128xf32>, vector<64x128xf32> -> vector<64x128xf32>
    %c0_15 = arith.constant 0 : index
    %c0_16 = arith.constant 0 : index
    %17 = vector.load %arg7[%c0_15, %c0_16] : memref<1x128xf32, #tpu.memory_space<vmem>>, vector<1x128xf32>
    %18 = vector.broadcast %17 : vector<1x128xf32> to vector<64x128xf32>
    %19 = arith.addf %16, %18 : vector<64x128xf32>
    %cst_17 = arith.constant dense<0.000000e+00> : vector<64xf32>
    %20 = vector.multi_reduction <add>, %19, %cst_17 [1] : vector<64x128xf32> to vector<64xf32>
    %21 = vector.shape_cast %20 : vector<64xf32> to vector<64x1xf32>
    %cst_18 = arith.constant 1.280000e+02 : f32
    %22 = vector.broadcast %cst_18 : f32 to vector<64x1xf32>
    %23 = arith.divf %21, %22 : vector<64x1xf32>
    %24 = vector.broadcast %23 : vector<64x1xf32> to vector<64x128xf32>
    %25 = arith.subf %19, %24 : vector<64x128xf32>
    %26 = arith.mulf %25, %25 : vector<64x128xf32>
    %cst_19 = arith.constant dense<0.000000e+00> : vector<64xf32>
    %27 = vector.multi_reduction <add>, %26, %cst_19 [1] : vector<64x128xf32> to vector<64xf32>
    %28 = vector.shape_cast %27 : vector<64xf32> to vector<64x1xf32>
    %cst_20 = arith.constant 1.280000e+02 : f32
    %29 = vector.broadcast %cst_20 : f32 to vector<64x1xf32>
    %30 = arith.divf %28, %29 : vector<64x1xf32>
    %31 = vector.broadcast %23 : vector<64x1xf32> to vector<64x128xf32>
    %32 = arith.subf %19, %31 : vector<64x128xf32>
    %cst_21 = arith.constant 9.99999974E-6 : f32
    %33 = vector.broadcast %cst_21 : f32 to vector<64x1xf32>
    %34 = arith.addf %30, %33 : vector<64x1xf32>
    %35 = math.rsqrt %34 : vector<64x1xf32>
    %36 = vector.broadcast %35 : vector<64x1xf32> to vector<64x128xf32>
    %37 = arith.mulf %32, %36 : vector<64x128xf32>
    %c0_22 = arith.constant 0 : index
    %c0_23 = arith.constant 0 : index
    %38 = vector.load %arg8[%c0_22, %c0_23] : memref<1x128xf32, #tpu.memory_space<vmem>>, vector<1x128xf32>
    %39 = vector.broadcast %38 : vector<1x128xf32> to vector<64x128xf32>
    %40 = arith.mulf %37, %39 : vector<64x128xf32>
    %c0_24 = arith.constant 0 : index
    %c0_25 = arith.constant 0 : index
    %41 = vector.load %arg9[%c0_24, %c0_25] : memref<1x128xf32, #tpu.memory_space<vmem>>, vector<1x128xf32>
    %42 = vector.broadcast %41 : vector<1x128xf32> to vector<64x128xf32>
    %43 = arith.addf %40, %42 : vector<64x128xf32>
    %44 = arith.truncf %43 : vector<64x128xf32> to vector<64x128xbf16>
    %c0_26 = arith.constant 0 : index
    %c0_27 = arith.constant 0 : index
    %45 = vector.load %arg10[%c0_26, %c0_27] : memref<64x128xbf16, #tpu.memory_space<vmem>>, vector<64x128xbf16>
    tpu.vector_store %arg10[%c0_26, %c0_27], %44 {strides = array<i32>} : memref<64x128xbf16, #tpu.memory_space<vmem>>, vector<64x128xbf16>,
    return
  }
  func.func @transform_0(%arg0: i32) -> (i32, i32) {
    %c0_i32 = arith.constant 0 : i32
    %c0_i32_0 = arith.constant 0 : i32
    return %arg0, %c0_i32 : i32, i32
  }
  func.func @transform_1(%arg0: i32) -> (i32, i32) {
    %c0_i32 = arith.constant 0 : i32
    %c0_i32_0 = arith.constant 0 : i32
    %c0_i32_1 = arith.constant 0 : i32
    return %c0_i32, %c0_i32_0 : i32, i32
  }
  func.func @transform_2(%arg0: i32) -> (i32, i32) {
    %c0_i32 = arith.constant 0 : i32
    %c0_i32_0 = arith.constant 0 : i32
    %c0_i32_1 = arith.constant 0 : i32
    return %c0_i32, %c0_i32_0 : i32, i32
  }
  func.func @transform_3(%arg0: i32) -> (i32, i32) {
    %c0_i32 = arith.constant 0 : i32
    %c0_i32_0 = arith.constant 0 : i32
    %c0_i32_1 = arith.constant 0 : i32
    return %c0_i32, %c0_i32_0 : i32, i32
  }
  func.func @transform_4(%arg0: i32) -> (i32, i32) {
    %c0_i32 = arith.constant 0 : i32
    %c0_i32_0 = arith.constant 0 : i32
    %c0_i32_1 = arith.constant 0 : i32
    return %c0_i32, %c0_i32_0 : i32, i32
  }
  func.func @transform_5(%arg0: i32) -> (i32, i32) {
    %c0_i32 = arith.constant 0 : i32
    %c0_i32_0 = arith.constant 0 : i32
    %c0_i32_1 = arith.constant 0 : i32
    return %c0_i32, %c0_i32_0 : i32, i32
  }
  func.func @transform_6(%arg0: i32) -> (i32, i32) {
    %c0_i32 = arith.constant 0 : i32
    %c0_i32_0 = arith.constant 0 : i32
    %c0_i32_1 = arith.constant 0 : i32
    return %c0_i32, %c0_i32_0 : i32, i32
  }
  func.func @transform_7(%arg0: i32) -> (i32, i32) {
    %c0_i32 = arith.constant 0 : i32
    %c0_i32_0 = arith.constant 0 : i32
    %c0_i32_1 = arith.constant 0 : i32
    return %c0_i32, %c0_i32_0 : i32, i32
  }
  func.func @transform_8(%arg0: i32) -> (i32, i32) {
    %c0_i32 = arith.constant 0 : i32
    %c0_i32_0 = arith.constant 0 : i32
    %c0_i32_1 = arith.constant 0 : i32
    return %c0_i32, %c0_i32_0 : i32, i32
  }
  func.func @transform_9(%arg0: i32) -> (i32, i32) {
    %c0_i32 = arith.constant 0 : i32
    %c0_i32_0 = arith.constant 0 : i32
    return %arg0, %c0_i32 : i32, i32
  }
}

module attributes {stable_mosaic.version = 11 : i64} {
  func.func @_mlp3_kernel(%arg0: i32, %arg1: memref<128x128xbf16, #tpu.memory_space<vmem>>, %arg2: memref<128x128xbf16, #tpu.memory_space<vmem>>, %arg3: memref<128x128xbf16, #tpu.memory_space<vmem>>, %arg4: memref<128x128xbf16, #tpu.memory_space<vmem>>, %arg5: memref<128x128xbf16, #tpu.memory_space<vmem>>, %arg6: memref<128x128xbf16, #tpu.memory_space<vmem>>, %arg7: memref<1x128xf32, #tpu.memory_space<vmem>>, %arg8: memref<128x128xbf16, #tpu.memory_space<vmem>>, %arg9: memref<1x128xf32, #tpu.memory_space<vmem>>, %arg10: memref<128x128xbf16, #tpu.memory_space<vmem>>, %arg11: memref<1x128xf32, #tpu.memory_space<vmem>>, %arg12: memref<1x128xf32, #tpu.memory_space<vmem>>, %arg13: memref<1x128xf32, #tpu.memory_space<vmem>>, %arg14: memref<128x128xbf16, #tpu.memory_space<vmem>>) attributes {dimension_semantics = [#tpu.dimension_semantics<parallel>], iteration_bounds = array<i64: 1>, scalar_prefetch = 0 : i64, scratch_operands = 0 : i64, tpu.core_type = #tpu.core_type<tc>, window_params = [{transform_indices = @transform_0, window_bounds = array<i64: 128, 128>}, {transform_indices = @transform_1, window_bounds = array<i64: 128, 128>}, {transform_indices = @transform_2, window_bounds = array<i64: 128, 128>}, {pipeline_mode = #tpu.pipeline_mode<synchronous>, transform_indices = @transform_3, window_bounds = array<i64: 128, 128>}, {pipeline_mode = #tpu.pipeline_mode<synchronous>, transform_indices = @transform_4, window_bounds = array<i64: 128, 128>}, {pipeline_mode = #tpu.pipeline_mode<synchronous>, transform_indices = @transform_5, window_bounds = array<i64: 128, 128>}, {pipeline_mode = #tpu.pipeline_mode<synchronous>, transform_indices = @transform_6, window_bounds = array<i64: 1, 128>}, {pipeline_mode = #tpu.pipeline_mode<synchronous>, transform_indices = @transform_7, window_bounds = array<i64: 128, 128>}, {pipeline_mode = #tpu.pipeline_mode<synchronous>, transform_indices = @transform_8, window_bounds = array<i64: 1, 128>}, {pipeline_mode = #tpu.pipeline_mode<synchronous>, transform_indices = @transform_9, window_bounds = array<i64: 128, 128>}, {pipeline_mode = #tpu.pipeline_mode<synchronous>, transform_indices = @transform_10, window_bounds = array<i64: 1, 128>}, {pipeline_mode = #tpu.pipeline_mode<synchronous>, transform_indices = @transform_11, window_bounds = array<i64: 1, 128>}, {pipeline_mode = #tpu.pipeline_mode<synchronous>, transform_indices = @transform_12, window_bounds = array<i64: 1, 128>}, {transform_indices = @transform_13, window_bounds = array<i64: 128, 128>}]} {
    %c0 = arith.constant 0 : index
    %c0_0 = arith.constant 0 : index
    %0 = vector.load %arg1[%c0, %c0_0] : memref<128x128xbf16, #tpu.memory_space<vmem>>, vector<128x128xbf16>
    %c0_1 = arith.constant 0 : index
    %c0_2 = arith.constant 0 : index
    %1 = vector.load %arg4[%c0_1, %c0_2] : memref<128x128xbf16, #tpu.memory_space<vmem>>, vector<128x128xbf16>
    %cst = arith.constant dense<0.000000e+00> : vector<128x128xf32>
    %2 = tpu.matmul %0, %1, %cst {dimension_numbers = #tpu.dot_dimension_numbers<[1], [0], [0], [1], [0, 0, 1, 1], [], []>} : vector<128x128xbf16>, vector<128x128xbf16>, vector<128x128xf32> -> vector<128x128xf32>
    %c0_3 = arith.constant 0 : index
    %c0_4 = arith.constant 0 : index
    %3 = vector.load %arg2[%c0_3, %c0_4] : memref<128x128xbf16, #tpu.memory_space<vmem>>, vector<128x128xbf16>
    %c0_5 = arith.constant 0 : index
    %c0_6 = arith.constant 0 : index
    %4 = vector.load %arg5[%c0_5, %c0_6] : memref<128x128xbf16, #tpu.memory_space<vmem>>, vector<128x128xbf16>
    %cst_7 = arith.constant dense<0.000000e+00> : vector<128x128xf32>
    %5 = tpu.matmul %3, %4, %cst_7 {dimension_numbers = #tpu.dot_dimension_numbers<[1], [0], [0], [1], [0, 0, 1, 1], [], []>} : vector<128x128xbf16>, vector<128x128xbf16>, vector<128x128xf32> -> vector<128x128xf32>
    %6 = arith.addf %2, %5 : vector<128x128xf32>
    %c0_8 = arith.constant 0 : index
    %c0_9 = arith.constant 0 : index
    %7 = vector.load %arg3[%c0_8, %c0_9] : memref<128x128xbf16, #tpu.memory_space<vmem>>, vector<128x128xbf16>
    %c0_10 = arith.constant 0 : index
    %c0_11 = arith.constant 0 : index
    %8 = vector.load %arg6[%c0_10, %c0_11] : memref<128x128xbf16, #tpu.memory_space<vmem>>, vector<128x128xbf16>
    %cst_12 = arith.constant dense<0.000000e+00> : vector<128x128xf32>
    %9 = tpu.matmul %7, %8, %cst_12 {dimension_numbers = #tpu.dot_dimension_numbers<[1], [0], [0], [1], [0, 0, 1, 1], [], []>} : vector<128x128xbf16>, vector<128x128xbf16>, vector<128x128xf32> -> vector<128x128xf32>
    %10 = arith.addf %6, %9 : vector<128x128xf32>
    %c0_13 = arith.constant 0 : index
    %c0_14 = arith.constant 0 : index
    %11 = vector.load %arg7[%c0_13, %c0_14] : memref<1x128xf32, #tpu.memory_space<vmem>>, vector<1x128xf32>
    %12 = vector.broadcast %11 : vector<1x128xf32> to vector<128x128xf32>
    %13 = arith.addf %10, %12 : vector<128x128xf32>
    %cst_15 = arith.constant 0.000000e+00 : f32
    %14 = vector.broadcast %cst_15 : f32 to vector<128x128xf32>
    %15 = arith.maximumf %13, %14 : vector<128x128xf32>
    %16 = arith.truncf %15 : vector<128x128xf32> to vector<128x128xbf16>
    %c0_16 = arith.constant 0 : index
    %c0_17 = arith.constant 0 : index
    %17 = vector.load %arg8[%c0_16, %c0_17] : memref<128x128xbf16, #tpu.memory_space<vmem>>, vector<128x128xbf16>
    %cst_18 = arith.constant dense<0.000000e+00> : vector<128x128xf32>
    %18 = tpu.matmul %16, %17, %cst_18 {dimension_numbers = #tpu.dot_dimension_numbers<[1], [0], [0], [1], [0, 0, 1, 1], [], []>} : vector<128x128xbf16>, vector<128x128xbf16>, vector<128x128xf32> -> vector<128x128xf32>
    %c0_19 = arith.constant 0 : index
    %c0_20 = arith.constant 0 : index
    %19 = vector.load %arg9[%c0_19, %c0_20] : memref<1x128xf32, #tpu.memory_space<vmem>>, vector<1x128xf32>
    %20 = vector.broadcast %19 : vector<1x128xf32> to vector<128x128xf32>
    %21 = arith.addf %18, %20 : vector<128x128xf32>
    %cst_21 = arith.constant 0.000000e+00 : f32
    %22 = vector.broadcast %cst_21 : f32 to vector<128x128xf32>
    %23 = arith.maximumf %21, %22 : vector<128x128xf32>
    %24 = arith.truncf %23 : vector<128x128xf32> to vector<128x128xbf16>
    %c0_22 = arith.constant 0 : index
    %c0_23 = arith.constant 0 : index
    %25 = vector.load %arg10[%c0_22, %c0_23] : memref<128x128xbf16, #tpu.memory_space<vmem>>, vector<128x128xbf16>
    %cst_24 = arith.constant dense<0.000000e+00> : vector<128x128xf32>
    %26 = tpu.matmul %24, %25, %cst_24 {dimension_numbers = #tpu.dot_dimension_numbers<[1], [0], [0], [1], [0, 0, 1, 1], [], []>} : vector<128x128xbf16>, vector<128x128xbf16>, vector<128x128xf32> -> vector<128x128xf32>
    %c0_25 = arith.constant 0 : index
    %c0_26 = arith.constant 0 : index
    %27 = vector.load %arg11[%c0_25, %c0_26] : memref<1x128xf32, #tpu.memory_space<vmem>>, vector<1x128xf32>
    %28 = vector.broadcast %27 : vector<1x128xf32> to vector<128x128xf32>
    %29 = arith.addf %26, %28 : vector<128x128xf32>
    %cst_27 = arith.constant dense<0.000000e+00> : vector<128xf32>
    %30 = vector.multi_reduction <add>, %29, %cst_27 [1] : vector<128x128xf32> to vector<128xf32>
    %31 = vector.shape_cast %30 : vector<128xf32> to vector<128x1xf32>
    %cst_28 = arith.constant 1.280000e+02 : f32
    %32 = vector.broadcast %cst_28 : f32 to vector<128x1xf32>
    %33 = arith.divf %31, %32 : vector<128x1xf32>
    %34 = vector.broadcast %33 : vector<128x1xf32> to vector<128x128xf32>
    %35 = arith.subf %29, %34 : vector<128x128xf32>
    %36 = arith.mulf %35, %35 : vector<128x128xf32>
    %cst_29 = arith.constant dense<0.000000e+00> : vector<128xf32>
    %37 = vector.multi_reduction <add>, %36, %cst_29 [1] : vector<128x128xf32> to vector<128xf32>
    %38 = vector.shape_cast %37 : vector<128xf32> to vector<128x1xf32>
    %cst_30 = arith.constant 1.280000e+02 : f32
    %39 = vector.broadcast %cst_30 : f32 to vector<128x1xf32>
    %40 = arith.divf %38, %39 : vector<128x1xf32>
    %41 = vector.broadcast %33 : vector<128x1xf32> to vector<128x128xf32>
    %42 = arith.subf %29, %41 : vector<128x128xf32>
    %cst_31 = arith.constant 9.99999974E-6 : f32
    %43 = vector.broadcast %cst_31 : f32 to vector<128x1xf32>
    %44 = arith.addf %40, %43 : vector<128x1xf32>
    %45 = math.rsqrt %44 : vector<128x1xf32>
    %46 = vector.broadcast %45 : vector<128x1xf32> to vector<128x128xf32>
    %47 = arith.mulf %42, %46 : vector<128x128xf32>
    %c0_32 = arith.constant 0 : index
    %c0_33 = arith.constant 0 : index
    %48 = vector.load %arg12[%c0_32, %c0_33] : memref<1x128xf32, #tpu.memory_space<vmem>>, vector<1x128xf32>
    %49 = vector.broadcast %48 : vector<1x128xf32> to vector<128x128xf32>
    %50 = arith.mulf %47, %49 : vector<128x128xf32>
    %c0_34 = arith.constant 0 : index
    %c0_35 = arith.constant 0 : index
    %51 = vector.load %arg13[%c0_34, %c0_35] : memref<1x128xf32, #tpu.memory_space<vmem>>, vector<1x128xf32>
    %52 = vector.broadcast %51 : vector<1x128xf32> to vector<128x128xf32>
    %53 = arith.addf %50, %52 : vector<128x128xf32>
    %54 = arith.truncf %53 : vector<128x128xf32> to vector<128x128xbf16>
    %c0_36 = arith.constant 0 : index
    %c0_37 = arith.constant 0 : index
    %55 = vector.load %arg14[%c0_36, %c0_37] : memref<128x128xbf16, #tpu.memory_space<vmem>>, vector<128x128xbf16>
    tpu.vector_store %arg14[%c0_36, %c0_37], %54 {strides = array<i32>} : memref<128x128xbf16, #tpu.memory_space<vmem>>, vector<128x128xbf16>,
    return
  }
  func.func @transform_0(%arg0: i32) -> (i32, i32) {
    %c0_i32 = arith.constant 0 : i32
    %c0_i32_0 = arith.constant 0 : i32
    return %arg0, %c0_i32 : i32, i32
  }
  func.func @transform_1(%arg0: i32) -> (i32, i32) {
    %c0_i32 = arith.constant 0 : i32
    %c0_i32_0 = arith.constant 0 : i32
    return %arg0, %c0_i32 : i32, i32
  }
  func.func @transform_2(%arg0: i32) -> (i32, i32) {
    %c0_i32 = arith.constant 0 : i32
    %c0_i32_0 = arith.constant 0 : i32
    return %arg0, %c0_i32 : i32, i32
  }
  func.func @transform_3(%arg0: i32) -> (i32, i32) {
    %c0_i32 = arith.constant 0 : i32
    %c0_i32_0 = arith.constant 0 : i32
    %c0_i32_1 = arith.constant 0 : i32
    return %c0_i32, %c0_i32_0 : i32, i32
  }
  func.func @transform_4(%arg0: i32) -> (i32, i32) {
    %c0_i32 = arith.constant 0 : i32
    %c0_i32_0 = arith.constant 0 : i32
    %c0_i32_1 = arith.constant 0 : i32
    return %c0_i32, %c0_i32_0 : i32, i32
  }
  func.func @transform_5(%arg0: i32) -> (i32, i32) {
    %c0_i32 = arith.constant 0 : i32
    %c0_i32_0 = arith.constant 0 : i32
    %c0_i32_1 = arith.constant 0 : i32
    return %c0_i32, %c0_i32_0 : i32, i32
  }
  func.func @transform_6(%arg0: i32) -> (i32, i32) {
    %c0_i32 = arith.constant 0 : i32
    %c0_i32_0 = arith.constant 0 : i32
    %c0_i32_1 = arith.constant 0 : i32
    return %c0_i32, %c0_i32_0 : i32, i32
  }
  func.func @transform_7(%arg0: i32) -> (i32, i32) {
    %c0_i32 = arith.constant 0 : i32
    %c0_i32_0 = arith.constant 0 : i32
    %c0_i32_1 = arith.constant 0 : i32
    return %c0_i32, %c0_i32_0 : i32, i32
  }
  func.func @transform_8(%arg0: i32) -> (i32, i32) {
    %c0_i32 = arith.constant 0 : i32
    %c0_i32_0 = arith.constant 0 : i32
    %c0_i32_1 = arith.constant 0 : i32
    return %c0_i32, %c0_i32_0 : i32, i32
  }
  func.func @transform_9(%arg0: i32) -> (i32, i32) {
    %c0_i32 = arith.constant 0 : i32
    %c0_i32_0 = arith.constant 0 : i32
    %c0_i32_1 = arith.constant 0 : i32
    return %c0_i32, %c0_i32_0 : i32, i32
  }
  func.func @transform_10(%arg0: i32) -> (i32, i32) {
    %c0_i32 = arith.constant 0 : i32
    %c0_i32_0 = arith.constant 0 : i32
    %c0_i32_1 = arith.constant 0 : i32
    return %c0_i32, %c0_i32_0 : i32, i32
  }
  func.func @transform_11(%arg0: i32) -> (i32, i32) {
    %c0_i32 = arith.constant 0 : i32
    %c0_i32_0 = arith.constant 0 : i32
    %c0_i32_1 = arith.constant 0 : i32
    return %c0_i32, %c0_i32_0 : i32, i32
  }
  func.func @transform_12(%arg0: i32) -> (i32, i32) {
    %c0_i32 = arith.constant 0 : i32
    %c0_i32_0 = arith.constant 0 : i32
    %c0_i32_1 = arith.constant 0 : i32
    return %c0_i32, %c0_i32_0 : i32, i32
  }
  func.func @transform_13(%arg0: i32) -> (i32, i32) {
    %c0_i32 = arith.constant 0 : i32
    %c0_i32_0 = arith.constant 0 : i32
    return %arg0, %c0_i32 : i32, i32
  }
}

module attributes {stable_mosaic.version = 11 : i64} {
  func.func @_scatter_add_kernel(%arg0: i32, %arg1: i32, %arg2: memref<1x128xi32, #tpu.memory_space<vmem>>, %arg3: memref<128x128xbf16, #tpu.memory_space<vmem>>, %arg4: memref<64x128xbf16, #tpu.memory_space<vmem>>, %arg5: memref<64x128xf32, #tpu.memory_space<vmem>>) attributes {dimension_semantics = [#tpu.dimension_semantics<parallel>, #tpu.dimension_semantics<arbitrary>], iteration_bounds = array<i64: 1, 1>, scalar_prefetch = 0 : i64, scratch_operands = 1 : i64, tpu.core_type = #tpu.core_type<tc>, window_params = [{transform_indices = @transform_0, window_bounds = array<i64: 1, 128>}, {transform_indices = @transform_1, window_bounds = array<i64: 128, 128>}, {transform_indices = @transform_2, window_bounds = array<i64: 64, 128>}]} {
    %c0_i32 = arith.constant 0 : i32
    %0 = arith.cmpi eq, %arg1, %c0_i32 : i32
    %1 = arith.extui %0 : i1 to i32
    %c0_i32_0 = arith.constant 0 : i32
    %2 = arith.cmpi ne, %1, %c0_i32_0 : i32
    scf.if %2 {
      %cst_10 = arith.constant 0.000000e+00 : f32
      %22 = vector.broadcast %cst_10 : f32 to vector<64x128xf32>
      %c0_11 = arith.constant 0 : index
      %c0_12 = arith.constant 0 : index
      %23 = vector.load %arg5[%c0_11, %c0_12] : memref<64x128xf32, #tpu.memory_space<vmem>>, vector<64x128xf32>
      tpu.vector_store %arg5[%c0_11, %c0_12], %22 {strides = array<i32>} : memref<64x128xf32, #tpu.memory_space<vmem>>, vector<64x128xf32>,
    } else {
    }
    %c0 = arith.constant 0 : index
    %c0_1 = arith.constant 0 : index
    %3 = vector.load %arg2[%c0, %c0_1] : memref<1x128xi32, #tpu.memory_space<vmem>>, vector<1x128xi32>
    %4 = tpu.iota {dimensions = array<i32: 0>} : vector<64x1xi32>
    %c64_i32 = arith.constant 64 : i32
    %5 = arith.muli %arg0, %c64_i32 : i32
    %6 = vector.broadcast %5 : i32 to vector<64x1xi32>
    %7 = arith.addi %4, %6 : vector<64x1xi32>
    %8 = vector.broadcast %7 : vector<64x1xi32> to vector<64x128xi32>
    %9 = vector.broadcast %3 : vector<1x128xi32> to vector<64x128xi32>
    %10 = arith.cmpi eq, %8, %9 : vector<64x128xi32>
    %11 = arith.extui %10 : vector<64x128xi1> to vector<64x128xi32>
    %12 = arith.sitofp %11 : vector<64x128xi32> to vector<64x128xf32>
    %13 = arith.truncf %12 : vector<64x128xf32> to vector<64x128xbf16>
    %c0_2 = arith.constant 0 : index
    %c0_3 = arith.constant 0 : index
    %14 = vector.load %arg5[%c0_2, %c0_3] : memref<64x128xf32, #tpu.memory_space<vmem>>, vector<64x128xf32>
    %c0_4 = arith.constant 0 : index
    %c0_5 = arith.constant 0 : index
    %15 = vector.load %arg3[%c0_4, %c0_5] : memref<128x128xbf16, #tpu.memory_space<vmem>>, vector<128x128xbf16>
    %cst = arith.constant dense<0.000000e+00> : vector<64x128xf32>
    %16 = tpu.matmul %13, %15, %cst {dimension_numbers = #tpu.dot_dimension_numbers<[1], [0], [0], [1], [0, 0, 1, 1], [], []>} : vector<64x128xbf16>, vector<128x128xbf16>, vector<64x128xf32> -> vector<64x128xf32>
    %17 = arith.addf %14, %16 : vector<64x128xf32>
    %c0_6 = arith.constant 0 : index
    %c0_7 = arith.constant 0 : index
    %18 = vector.load %arg5[%c0_6, %c0_7] : memref<64x128xf32, #tpu.memory_space<vmem>>, vector<64x128xf32>
    tpu.vector_store %arg5[%c0_6, %c0_7], %17 {strides = array<i32>} : memref<64x128xf32, #tpu.memory_space<vmem>>, vector<64x128xf32>,
    %c0_i32_8 = arith.constant 0 : i32
    %19 = arith.cmpi eq, %arg1, %c0_i32_8 : i32
    %20 = arith.extui %19 : i1 to i32
    %c0_i32_9 = arith.constant 0 : i32
    %21 = arith.cmpi ne, %20, %c0_i32_9 : i32
    scf.if %21 {
      %c0_10 = arith.constant 0 : index
      %c0_11 = arith.constant 0 : index
      %22 = vector.load %arg5[%c0_10, %c0_11] : memref<64x128xf32, #tpu.memory_space<vmem>>, vector<64x128xf32>
      %23 = arith.truncf %22 : vector<64x128xf32> to vector<64x128xbf16>
      %c0_12 = arith.constant 0 : index
      %c0_13 = arith.constant 0 : index
      %24 = vector.load %arg4[%c0_12, %c0_13] : memref<64x128xbf16, #tpu.memory_space<vmem>>, vector<64x128xbf16>
      tpu.vector_store %arg4[%c0_12, %c0_13], %23 {strides = array<i32>} : memref<64x128xbf16, #tpu.memory_space<vmem>>, vector<64x128xbf16>,
    } else {
    }
    return
  }
  func.func @transform_0(%arg0: i32, %arg1: i32) -> (i32, i32) {
    %c0_i32 = arith.constant 0 : i32
    %c0_i32_0 = arith.constant 0 : i32
    return %c0_i32, %arg1 : i32, i32
  }
  func.func @transform_1(%arg0: i32, %arg1: i32) -> (i32, i32) {
    %c0_i32 = arith.constant 0 : i32
    %c0_i32_0 = arith.constant 0 : i32
    return %arg1, %c0_i32 : i32, i32
  }
  func.func @transform_2(%arg0: i32, %arg1: i32) -> (i32, i32) {
    %c0_i32 = arith.constant 0 : i32
    %c0_i32_0 = arith.constant 0 : i32
    return %arg0, %c0_i32 : i32, i32
  }
}

module attributes {stable_mosaic.version = 11 : i64} {
  func.func @_mlp3_kernel(%arg0: i32, %arg1: memref<64x128xbf16, #tpu.memory_space<vmem>>, %arg2: memref<128x16xf32, #tpu.memory_space<vmem>>, %arg3: memref<1x16xf32, #tpu.memory_space<vmem>>, %arg4: memref<16x16xf32, #tpu.memory_space<vmem>>, %arg5: memref<1x16xf32, #tpu.memory_space<vmem>>, %arg6: memref<16x3xf32, #tpu.memory_space<vmem>>, %arg7: memref<1x3xf32, #tpu.memory_space<vmem>>, %arg8: memref<1x3xf32, #tpu.memory_space<vmem>>, %arg9: memref<1x3xf32, #tpu.memory_space<vmem>>, %arg10: memref<64x3xf32, #tpu.memory_space<vmem>>) attributes {dimension_semantics = [#tpu.dimension_semantics<parallel>], iteration_bounds = array<i64: 1>, scalar_prefetch = 0 : i64, scratch_operands = 0 : i64, tpu.core_type = #tpu.core_type<tc>, window_params = [{transform_indices = @transform_0, window_bounds = array<i64: 64, 128>}, {pipeline_mode = #tpu.pipeline_mode<synchronous>, transform_indices = @transform_1, window_bounds = array<i64: 128, 16>}, {pipeline_mode = #tpu.pipeline_mode<synchronous>, transform_indices = @transform_2, window_bounds = array<i64: 1, 16>}, {pipeline_mode = #tpu.pipeline_mode<synchronous>, transform_indices = @transform_3, window_bounds = array<i64: 16, 16>}, {pipeline_mode = #tpu.pipeline_mode<synchronous>, transform_indices = @transform_4, window_bounds = array<i64: 1, 16>}, {pipeline_mode = #tpu.pipeline_mode<synchronous>, transform_indices = @transform_5, window_bounds = array<i64: 16, 3>}, {pipeline_mode = #tpu.pipeline_mode<synchronous>, transform_indices = @transform_6, window_bounds = array<i64: 1, 3>}, {pipeline_mode = #tpu.pipeline_mode<synchronous>, transform_indices = @transform_7, window_bounds = array<i64: 1, 3>}, {pipeline_mode = #tpu.pipeline_mode<synchronous>, transform_indices = @transform_8, window_bounds = array<i64: 1, 3>}, {transform_indices = @transform_9, window_bounds = array<i64: 64, 3>}]} {
    %c0 = arith.constant 0 : index
    %c0_0 = arith.constant 0 : index
    %0 = vector.load %arg1[%c0, %c0_0] : memref<64x128xbf16, #tpu.memory_space<vmem>>, vector<64x128xbf16>
    %1 = arith.extf %0 : vector<64x128xbf16> to vector<64x128xf32>
    %c0_1 = arith.constant 0 : index
    %c0_2 = arith.constant 0 : index
    %2 = vector.load %arg2[%c0_1, %c0_2] : memref<128x16xf32, #tpu.memory_space<vmem>>, vector<128x16xf32>
    %cst = arith.constant dense<0.000000e+00> : vector<64x16xf32>
    %3 = tpu.matmul %1, %2, %cst {dimension_numbers = #tpu.dot_dimension_numbers<[1], [0], [0], [1], [0, 0, 1, 1], [], []>} : vector<64x128xf32>, vector<128x16xf32>, vector<64x16xf32> -> vector<64x16xf32>
    %c0_3 = arith.constant 0 : index
    %c0_4 = arith.constant 0 : index
    %4 = vector.load %arg3[%c0_3, %c0_4] : memref<1x16xf32, #tpu.memory_space<vmem>>, vector<1x16xf32>
    %5 = vector.broadcast %4 : vector<1x16xf32> to vector<64x16xf32>
    %6 = arith.addf %3, %5 : vector<64x16xf32>
    %cst_5 = arith.constant 0.000000e+00 : f32
    %7 = vector.broadcast %cst_5 : f32 to vector<64x16xf32>
    %8 = arith.maximumf %6, %7 : vector<64x16xf32>
    %c0_6 = arith.constant 0 : index
    %c0_7 = arith.constant 0 : index
    %9 = vector.load %arg4[%c0_6, %c0_7] : memref<16x16xf32, #tpu.memory_space<vmem>>, vector<16x16xf32>
    %cst_8 = arith.constant dense<0.000000e+00> : vector<64x16xf32>
    %10 = tpu.matmul %8, %9, %cst_8 {dimension_numbers = #tpu.dot_dimension_numbers<[1], [0], [0], [1], [0, 0, 1, 1], [], []>} : vector<64x16xf32>, vector<16x16xf32>, vector<64x16xf32> -> vector<64x16xf32>
    %c0_9 = arith.constant 0 : index
    %c0_10 = arith.constant 0 : index
    %11 = vector.load %arg5[%c0_9, %c0_10] : memref<1x16xf32, #tpu.memory_space<vmem>>, vector<1x16xf32>
    %12 = vector.broadcast %11 : vector<1x16xf32> to vector<64x16xf32>
    %13 = arith.addf %10, %12 : vector<64x16xf32>
    %cst_11 = arith.constant 0.000000e+00 : f32
    %14 = vector.broadcast %cst_11 : f32 to vector<64x16xf32>
    %15 = arith.maximumf %13, %14 : vector<64x16xf32>
    %c0_12 = arith.constant 0 : index
    %c0_13 = arith.constant 0 : index
    %16 = vector.load %arg6[%c0_12, %c0_13] : memref<16x3xf32, #tpu.memory_space<vmem>>, vector<16x3xf32>
    %cst_14 = arith.constant dense<0.000000e+00> : vector<64x3xf32>
    %17 = tpu.matmul %15, %16, %cst_14 {dimension_numbers = #tpu.dot_dimension_numbers<[1], [0], [0], [1], [0, 0, 1, 1], [], []>} : vector<64x16xf32>, vector<16x3xf32>, vector<64x3xf32> -> vector<64x3xf32>
    %c0_15 = arith.constant 0 : index
    %c0_16 = arith.constant 0 : index
    %18 = vector.load %arg7[%c0_15, %c0_16] : memref<1x3xf32, #tpu.memory_space<vmem>>, vector<1x3xf32>
    %19 = vector.broadcast %18 : vector<1x3xf32> to vector<64x3xf32>
    %20 = arith.addf %17, %19 : vector<64x3xf32>
    %c0_17 = arith.constant 0 : index
    %c0_18 = arith.constant 0 : index
    %21 = vector.load %arg10[%c0_17, %c0_18] : memref<64x3xf32, #tpu.memory_space<vmem>>, vector<64x3xf32>
    tpu.vector_store %arg10[%c0_17, %c0_18], %20 {strides = array<i32>} : memref<64x3xf32, #tpu.memory_space<vmem>>, vector<64x3xf32>,
    return
  }
  func.func @transform_0(%arg0: i32) -> (i32, i32) {
    %c0_i32 = arith.constant 0 : i32
    %c0_i32_0 = arith.constant 0 : i32
    return %arg0, %c0_i32 : i32, i32
  }
  func.func @transform_1(%arg0: i32) -> (i32, i32) {
    %c0_i32 = arith.constant 0 : i32
    %c0_i32_0 = arith.constant 0 : i32
    %c0_i32_1 = arith.constant 0 : i32
    return %c0_i32, %c0_i32_0 : i32, i32
  }
  func.func @transform_2(%arg0: i32) -> (i32, i32) {
    %c0_i32 = arith.constant 0 : i32
    %c0_i32_0 = arith.constant 0 : i32
    %c0_i32_1 = arith.constant 0 : i32
    return %c0_i32, %c0_i32_0 : i32, i32
  }
  func.func @transform_3(%arg0: i32) -> (i32, i32) {
    %c0_i32 = arith.constant 0 : i32
    %c0_i32_0 = arith.constant 0 : i32
    %c0_i32_1 = arith.constant 0 : i32
    return %c0_i32, %c0_i32_0 : i32, i32
  }
  func.func @transform_4(%arg0: i32) -> (i32, i32) {
    %c0_i32 = arith.constant 0 : i32
    %c0_i32_0 = arith.constant 0 : i32
    %c0_i32_1 = arith.constant 0 : i32
    return %c0_i32, %c0_i32_0 : i32, i32
  }
  func.func @transform_5(%arg0: i32) -> (i32, i32) {
    %c0_i32 = arith.constant 0 : i32
    %c0_i32_0 = arith.constant 0 : i32
    %c0_i32_1 = arith.constant 0 : i32
    return %c0_i32, %c0_i32_0 : i32, i32
  }
  func.func @transform_6(%arg0: i32) -> (i32, i32) {
    %c0_i32 = arith.constant 0 : i32
    %c0_i32_0 = arith.constant 0 : i32
    %c0_i32_1 = arith.constant 0 : i32
    return %c0_i32, %c0_i32_0 : i32, i32
  }
  func.func @transform_7(%arg0: i32) -> (i32, i32) {
    %c0_i32 = arith.constant 0 : i32
    %c0_i32_0 = arith.constant 0 : i32
    %c0_i32_1 = arith.constant 0 : i32
    return %c0_i32, %c0_i32_0 : i32, i32
  }
  func.func @transform_8(%arg0: i32) -> (i32, i32) {
    %c0_i32 = arith.constant 0 : i32
    %c0_i32_0 = arith.constant 0 : i32
    %c0_i32_1 = arith.constant 0 : i32
    return %c0_i32, %c0_i32_0 : i32, i32
  }
  func.func @transform_9(%arg0: i32) -> (i32, i32) {
    %c0_i32 = arith.constant 0 : i32
    %c0_i32_0 = arith.constant 0 : i32
    return %arg0, %c0_i32 : i32, i32
  }
}

module attributes {stable_mosaic.version = 11 : i64} {
  func.func @_mlp3_kernel(%arg0: i32, %arg1: memref<64x128xbf16, #tpu.memory_space<vmem>>, %arg2: memref<64x128xbf16, #tpu.memory_space<vmem>>, %arg3: memref<128x128xbf16, #tpu.memory_space<vmem>>, %arg4: memref<128x128xbf16, #tpu.memory_space<vmem>>, %arg5: memref<1x128xf32, #tpu.memory_space<vmem>>, %arg6: memref<128x128xbf16, #tpu.memory_space<vmem>>, %arg7: memref<1x128xf32, #tpu.memory_space<vmem>>, %arg8: memref<128x128xbf16, #tpu.memory_space<vmem>>, %arg9: memref<1x128xf32, #tpu.memory_space<vmem>>, %arg10: memref<1x128xf32, #tpu.memory_space<vmem>>, %arg11: memref<1x128xf32, #tpu.memory_space<vmem>>, %arg12: memref<64x128xbf16, #tpu.memory_space<vmem>>) attributes {dimension_semantics = [#tpu.dimension_semantics<parallel>], iteration_bounds = array<i64: 1>, scalar_prefetch = 0 : i64, scratch_operands = 0 : i64, tpu.core_type = #tpu.core_type<tc>, window_params = [{transform_indices = @transform_0, window_bounds = array<i64: 64, 128>}, {transform_indices = @transform_1, window_bounds = array<i64: 64, 128>}, {pipeline_mode = #tpu.pipeline_mode<synchronous>, transform_indices = @transform_2, window_bounds = array<i64: 128, 128>}, {pipeline_mode = #tpu.pipeline_mode<synchronous>, transform_indices = @transform_3, window_bounds = array<i64: 128, 128>}, {pipeline_mode = #tpu.pipeline_mode<synchronous>, transform_indices = @transform_4, window_bounds = array<i64: 1, 128>}, {pipeline_mode = #tpu.pipeline_mode<synchronous>, transform_indices = @transform_5, window_bounds = array<i64: 128, 128>}, {pipeline_mode = #tpu.pipeline_mode<synchronous>, transform_indices = @transform_6, window_bounds = array<i64: 1, 128>}, {pipeline_mode = #tpu.pipeline_mode<synchronous>, transform_indices = @transform_7, window_bounds = array<i64: 128, 128>}, {pipeline_mode = #tpu.pipeline_mode<synchronous>, transform_indices = @transform_8, window_bounds = array<i64: 1, 128>}, {pipeline_mode = #tpu.pipeline_mode<synchronous>, transform_indices = @transform_9, window_bounds = array<i64: 1, 128>}, {pipeline_mode = #tpu.pipeline_mode<synchronous>, transform_indices = @transform_10, window_bounds = array<i64: 1, 128>}, {transform_indices = @transform_11, window_bounds = array<i64: 64, 128>}]} {
    %c0 = arith.constant 0 : index
    %c0_0 = arith.constant 0 : index
    %0 = vector.load %arg1[%c0, %c0_0] : memref<64x128xbf16, #tpu.memory_space<vmem>>, vector<64x128xbf16>
    %c0_1 = arith.constant 0 : index
    %c0_2 = arith.constant 0 : index
    %1 = vector.load %arg3[%c0_1, %c0_2] : memref<128x128xbf16, #tpu.memory_space<vmem>>, vector<128x128xbf16>
    %cst = arith.constant dense<0.000000e+00> : vector<64x128xf32>
    %2 = tpu.matmul %0, %1, %cst {dimension_numbers = #tpu.dot_dimension_numbers<[1], [0], [0], [1], [0, 0, 1, 1], [], []>} : vector<64x128xbf16>, vector<128x128xbf16>, vector<64x128xf32> -> vector<64x128xf32>
    %c0_3 = arith.constant 0 : index
    %c0_4 = arith.constant 0 : index
    %3 = vector.load %arg2[%c0_3, %c0_4] : memref<64x128xbf16, #tpu.memory_space<vmem>>, vector<64x128xbf16>
    %c0_5 = arith.constant 0 : index
    %c0_6 = arith.constant 0 : index
    %4 = vector.load %arg4[%c0_5, %c0_6] : memref<128x128xbf16, #tpu.memory_space<vmem>>, vector<128x128xbf16>
    %cst_7 = arith.constant dense<0.000000e+00> : vector<64x128xf32>
    %5 = tpu.matmul %3, %4, %cst_7 {dimension_numbers = #tpu.dot_dimension_numbers<[1], [0], [0], [1], [0, 0, 1, 1], [], []>} : vector<64x128xbf16>, vector<128x128xbf16>, vector<64x128xf32> -> vector<64x128xf32>
    %6 = arith.addf %2, %5 : vector<64x128xf32>
    %c0_8 = arith.constant 0 : index
    %c0_9 = arith.constant 0 : index
    %7 = vector.load %arg5[%c0_8, %c0_9] : memref<1x128xf32, #tpu.memory_space<vmem>>, vector<1x128xf32>
    %8 = vector.broadcast %7 : vector<1x128xf32> to vector<64x128xf32>
    %9 = arith.addf %6, %8 : vector<64x128xf32>
    %cst_10 = arith.constant 0.000000e+00 : f32
    %10 = vector.broadcast %cst_10 : f32 to vector<64x128xf32>
    %11 = arith.maximumf %9, %10 : vector<64x128xf32>
    %12 = arith.truncf %11 : vector<64x128xf32> to vector<64x128xbf16>
    %c0_11 = arith.constant 0 : index
    %c0_12 = arith.constant 0 : index
    %13 = vector.load %arg6[%c0_11, %c0_12] : memref<128x128xbf16, #tpu.memory_space<vmem>>, vector<128x128xbf16>
    %cst_13 = arith.constant dense<0.000000e+00> : vector<64x128xf32>
    %14 = tpu.matmul %12, %13, %cst_13 {dimension_numbers = #tpu.dot_dimension_numbers<[1], [0], [0], [1], [0, 0, 1, 1], [], []>} : vector<64x128xbf16>, vector<128x128xbf16>, vector<64x128xf32> -> vector<64x128xf32>
    %c0_14 = arith.constant 0 : index
    %c0_15 = arith.constant 0 : index
    %15 = vector.load %arg7[%c0_14, %c0_15] : memref<1x128xf32, #tpu.memory_space<vmem>>, vector<1x128xf32>
    %16 = vector.broadcast %15 : vector<1x128xf32> to vector<64x128xf32>
    %17 = arith.addf %14, %16 : vector<64x128xf32>
    %cst_16 = arith.constant 0.000000e+00 : f32
    %18 = vector.broadcast %cst_16 : f32 to vector<64x128xf32>
    %19 = arith.maximumf %17, %18 : vector<64x128xf32>
    %20 = arith.truncf %19 : vector<64x128xf32> to vector<64x128xbf16>
    %c0_17 = arith.constant 0 : index
    %c0_18 = arith.constant 0 : index
    %21 = vector.load %arg8[%c0_17, %c0_18] : memref<128x128xbf16, #tpu.memory_space<vmem>>, vector<128x128xbf16>
    %cst_19 = arith.constant dense<0.000000e+00> : vector<64x128xf32>
    %22 = tpu.matmul %20, %21, %cst_19 {dimension_numbers = #tpu.dot_dimension_numbers<[1], [0], [0], [1], [0, 0, 1, 1], [], []>} : vector<64x128xbf16>, vector<128x128xbf16>, vector<64x128xf32> -> vector<64x128xf32>
    %c0_20 = arith.constant 0 : index
    %c0_21 = arith.constant 0 : index
    %23 = vector.load %arg9[%c0_20, %c0_21] : memref<1x128xf32, #tpu.memory_space<vmem>>, vector<1x128xf32>
    %24 = vector.broadcast %23 : vector<1x128xf32> to vector<64x128xf32>
    %25 = arith.addf %22, %24 : vector<64x128xf32>
    %cst_22 = arith.constant dense<0.000000e+00> : vector<64xf32>
    %26 = vector.multi_reduction <add>, %25, %cst_22 [1] : vector<64x128xf32> to vector<64xf32>
    %27 = vector.shape_cast %26 : vector<64xf32> to vector<64x1xf32>
    %cst_23 = arith.constant 1.280000e+02 : f32
    %28 = vector.broadcast %cst_23 : f32 to vector<64x1xf32>
    %29 = arith.divf %27, %28 : vector<64x1xf32>
    %30 = vector.broadcast %29 : vector<64x1xf32> to vector<64x128xf32>
    %31 = arith.subf %25, %30 : vector<64x128xf32>
    %32 = arith.mulf %31, %31 : vector<64x128xf32>
    %cst_24 = arith.constant dense<0.000000e+00> : vector<64xf32>
    %33 = vector.multi_reduction <add>, %32, %cst_24 [1] : vector<64x128xf32> to vector<64xf32>
    %34 = vector.shape_cast %33 : vector<64xf32> to vector<64x1xf32>
    %cst_25 = arith.constant 1.280000e+02 : f32
    %35 = vector.broadcast %cst_25 : f32 to vector<64x1xf32>
    %36 = arith.divf %34, %35 : vector<64x1xf32>
    %37 = vector.broadcast %29 : vector<64x1xf32> to vector<64x128xf32>
    %38 = arith.subf %25, %37 : vector<64x128xf32>
    %cst_26 = arith.constant 9.99999974E-6 : f32
    %39 = vector.broadcast %cst_26 : f32 to vector<64x1xf32>
    %40 = arith.addf %36, %39 : vector<64x1xf32>
    %41 = math.rsqrt %40 : vector<64x1xf32>
    %42 = vector.broadcast %41 : vector<64x1xf32> to vector<64x128xf32>
    %43 = arith.mulf %38, %42 : vector<64x128xf32>
    %c0_27 = arith.constant 0 : index
    %c0_28 = arith.constant 0 : index
    %44 = vector.load %arg10[%c0_27, %c0_28] : memref<1x128xf32, #tpu.memory_space<vmem>>, vector<1x128xf32>
    %45 = vector.broadcast %44 : vector<1x128xf32> to vector<64x128xf32>
    %46 = arith.mulf %43, %45 : vector<64x128xf32>
    %c0_29 = arith.constant 0 : index
    %c0_30 = arith.constant 0 : index
    %47 = vector.load %arg11[%c0_29, %c0_30] : memref<1x128xf32, #tpu.memory_space<vmem>>, vector<1x128xf32>
    %48 = vector.broadcast %47 : vector<1x128xf32> to vector<64x128xf32>
    %49 = arith.addf %46, %48 : vector<64x128xf32>
    %cst_31 = arith.constant 2.000000e+00 : f32
    %50 = vector.broadcast %cst_31 : f32 to vector<64x128xf32>
    %51 = arith.mulf %49, %50 : vector<64x128xf32>
    %52 = arith.truncf %51 : vector<64x128xf32> to vector<64x128xbf16>
    %c0_32 = arith.constant 0 : index
    %c0_33 = arith.constant 0 : index
    %53 = vector.load %arg12[%c0_32, %c0_33] : memref<64x128xbf16, #tpu.memory_space<vmem>>, vector<64x128xbf16>
    tpu.vector_store %arg12[%c0_32, %c0_33], %52 {strides = array<i32>} : memref<64x128xbf16, #tpu.memory_space<vmem>>, vector<64x128xbf16>,
    return
  }
  func.func @transform_0(%arg0: i32) -> (i32, i32) {
    %c0_i32 = arith.constant 0 : i32
    %c0_i32_0 = arith.constant 0 : i32
    return %arg0, %c0_i32 : i32, i32
  }
  func.func @transform_1(%arg0: i32) -> (i32, i32) {
    %c0_i32 = arith.constant 0 : i32
    %c0_i32_0 = arith.constant 0 : i32
    return %arg0, %c0_i32 : i32, i32
  }
  func.func @transform_2(%arg0: i32) -> (i32, i32) {
    %c0_i32 = arith.constant 0 : i32
    %c0_i32_0 = arith.constant 0 : i32
    %c0_i32_1 = arith.constant 0 : i32
    return %c0_i32, %c0_i32_0 : i32, i32
  }
  func.func @transform_3(%arg0: i32) -> (i32, i32) {
    %c0_i32 = arith.constant 0 : i32
    %c0_i32_0 = arith.constant 0 : i32
    %c0_i32_1 = arith.constant 0 : i32
    return %c0_i32, %c0_i32_0 : i32, i32
  }
  func.func @transform_4(%arg0: i32) -> (i32, i32) {
    %c0_i32 = arith.constant 0 : i32
    %c0_i32_0 = arith.constant 0 : i32
    %c0_i32_1 = arith.constant 0 : i32
    return %c0_i32, %c0_i32_0 : i32, i32
  }
  func.func @transform_5(%arg0: i32) -> (i32, i32) {
    %c0_i32 = arith.constant 0 : i32
    %c0_i32_0 = arith.constant 0 : i32
    %c0_i32_1 = arith.constant 0 : i32
    return %c0_i32, %c0_i32_0 : i32, i32
  }
  func.func @transform_6(%arg0: i32) -> (i32, i32) {
    %c0_i32 = arith.constant 0 : i32
    %c0_i32_0 = arith.constant 0 : i32
    %c0_i32_1 = arith.constant 0 : i32
    return %c0_i32, %c0_i32_0 : i32, i32
  }
  func.func @transform_7(%arg0: i32) -> (i32, i32) {
    %c0_i32 = arith.constant 0 : i32
    %c0_i32_0 = arith.constant 0 : i32
    %c0_i32_1 = arith.constant 0 : i32
    return %c0_i32, %c0_i32_0 : i32, i32
  }
  func.func @transform_8(%arg0: i32) -> (i32, i32) {
    %c0_i32 = arith.constant 0 : i32
    %c0_i32_0 = arith.constant 0 : i32
    %c0_i32_1 = arith.constant 0 : i32
    return %c0_i32, %c0_i32_0 : i32, i32
  }
  func.func @transform_9(%arg0: i32) -> (i32, i32) {
    %c0_i32 = arith.constant 0 : i32
    %c0_i32_0 = arith.constant 0 : i32
    %c0_i32_1 = arith.constant 0 : i32
    return %c0_i32, %c0_i32_0 : i32, i32
  }
  func.func @transform_10(%arg0: i32) -> (i32, i32) {
    %c0_i32 = arith.constant 0 : i32
    %c0_i32_0 = arith.constant 0 : i32
    %c0_i32_1 = arith.constant 0 : i32
    return %c0_i32, %c0_i32_0 : i32, i32
  }
  func.func @transform_11(%arg0: i32) -> (i32, i32) {
    %c0_i32 = arith.constant 0 : i32
    %c0_i32_0 = arith.constant 0 : i32
    return %arg0, %c0_i32 : i32, i32
  }
}

</mosaic_0001>

<bundles_post_ra>
// kernel: _lambda_.9
= control target key start
LH: loop header
LB: loop body
LE: loop exit
PB: predicated region body
PF: predicated region fallthrough
CT: control target
= control target key end

     0   :  { %vm73_vm0 = vcmask 1045504   ;;  %vm48_vm1 = vcmask 48128   ;;  %vm199_vm2 = vcmask 130048   ;;  %s988_s1 = inlined_call_operand.vmem [shape: f32[6,16], index: 1, kind: input, shape index: {}]   ;;  %s989_s0 = inlined_call_operand.vmem [shape: f32[64,6], index: 0, kind: input, shape index: {}]   ;;  %s990_s3 = inlined_call_operand.vmem [shape: f32[16,16], index: 3, kind: input, shape index: {}]   ;;  %s991_s5 = inlined_call_operand.vmem [shape: f32[16,128], index: 5, kind: input, shape index: {}]   ;;  %s992_s2 = inlined_call_operand.vmem [shape: f32[1,16], index: 2, kind: input, shape index: {}]   ;;  %s993_s4 = inlined_call_operand.vmem [shape: f32[1,16], index: 4, kind: input, shape index: {}]   ;;  %s994_s6 = inlined_call_operand.vmem [shape: f32[1,128], index: 6, kind: input, shape index: {}]   ;;  %s995_s7 = inlined_call_operand.vmem [shape: f32[1,128], index: 7, kind: input, shape index: {}]   ;;  %s996_s8 = inlined_call_operand.vmem [shape: f32[1,128], index: 8, kind: input, shape index: {}]   ;;  %s997_s9 = inlined_call_operand.vmem [shape: bf16[64,128], index: 9, kind: output, shape index: {}]  }
   0x1   :  { %v40_v0 = vld [vmem:[%s988_s1] sm:$0x3f]  ;;  %v33_v2 = vld [vmem:[%s989_s0 + $0x8] sm:$0xff]  ;;  %v34_v3 = vld [vmem:[%s989_s0 + $0x10] sm:$0xff] }
   0x2   :  { %v32_v1 = vld [vmem:[%s989_s0] sm:$0xff]  ;;  %736 = vmatprep.subr.msk.mxu0 %vm73_vm0, %v40_v0  ;;  %790 = vmatprep.subr.msk.mxu1 %vm73_vm0, %v40_v0  ;;  %v37_v5 = vld [vmem:[%s989_s0 + $0x28] sm:$0xff]  ;;  %v38_v6 = vld [vmem:[%s989_s0 + $0x30] sm:$0xff] }
   0x3   :  { %738 = vmatprep.mubr.msk.f32.mxu0 %vm48_vm1, %v32_v1  ;;  %v36_v4 = vld [vmem:[%s989_s0 + $0x20] sm:$0xff]  ;;  %737 = vmatpush3.msk.msra.mxu0 %vm73_vm0, %v40_v0  ;;  %v191_v8 = vld [vmem:[%s990_s3 + $0x8] sm:$0xff]  ;;  %v35_v9 = vld [vmem:[%s989_s0 + $0x18] sm:$0xff] }
   0x4   :  { %739 = vmatmul.mubr.msk.f32.vlgmr.msra.gmra.mrb[0].mxu0 %vm48_vm1, %v33_v2  ;;  %791 = vmatpush3.msk.msra.mxu1 %vm73_vm0, %v40_v0  ;;  %v190_v7 = vld [vmem:[%s990_s3] sm:$0xff]  ;;  %v39_v11 = vld [vmem:[%s989_s0 + $0x38] sm:$0xff]  ;;  %v338_v13 = vld [vmem:[%s991_s5 + $0x8] sm:$0xff] }
   0x5   :  { %741 = vmatprep.mubr.msk.f32.mxu0 %vm48_vm1, %v34_v3  ;;  %744 = vmatprep.mubr.msk.f32.mxu1 %vm48_vm1, %v36_v4  ;;  %v782_v10 = vpack.c.bf16 %v191_v8, %v190_v7  ;;  %v337_v12 = vld [vmem:[%s991_s5] sm:$0xff] }
   0x6   :  { %745 = vmatmul.mubr.msk.f32.vlgmr.msra.gmra.mrb[0].mxu1 %vm48_vm1, %v37_v5  ;;  %v786_v14 = vpack.c.bf16 %v338_v13, %v337_v12  ;;  %v638_v15 = vld [vmem:[%s992_s2] ss:$0 sm:$0xff] }
   0x7   :  { %747 = vmatprep.mubr.msk.f32.mxu1 %vm48_vm1, %v38_v6  ;;  %783 = vmatprep.subr.bf16.mxu1 %v782_v10  ;;  %v648_v40 = vld [vmem:[%s993_s4] ss:$0 sm:$0xff] }
   0x8   :  { %742 = vmatmul.mubr.msk.f32.gmra.mrb[2].mxu0 %vm48_vm1, %v35_v9  ;;  %785 = vmatpush3.bf16.msra.mxu1 %v782_v10  ;;  %v657_v1 = vld [vmem:[%s994_s6] ss:$0 sm:$0xff] }
   0x9   :  { %787 = vmatprep.subr.bf16.mxu0 %v786_v14 }
   0xa   :  { %748 = vmatmul.mubr.msk.f32.gmra.mrb[2].mxu1 %vm48_vm1, %v39_v11  ;;  %789 = vmatpush3.bf16.msra.mxu0 %v786_v14 }
  0xd7   :  { %v740_v16 = vpop.f32.mrb[0].mxu0 }
  0xd8   :  { %v149_v17 = vadd.f32 %v740_v16, %v638_v15  ;;  %v143_v18 = vpop.f32.mrb[1].mxu0 }
  0xd9   :  { %v144_v19 = vadd.f32 %v638_v15, %v143_v18  ;;  %v746_v20 = vpop.f32.mrb[0].mxu1 }
  0xda   :  { %v163_v21 = vpop.f32.mrb[1].mxu1  ;;  %v183_v25 = vmax.f32 %v149_v17, 0.0  ;;  %v169_v30 = vadd.f32 %v746_v20, %v638_v15 }
  0xdb   :  { %v182_v22 = vmax.f32 %v144_v19, 0.0  ;;  %v743_v23 = vpop.f32.mrb[2].mxu0  ;;  %v164_v24 = vadd.f32 %v638_v15, %v163_v21 }
  0xdc   :  { %v159_v26 = vadd.f32 %v743_v23, %v638_v15  ;;  %v153_v27 = vpop.f32.mrb[3].mxu0  ;;  %v187_v36 = vmax.f32 %v169_v30, 0.0 }
  0xdd   :  { %v154_v28 = vadd.f32 %v638_v15, %v153_v27  ;;  %754 = vmatprep.mubr.msk.f32.mxu1 %vm199_vm2, %v182_v22  ;;  %v749_v29 = vpop.f32.mrb[2].mxu1  ;;  %v186_v33 = vmax.f32 %v164_v24, 0.0 }
  0xde   :  { %755 = vmatmul.mubr.msk.f32.vlgmr.msra.gmra.mrb[4].mxu1 %vm199_vm2, %v183_v25  ;;  %v173_v31 = vpop.f32.mrb[3].mxu1  ;;  %v185_v35 = vmax.f32 %v159_v26, 0.0  ;;  %v179_v37 = vadd.f32 %v749_v29, %v638_v15 }
  0xdf   :  { %v184_v32 = vmax.f32 %v154_v28, 0.0  ;;  %v174_v34 = vadd.f32 %v638_v15, %v173_v31 }
  0xe0   :  { %v189_v39 = vmax.f32 %v179_v37, 0.0 }
  0xe1   :  { %757 = vmatprep.mubr.msk.f32.mxu1 %vm199_vm2, %v184_v32  ;;  %v188_v38 = vmax.f32 %v174_v34, 0.0 }
  0xe2   :  { %758 = vmatmul.mubr.msk.f32.gmra.mrb[6].mxu1 %vm199_vm2, %v185_v35 }
  0xe3   :  { %760 = vmatprep.mubr.msk.f32.mxu1 %vm199_vm2, %v186_v33 }
  0xe6   :  { %761 = vmatmul.mubr.msk.f32.gmra.mrb[8].mxu1 %vm199_vm2, %v187_v36 }
  0xe7   :  { %763 = vmatprep.mubr.msk.f32.mxu1 %vm199_vm2, %v188_v38 }
  0xea   :  { %764 = vmatmul.mubr.msk.f32.gmra.mrb[10].mxu1 %vm199_vm2, %v189_v39 }
 0x1b1   :  { %v756_v41 = vpop.f32.mrb[4].mxu1 }
 0x1b2   :  { %v296_v42 = vadd.f32 %v756_v41, %v648_v40  ;;  %v290_v43 = vpop.f32.mrb[5].mxu1 }
 0x1b3   :  { %v291_v44 = vadd.f32 %v648_v40, %v290_v43 }
 0x1b4   :  { %v330_v47 = vmax.f32 %v296_v42, 0.0 }
 0x1b5   :  { %v329_v45 = vmax.f32 %v291_v44, 0.0  ;;  %v759_v46 = vpop.f32.mrb[6].mxu1 }
 0x1b6   :  { %v306_v48 = vadd.f32 %v759_v46, %v648_v40  ;;  %v300_v49 = vpop.f32.mrb[7].mxu1 }
 0x1b7   :  { %v301_v50 = vadd.f32 %v648_v40, %v300_v49  ;;  %770 = vmatprep.mubr.msk.f32.mxu0 %vm199_vm2, %v329_v45 }
 0x1b8   :  { %771 = vmatmul.mubr.msk.f32.vlgmr.msra.gmra.mrb[4].mxu0 %vm199_vm2, %v330_v47  ;;  %v332_v53 = vmax.f32 %v306_v48, 0.0 }
 0x1b9   :  { %v331_v51 = vmax.f32 %v301_v50, 0.0  ;;  %v762_v52 = vpop.f32.mrb[8].mxu1 }
 0x1ba   :  { %v316_v54 = vadd.f32 %v762_v52, %v648_v40  ;;  %v310_v55 = vpop.f32.mrb[9].mxu1 }
 0x1bb   :  { %v311_v56 = vadd.f32 %v648_v40, %v310_v55  ;;  %773 = vmatprep.mubr.msk.f32.mxu0 %vm199_vm2, %v331_v51 }
 0x1bc   :  { %v334_v57 = vmax.f32 %v316_v54, 0.0  ;;  %774 = vmatmul.mubr.msk.f32.gmra.mrb[6].mxu0 %vm199_vm2, %v332_v53 }
 0x1bd   :  { %v333_v58 = vmax.f32 %v311_v56, 0.0  ;;  %v765_v59 = vpop.f32.mrb[10].mxu1 }
 0x1be   :  { %v326_v60 = vadd.f32 %v765_v59, %v648_v40  ;;  %v320_v61 = vpop.f32.mrb[11].mxu1 }
 0x1bf   :  { %v321_v62 = vadd.f32 %v648_v40, %v320_v61  ;;  %776 = vmatprep.mubr.msk.f32.mxu0 %vm199_vm2, %v333_v58 }
 0x1c0   :  { %v336_v63 = vmax.f32 %v326_v60, 0.0  ;;  %777 = vmatmul.mubr.msk.f32.gmra.mrb[8].mxu0 %vm199_vm2, %v334_v57 }
 0x1c1   :  { %v335_v0 = vmax.f32 %v321_v62, 0.0 }
 0x1c3   :  { %779 = vmatprep.mubr.msk.f32.mxu0 %vm199_vm2, %v335_v0 }
 0x1c4   :  { %780 = vmatmul.mubr.msk.f32.gmra.mrb[10].mxu0 %vm199_vm2, %v336_v63 }
 0x28b   :  { %v772_v2 = vpop.f32.mrb[4].mxu0 }
 0x28c   :  { %v442_v3 = vadd.f32 %v772_v2, %v657_v1  ;;  %v436_v4 = vpop.f32.mrb[5].mxu0 }
 0x28d   :  { %v437_v6 = vadd.f32 %v657_v1, %v436_v4 }
 0x28e   :  { %477 = vadd.xlane.f32.xlu0 %v442_v3 }
 0x28f   :  { %v775_v5 = vpop.f32.mrb[6].mxu0 }
 0x290   :  { %v452_v7 = vadd.f32 %v775_v5, %v657_v1  ;;  %v446_v8 = vpop.f32.mrb[7].mxu0 }
 0x291   :  { %v447_v10 = vadd.f32 %v657_v1, %v446_v8 }
 0x292   :  { %481 = vadd.xlane.f32.xlu1 %v452_v7  ;;  %475 = vadd.xlane.f32.xlu0 %v437_v6 }
 0x293   :  { %v778_v9 = vpop.f32.mrb[8].mxu0 }
 0x294   :  { %v456_v11 = vpop.f32.mrb[9].mxu0  ;;  %v462_v14 = vadd.f32 %v778_v9, %v657_v1 }
 0x295   :  { %v457_v12 = vadd.f32 %v657_v1, %v456_v11 }
 0x296   :  { %479 = vadd.xlane.f32.xlu1 %v447_v10 }
 0x297   :  { %v781_v13 = vpop.f32.mrb[10].mxu0  ;;  %483 = vadd.xlane.f32.xlu0 %v457_v12 }
 0x298   :  { %v466_v15 = vpop.f32.mrb[11].mxu0  ;;  %v472_v17 = vadd.f32 %v781_v13, %v657_v1 }
 0x299   :  { %v467_v16 = vadd.f32 %v657_v1, %v466_v15 }
 0x29a   :  { %485 = vadd.xlane.f32.xlu1 %v462_v14 }
 0x29b   :  { %487 = vadd.xlane.f32.xlu0 %v467_v16 }
 0x29e   :  { %489 = vadd.xlane.f32.xlu1 %v472_v17 }
 0x31b   :  { %v478_v18 = vpop.xlane.xlu0 %477 }
 0x31c   :  { %v493_v19 = vmul.f32 0.0078125, %v478_v18  ;;  %v667_v18 = vld [vmem:[%s996_s8] ss:$0 sm:$0xff] }
 0x31e   :  { %v930_v20 = vsub.f32 %v442_v3, %v493_v19 }
 0x31f   :  { %v482_v21 = vpop.xlane.xlu1 %481  ;;  %v476_v22 = vpop.xlane.xlu0 %475 }
 0x320   :  { %v495_v23 = vmul.f32 0.0078125, %v482_v21  ;;  %v492_v24 = vmul.f32 0.0078125, %v476_v22  ;;  %v509_v25 = vmul.f32 %v930_v20, %v930_v20 }
 0x322   :  { %v934_v26 = vsub.f32 %v452_v7, %v495_v23  ;;  %v936_v27 = vsub.f32 %v437_v6, %v492_v24  ;;  %518 = vadd.xlane.f32.xlu1 %v509_v25 }
 0x323   :  { %v480_v28 = vpop.xlane.xlu1 %479 }
 0x324   :  { %v494_v29 = vmul.f32 0.0078125, %v480_v28  ;;  %v484_v30 = vpop.xlane.xlu0 %483  ;;  %v511_v31 = vmul.f32 %v934_v26, %v934_v26  ;;  %v508_v32 = vmul.f32 %v936_v27, %v936_v27 }
 0x325   :  { %v496_v33 = vmul.f32 0.0078125, %v484_v30 }
 0x326   :  { %v942_v34 = vsub.f32 %v447_v10, %v494_v29  ;;  %522 = vadd.xlane.f32.xlu1 %v511_v31  ;;  %516 = vadd.xlane.f32.xlu0 %v508_v32  ;;  %v666_v10 = vld [vmem:[%s995_s7] ss:$0 sm:$0xff] }
 0x327   :  { %v486_v35 = vpop.xlane.xlu1 %485  ;;  %v944_v36 = vsub.f32 %v457_v12, %v496_v33 }
 0x328   :  { %v497_v37 = vmul.f32 0.0078125, %v486_v35  ;;  %v488_v38 = vpop.xlane.xlu0 %487  ;;  %v510_v39 = vmul.f32 %v942_v34, %v942_v34 }
 0x329   :  { %v498_v40 = vmul.f32 0.0078125, %v488_v38  ;;  %v512_v46 = vmul.f32 %v944_v36, %v944_v36 }
 0x32a   :  { %v948_v41 = vsub.f32 %v462_v14, %v497_v37  ;;  %520 = vadd.xlane.f32.xlu0 %v510_v39 }
 0x32b   :  { %v490_v42 = vpop.xlane.xlu1 %489  ;;  %v950_v43 = vsub.f32 %v467_v16, %v498_v40 }
 0x32c   :  { %v499_v44 = vmul.f32 0.0078125, %v490_v42  ;;  %v513_v45 = vmul.f32 %v948_v41, %v948_v41 }
 0x32d   :  { %v514_v49 = vmul.f32 %v950_v43, %v950_v43 }
 0x32e   :  { %v956_v47 = vsub.f32 %v472_v17, %v499_v44  ;;  %526 = vadd.xlane.f32.xlu1 %v513_v45  ;;  %524 = vadd.xlane.f32.xlu0 %v512_v46 }
 0x330   :  { %v515_v48 = vmul.f32 %v956_v47, %v956_v47 }
 0x332   :  { %530 = vadd.xlane.f32.xlu1 %v515_v48  ;;  %528 = vadd.xlane.f32.xlu0 %v514_v49 }
 0x3af   :  { %v519_v50 = vpop.xlane.xlu1 %518 }
 0x3b0   :  { %v533_v51 = vmul.f32 0.0078125, %v519_v50 }
 0x3b2   :  { %v541_v52 = vadd.f32 1e-05, %v533_v51 }
 0x3b3   :  { %v523_v53 = vpop.xlane.xlu1 %522  ;;  %v517_v54 = vpop.xlane.xlu0 %516 }
 0x3b4   :  { %792 = vrsqrt.f32 %v541_v52  ;;  %v535_v55 = vmul.f32 0.0078125, %v523_v53  ;;  %v532_v56 = vmul.f32 0.0078125, %v517_v54 }
 0x3b6   :  { %v543_v57 = vadd.f32 1e-05, %v535_v55  ;;  %v540_v58 = vadd.f32 1e-05, %v532_v56 }
 0x3b7   :  { %v521_v59 = vpop.xlane.xlu0 %520 }
 0x3b8   :  { %794 = vrsqrt.f32 %v543_v57  ;;  %v534_v60 = vmul.f32 0.0078125, %v521_v59 }
 0x3b9   :  { %796 = vrsqrt.f32 %v540_v58 }
 0x3ba   :  { %v542_v61 = vadd.f32 1e-05, %v534_v60 }
 0x3bb   :  { %v527_v62 = vpop.xlane.xlu1 %526  ;;  %v525_v63 = vpop.xlane.xlu0 %524 }
 0x3bc   :  { %798 = vrsqrt.f32 %v542_v61  ;;  %v537_v0 = vmul.f32 0.0078125, %v527_v62  ;;  %v536_v1 = vmul.f32 0.0078125, %v525_v63 }
 0x3be   :  { %v793_v2 = vpop.eup %792  ;;  %v545_v3 = vadd.f32 1e-05, %v537_v0  ;;  %v544_v4 = vadd.f32 1e-05, %v536_v1 }
 0x3bf   :  { %v531_v5 = vpop.xlane.xlu1 %530  ;;  %v529_v6 = vpop.xlane.xlu0 %528  ;;  %v557_v7 = vmul.f32 %v793_v2, %v930_v20 }
 0x3c0   :  { %800 = vrsqrt.f32 %v545_v3  ;;  %v539_v8 = vmul.f32 0.0078125, %v531_v5  ;;  %v538_v9 = vmul.f32 0.0078125, %v529_v6 }
 0x3c1   :  { %802 = vrsqrt.f32 %v544_v4  ;;  %v572_v16 = vmul.f32 %v666_v10, %v557_v7 }
 0x3c2   :  { %v795_v11 = vpop.eup %794  ;;  %v547_v12 = vadd.f32 1e-05, %v539_v8  ;;  %v546_v13 = vadd.f32 1e-05, %v538_v9 }
 0x3c3   :  { %v797_v14 = vpop.eup %796  ;;  %v559_v15 = vmul.f32 %v795_v11, %v934_v26  ;;  %v587_v23 = vadd.f32 %v667_v18, %v572_v16 }
 0x3c4   :  { %v556_v17 = vmul.f32 %v797_v14, %v936_v27  ;;  %804 = vrsqrt.f32 %v547_v12 }
 0x3c5   :  { %806 = vrsqrt.f32 %v546_v13  ;;  %v574_v21 = vmul.f32 %v666_v10, %v559_v15 }
 0x3c6   :  { %v799_v19 = vpop.eup %798  ;;  %v571_v20 = vmul.f32 %v666_v10, %v556_v17 }
 0x3c7   :  { %v558_v22 = vmul.f32 %v799_v19, %v942_v34  ;;  %v589_v30 = vadd.f32 %v667_v18, %v574_v21 }
 0x3c8   :  { %v586_v24 = vadd.f32 %v667_v18, %v571_v20 }
 0x3c9   :  { %v573_v25 = vmul.f32 %v666_v10, %v558_v22 }
 0x3ca   :  { %v801_v28 = vpop.eup %800  ;;  %v687_v29 = vpack.c.bf16 %v587_v23, %v586_v24 }
 0x3cb   :  { %v803_v26 = vpop.eup %802  ;;  %v588_v31 = vadd.f32 %v667_v18, %v573_v25  ;;  %v561_v27 = vmul.f32 %v801_v28, %v948_v41 }
 0x3cc   :  { %688 = vst [vmem:[%s997_s9] sm:$0xff] %v687_v29   ;;  %v560_v32 = vmul.f32 %v803_v26, %v944_v36 }
 0x3cd   :  { %v692_v33 = vpack.c.bf16 %v589_v30, %v588_v31  ;;  %v576_v35 = vmul.f32 %v666_v10, %v561_v27 }
 0x3ce   :  { %v805_v37 = vpop.eup %804  ;;  %v575_v34 = vmul.f32 %v666_v10, %v560_v32 }
 0x3cf   :  { %v807_v38 = vpop.eup %806  ;;  %704 = vst [vmem:[%s997_s9 + $0x8] sm:$0xff] %v692_v33   ;;  %v591_v39 = vadd.f32 %v667_v18, %v576_v35  ;;  %v563_v40 = vmul.f32 %v805_v37, %v956_v47 }
 0x3d0   :  { %v590_v42 = vadd.f32 %v667_v18, %v575_v34  ;;  %v562_v41 = vmul.f32 %v807_v38, %v950_v43 }
 0x3d1   :  { %v578_v44 = vmul.f32 %v666_v10, %v563_v40 }
 0x3d2   :  { %v697_v45 = vpack.c.bf16 %v591_v39, %v590_v42  ;;  %v577_v46 = vmul.f32 %v666_v10, %v562_v41 }
 0x3d3   :  { %v593_v48 = vadd.f32 %v667_v18, %v578_v44 }
 0x3d4   :  { %705 = vst [vmem:[%s997_s9 + $0x10] sm:$0xff] %v697_v45   ;;  %v592_v36 = vadd.f32 %v667_v18, %v577_v46 }
 0x3d6   :  { %v702_v49 = vpack.c.bf16 %v593_v48, %v592_v36 }
 0x3d8   :  { %706 = vst [vmem:[%s997_s9 + $0x18] sm:$0xff] %v702_v49  }

// kernel: _lambda_.10
= control target key start
LH: loop header
LB: loop body
LE: loop exit
PB: predicated region body
PF: predicated region fallthrough
CT: control target
= control target key end

     0   :  { %vm105_vm0 = vcmask 1040384   ;;  %vm56_vm1 = vcmask 7168   ;;  %vm279_vm2 = vcmask 130048   ;;  %s1652_s1 = inlined_call_operand.vmem [shape: f32[1,16], index: 1, kind: input, shape index: {}]   ;;  %s1653_s0 = inlined_call_operand.vmem [shape: f32[128,1], index: 0, kind: input, shape index: {}]   ;;  %s1654_s3 = inlined_call_operand.vmem [shape: f32[16,16], index: 3, kind: input, shape index: {}]   ;;  %s1655_s5 = inlined_call_operand.vmem [shape: f32[16,128], index: 5, kind: input, shape index: {}]   ;;  %s1656_s2 = inlined_call_operand.vmem [shape: f32[1,16], index: 2, kind: input, shape index: {}]   ;;  %s1657_s4 = inlined_call_operand.vmem [shape: f32[1,16], index: 4, kind: input, shape index: {}]   ;;  %s1658_s6 = inlined_call_operand.vmem [shape: f32[1,128], index: 6, kind: input, shape index: {}]   ;;  %s1659_s7 = inlined_call_operand.vmem [shape: f32[1,128], index: 7, kind: input, shape index: {}]   ;;  %s1660_s8 = inlined_call_operand.vmem [shape: f32[1,128], index: 8, kind: input, shape index: {}]   ;;  %s1661_s9 = inlined_call_operand.vmem [shape: bf16[128,128], index: 9, kind: output, shape index: {}]  }
   0x1   :  { %v48_v0 = vld [vmem:[%s1652_s1] sm:$0x1]  ;;  %v33_v2 = vld [vmem:[%s1653_s0 + $0x8] sm:$0xff]  ;;  %v34_v3 = vld [vmem:[%s1653_s0 + $0x10] sm:$0xff] }
   0x2   :  { %v32_v1 = vld [vmem:[%s1653_s0] sm:$0xff]  ;;  %1184 = vmatprep.subr.msk.mxu0 %vm105_vm0, %v48_v0  ;;  %1274 = vmatprep.subr.msk.mxu1 %vm105_vm0, %v48_v0  ;;  %v41_v5 = vld [vmem:[%s1653_s0 + $0x48] sm:$0xff]  ;;  %v42_v6 = vld [vmem:[%s1653_s0 + $0x50] sm:$0xff] }
   0x3   :  { %1186 = vmatprep.mubr.msk.f32.mxu0 %vm56_vm1, %v32_v1  ;;  %1185 = vmatpush3.msk.msra.mxu0 %vm105_vm0, %v48_v0  ;;  %v40_v4 = vld [vmem:[%s1653_s0 + $0x40] sm:$0xff]  ;;  %v35_v7 = vld [vmem:[%s1653_s0 + $0x18] sm:$0xff]  ;;  %v271_v11 = vld [vmem:[%s1654_s3 + $0x8] sm:$0xff] }
   0x4   :  { %1187 = vmatmul.mubr.msk.f32.vlgmr.msra.gmra.mrb[0].mxu0 %vm56_vm1, %v33_v2  ;;  %1275 = vmatpush3.msk.msra.mxu1 %vm105_vm0, %v48_v0  ;;  %v36_v8 = vld [vmem:[%s1653_s0 + $0x20] sm:$0xff]  ;;  %v43_v10 = vld [vmem:[%s1653_s0 + $0x58] sm:$0xff]  ;;  %v37_v14 = vld [vmem:[%s1653_s0 + $0x28] sm:$0xff] }
   0x5   :  { %1189 = vmatprep.mubr.msk.f32.mxu0 %vm56_vm1, %v34_v3  ;;  %1198 = vmatprep.mubr.msk.f32.mxu1 %vm56_vm1, %v40_v4  ;;  %v270_v9 = vld [vmem:[%s1654_s3] sm:$0xff]  ;;  %v38_v15 = vld [vmem:[%s1653_s0 + $0x30] sm:$0xff]  ;;  %v45_v16 = vld [vmem:[%s1653_s0 + $0x68] sm:$0xff] }
   0x6   :  { %1199 = vmatmul.mubr.msk.f32.vlgmr.msra.gmra.mrb[0].mxu1 %vm56_vm1, %v41_v5  ;;  %v44_v12 = vld [vmem:[%s1653_s0 + $0x60] sm:$0xff]  ;;  %v1266_v13 = vpack.c.bf16 %v271_v11, %v270_v9  ;;  %v46_v17 = vld [vmem:[%s1653_s0 + $0x70] sm:$0xff]  ;;  %v39_v18 = vld [vmem:[%s1653_s0 + $0x38] sm:$0xff] }
   0x7   :  { %1201 = vmatprep.mubr.msk.f32.mxu1 %vm56_vm1, %v42_v6  ;;  %v47_v19 = vld [vmem:[%s1653_s0 + $0x78] sm:$0xff]  ;;  %v489_v20 = vld [vmem:[%s1655_s5] sm:$0xff]  ;;  %v490_v21 = vld [vmem:[%s1655_s5 + $0x8] sm:$0xff] }
   0x8   :  { %1190 = vmatmul.mubr.msk.f32.gmra.mrb[2].mxu0 %vm56_vm1, %v35_v7  ;;  %1267 = vmatprep.subr.bf16.mxu1 %v1266_v13  ;;  %v1270_v22 = vpack.c.bf16 %v490_v21, %v489_v20  ;;  %v998_v23 = vld [vmem:[%s1656_s2] ss:$0 sm:$0xff] }
   0x9   :  { %1192 = vmatprep.mubr.msk.f32.mxu0 %vm56_vm1, %v36_v8  ;;  %1269 = vmatpush3.bf16.msra.mxu1 %v1266_v13  ;;  %v1016_v8 = vld [vmem:[%s1657_s4] ss:$0 sm:$0xff] }
   0xa   :  { %1202 = vmatmul.mubr.msk.f32.gmra.mrb[2].mxu1 %vm56_vm1, %v43_v10  ;;  %1271 = vmatprep.subr.bf16.mxu0 %v1270_v22 }
   0xb   :  { %1204 = vmatprep.mubr.msk.f32.mxu1 %vm56_vm1, %v44_v12  ;;  %1273 = vmatpush3.bf16.msra.mxu0 %v1270_v22 }
   0xc   :  { %1193 = vmatmul.mubr.msk.f32.gmra.mrb[4].mxu0 %vm56_vm1, %v37_v14 }
   0xd   :  { %1195 = vmatprep.mubr.msk.f32.mxu0 %vm56_vm1, %v38_v15 }
   0xe   :  { %1205 = vmatmul.mubr.msk.f32.gmra.mrb[4].mxu1 %vm56_vm1, %v45_v16 }
   0xf   :  { %1207 = vmatprep.mubr.msk.f32.mxu1 %vm56_vm1, %v46_v17 }
  0x10   :  { %1196 = vmatmul.mubr.msk.f32.gmra.mrb[6].mxu0 %vm56_vm1, %v39_v18 }
  0x12   :  { %1208 = vmatmul.mubr.msk.f32.gmra.mrb[6].mxu1 %vm56_vm1, %v47_v19 }
  0xd7   :  { %v1188_v24 = vpop.f32.mrb[0].mxu0 }
  0xd8   :  { %v181_v25 = vadd.f32 %v1188_v24, %v998_v23  ;;  %v175_v26 = vpop.f32.mrb[1].mxu0 }
  0xd9   :  { %v176_v27 = vadd.f32 %v998_v23, %v175_v26  ;;  %v1200_v28 = vpop.f32.mrb[0].mxu1 }
  0xda   :  { %v215_v29 = vpop.f32.mrb[1].mxu1  ;;  %v255_v32 = vmax.f32 %v181_v25, 0.0  ;;  %v221_v55 = vadd.f32 %v1200_v28, %v998_v23 }
  0xdb   :  { %v254_v30 = vmax.f32 %v176_v27, 0.0  ;;  %v1191_v31 = vpop.f32.mrb[2].mxu0  ;;  %v216_v49 = vadd.f32 %v998_v23, %v215_v29 }
  0xdc   :  { %v191_v33 = vadd.f32 %v1191_v31, %v998_v23  ;;  %v185_v34 = vpop.f32.mrb[3].mxu0  ;;  %v263_v60 = vmax.f32 %v221_v55, 0.0 }
  0xdd   :  { %v186_v35 = vadd.f32 %v998_v23, %v185_v34  ;;  %1214 = vmatprep.mubr.msk.f32.mxu1 %vm279_vm2, %v254_v30  ;;  %v1203_v36 = vpop.f32.mrb[2].mxu1  ;;  %v262_v58 = vmax.f32 %v216_v49, 0.0 }
  0xde   :  { %1215 = vmatmul.mubr.msk.f32.vlgmr.msra.gmra.mrb[8].mxu1 %vm279_vm2, %v255_v32  ;;  %v225_v37 = vpop.f32.mrb[3].mxu1  ;;  %v257_v40 = vmax.f32 %v191_v33, 0.0  ;;  %v231_v61 = vadd.f32 %v1203_v36, %v998_v23 }
  0xdf   :  { %v256_v38 = vmax.f32 %v186_v35, 0.0  ;;  %v1194_v39 = vpop.f32.mrb[4].mxu0  ;;  %v226_v59 = vadd.f32 %v998_v23, %v225_v37 }
  0xe0   :  { %v201_v41 = vadd.f32 %v1194_v39, %v998_v23  ;;  %v195_v42 = vpop.f32.mrb[5].mxu0  ;;  %v265_v0 = vmax.f32 %v231_v61, 0.0 }
  0xe1   :  { %v196_v43 = vadd.f32 %v998_v23, %v195_v42  ;;  %1217 = vmatprep.mubr.msk.f32.mxu1 %vm279_vm2, %v256_v38  ;;  %v1206_v44 = vpop.f32.mrb[4].mxu1  ;;  %v264_v62 = vmax.f32 %v226_v59, 0.0 }
  0xe2   :  { %v259_v45 = vmax.f32 %v201_v41, 0.0  ;;  %1218 = vmatmul.mubr.msk.f32.gmra.mrb[10].mxu1 %vm279_vm2, %v257_v40  ;;  %v235_v46 = vpop.f32.mrb[5].mxu1  ;;  %v241_v1 = vadd.f32 %v1206_v44, %v998_v23 }
  0xe3   :  { %v258_v47 = vmax.f32 %v196_v43, 0.0  ;;  %v1197_v48 = vpop.f32.mrb[6].mxu0  ;;  %v236_v63 = vadd.f32 %v998_v23, %v235_v46 }
  0xe4   :  { %v211_v50 = vadd.f32 %v1197_v48, %v998_v23  ;;  %v205_v51 = vpop.f32.mrb[7].mxu0  ;;  %v267_v4 = vmax.f32 %v241_v1, 0.0 }
  0xe5   :  { %v206_v52 = vadd.f32 %v998_v23, %v205_v51  ;;  %1220 = vmatprep.mubr.msk.f32.mxu1 %vm279_vm2, %v258_v47  ;;  %v1209_v53 = vpop.f32.mrb[6].mxu1  ;;  %v266_v2 = vmax.f32 %v236_v63, 0.0 }
  0xe6   :  { %v261_v54 = vmax.f32 %v211_v50, 0.0  ;;  %1221 = vmatmul.mubr.msk.f32.gmra.mrb[12].mxu1 %vm279_vm2, %v259_v45  ;;  %v245_v56 = vpop.f32.mrb[7].mxu1  ;;  %v251_v5 = vadd.f32 %v1209_v53, %v998_v23 }
  0xe7   :  { %v260_v57 = vmax.f32 %v206_v52, 0.0  ;;  %v246_v3 = vadd.f32 %v998_v23, %v245_v56 }
  0xe8   :  { %v269_v7 = vmax.f32 %v251_v5, 0.0 }
  0xe9   :  { %1223 = vmatprep.mubr.msk.f32.mxu1 %vm279_vm2, %v260_v57  ;;  %v268_v6 = vmax.f32 %v246_v3, 0.0  ;;  %v1033_v57 = vld [vmem:[%s1658_s6] ss:$0 sm:$0xff] }
  0xea   :  { %1224 = vmatmul.mubr.msk.f32.gmra.mrb[14].mxu1 %vm279_vm2, %v261_v54 }
  0xeb   :  { %1226 = vmatprep.mubr.msk.f32.mxu1 %vm279_vm2, %v262_v58 }
  0xee   :  { %1227 = vmatmul.mubr.msk.f32.gmra.mrb[16].mxu1 %vm279_vm2, %v263_v60 }
  0xef   :  { %1229 = vmatprep.mubr.msk.f32.mxu1 %vm279_vm2, %v264_v62 }
  0xf2   :  { %1230 = vmatmul.mubr.msk.f32.gmra.mrb[18].mxu1 %vm279_vm2, %v265_v0 }
  0xf3   :  { %1232 = vmatprep.mubr.msk.f32.mxu1 %vm279_vm2, %v266_v2 }
  0xf6   :  { %1233 = vmatmul.mubr.msk.f32.gmra.mrb[20].mxu1 %vm279_vm2, %v267_v4 }
  0xf7   :  { %1235 = vmatprep.mubr.msk.f32.mxu1 %vm279_vm2, %v268_v6 }
  0xfa   :  { %1236 = vmatmul.mubr.msk.f32.gmra.mrb[22].mxu1 %vm279_vm2, %v269_v7 }
 0x1b1   :  { %v1216_v9 = vpop.f32.mrb[8].mxu1 }
 0x1b2   :  { %v400_v10 = vadd.f32 %v1216_v9, %v1016_v8  ;;  %v394_v11 = vpop.f32.mrb[9].mxu1 }
 0x1b3   :  { %v395_v12 = vadd.f32 %v1016_v8, %v394_v11 }
 0x1b4   :  { %v474_v15 = vmax.f32 %v400_v10, 0.0 }
 0x1b5   :  { %v473_v13 = vmax.f32 %v395_v12, 0.0  ;;  %v1219_v14 = vpop.f32.mrb[10].mxu1 }
 0x1b6   :  { %v410_v16 = vadd.f32 %v1219_v14, %v1016_v8  ;;  %v404_v17 = vpop.f32.mrb[11].mxu1 }
 0x1b7   :  { %v405_v18 = vadd.f32 %v1016_v8, %v404_v17  ;;  %1242 = vmatprep.mubr.msk.f32.mxu0 %vm279_vm2, %v473_v13 }
 0x1b8   :  { %1243 = vmatmul.mubr.msk.f32.vlgmr.msra.gmra.mrb[8].mxu0 %vm279_vm2, %v474_v15  ;;  %v476_v21 = vmax.f32 %v410_v16, 0.0 }
 0x1b9   :  { %v475_v19 = vmax.f32 %v405_v18, 0.0  ;;  %v1222_v20 = vpop.f32.mrb[12].mxu1 }
 0x1ba   :  { %v420_v22 = vadd.f32 %v1222_v20, %v1016_v8  ;;  %v414_v23 = vpop.f32.mrb[13].mxu1 }
 0x1bb   :  { %v415_v24 = vadd.f32 %v1016_v8, %v414_v23  ;;  %1245 = vmatprep.mubr.msk.f32.mxu0 %vm279_vm2, %v475_v19 }
 0x1bc   :  { %v478_v25 = vmax.f32 %v420_v22, 0.0  ;;  %1246 = vmatmul.mubr.msk.f32.gmra.mrb[10].mxu0 %vm279_vm2, %v476_v21 }
 0x1bd   :  { %v477_v26 = vmax.f32 %v415_v24, 0.0  ;;  %v1225_v27 = vpop.f32.mrb[14].mxu1 }
 0x1be   :  { %v430_v28 = vadd.f32 %v1225_v27, %v1016_v8  ;;  %v424_v29 = vpop.f32.mrb[15].mxu1 }
 0x1bf   :  { %v425_v30 = vadd.f32 %v1016_v8, %v424_v29  ;;  %1248 = vmatprep.mubr.msk.f32.mxu0 %vm279_vm2, %v477_v26 }
 0x1c0   :  { %v480_v31 = vmax.f32 %v430_v28, 0.0  ;;  %1249 = vmatmul.mubr.msk.f32.gmra.mrb[12].mxu0 %vm279_vm2, %v478_v25 }
 0x1c1   :  { %v479_v32 = vmax.f32 %v425_v30, 0.0  ;;  %v1228_v33 = vpop.f32.mrb[16].mxu1 }
 0x1c2   :  { %v440_v34 = vadd.f32 %v1228_v33, %v1016_v8  ;;  %v434_v35 = vpop.f32.mrb[17].mxu1 }
 0x1c3   :  { %v435_v36 = vadd.f32 %v1016_v8, %v434_v35  ;;  %1251 = vmatprep.mubr.msk.f32.mxu0 %vm279_vm2, %v479_v32 }
 0x1c4   :  { %v482_v37 = vmax.f32 %v440_v34, 0.0  ;;  %1252 = vmatmul.mubr.msk.f32.gmra.mrb[14].mxu0 %vm279_vm2, %v480_v31 }
 0x1c5   :  { %v481_v38 = vmax.f32 %v435_v36, 0.0  ;;  %v1231_v39 = vpop.f32.mrb[18].mxu1 }
 0x1c6   :  { %v450_v40 = vadd.f32 %v1231_v39, %v1016_v8  ;;  %v444_v41 = vpop.f32.mrb[19].mxu1 }
 0x1c7   :  { %v445_v42 = vadd.f32 %v1016_v8, %v444_v41  ;;  %1254 = vmatprep.mubr.msk.f32.mxu0 %vm279_vm2, %v481_v38 }
 0x1c8   :  { %v484_v43 = vmax.f32 %v450_v40, 0.0  ;;  %1255 = vmatmul.mubr.msk.f32.gmra.mrb[16].mxu0 %vm279_vm2, %v482_v37 }
 0x1c9   :  { %v483_v44 = vmax.f32 %v445_v42, 0.0  ;;  %v1234_v45 = vpop.f32.mrb[20].mxu1 }
 0x1ca   :  { %v460_v46 = vadd.f32 %v1234_v45, %v1016_v8  ;;  %v454_v47 = vpop.f32.mrb[21].mxu1 }
 0x1cb   :  { %v455_v48 = vadd.f32 %v1016_v8, %v454_v47  ;;  %1257 = vmatprep.mubr.msk.f32.mxu0 %vm279_vm2, %v483_v44 }
 0x1cc   :  { %v486_v49 = vmax.f32 %v460_v46, 0.0  ;;  %1258 = vmatmul.mubr.msk.f32.gmra.mrb[18].mxu0 %vm279_vm2, %v484_v43 }
 0x1cd   :  { %v485_v50 = vmax.f32 %v455_v48, 0.0  ;;  %v1237_v51 = vpop.f32.mrb[22].mxu1 }
 0x1ce   :  { %v470_v52 = vadd.f32 %v1237_v51, %v1016_v8  ;;  %v464_v53 = vpop.f32.mrb[23].mxu1 }
 0x1cf   :  { %v465_v54 = vadd.f32 %v1016_v8, %v464_v53  ;;  %1260 = vmatprep.mubr.msk.f32.mxu0 %vm279_vm2, %v485_v50 }
 0x1d0   :  { %v488_v55 = vmax.f32 %v470_v52, 0.0  ;;  %1261 = vmatmul.mubr.msk.f32.gmra.mrb[20].mxu0 %vm279_vm2, %v486_v49 }
 0x1d1   :  { %v487_v56 = vmax.f32 %v465_v54, 0.0 }
 0x1d3   :  { %1263 = vmatprep.mubr.msk.f32.mxu0 %vm279_vm2, %v487_v56 }
 0x1d4   :  { %1264 = vmatmul.mubr.msk.f32.gmra.mrb[22].mxu0 %vm279_vm2, %v488_v55 }
 0x28b   :  { %v1244_v58 = vpop.f32.mrb[8].mxu0 }
 0x28c   :  { %v618_v59 = vadd.f32 %v1244_v58, %v1033_v57  ;;  %v612_v60 = vpop.f32.mrb[9].mxu0 }
 0x28d   :  { %v613_v62 = vadd.f32 %v1033_v57, %v612_v60 }
 0x28e   :  { %693 = vadd.xlane.f32.xlu0 %v618_v59 }
 0x28f   :  { %v1247_v61 = vpop.f32.mrb[10].mxu0 }
 0x290   :  { %v628_v63 = vadd.f32 %v1247_v61, %v1033_v57  ;;  %v622_v0 = vpop.f32.mrb[11].mxu0 }
 0x291   :  { %v623_v2 = vadd.f32 %v1033_v57, %v622_v0 }
 0x292   :  { %697 = vadd.xlane.f32.xlu1 %v628_v63  ;;  %691 = vadd.xlane.f32.xlu0 %v613_v62 }
 0x293   :  { %v1250_v1 = vpop.f32.mrb[12].mxu0 }
 0x294   :  { %v632_v3 = vpop.f32.mrb[13].mxu0  ;;  %v638_v6 = vadd.f32 %v1250_v1, %v1033_v57 }
 0x295   :  { %v633_v4 = vadd.f32 %v1033_v57, %v632_v3 }
 0x296   :  { %695 = vadd.xlane.f32.xlu1 %v623_v2 }
 0x297   :  { %v1253_v5 = vpop.f32.mrb[14].mxu0  ;;  %699 = vadd.xlane.f32.xlu0 %v633_v4 }
 0x298   :  { %v642_v7 = vpop.f32.mrb[15].mxu0  ;;  %v648_v10 = vadd.f32 %v1253_v5, %v1033_v57 }
 0x299   :  { %v643_v8 = vadd.f32 %v1033_v57, %v642_v7 }
 0x29a   :  { %701 = vadd.xlane.f32.xlu1 %v638_v6 }
 0x29b   :  { %v1256_v9 = vpop.f32.mrb[16].mxu0  ;;  %703 = vadd.xlane.f32.xlu0 %v643_v8 }
 0x29c   :  { %v652_v11 = vpop.f32.mrb[17].mxu0  ;;  %v1478_v14 = vadd.f32 %v1256_v9, %v1033_v57 }
 0x29d   :  { %v653_v12 = vadd.f32 %v1033_v57, %v652_v11 }
 0x29e   :  { %705 = vadd.xlane.f32.xlu1 %v648_v10 }
 0x29f   :  { %v1259_v13 = vpop.f32.mrb[18].mxu0  ;;  %707 = vadd.xlane.f32.xlu0 %v653_v12 }
 0x2a0   :  { %v662_v15 = vpop.f32.mrb[19].mxu0  ;;  %v1484_v18 = vadd.f32 %v1259_v13, %v1033_v57 }
 0x2a1   :  { %v1480_v16 = vadd.f32 %v1033_v57, %v662_v15 }
 0x2a2   :  { %709 = vadd.xlane.f32.xlu1 %v1478_v14 }
 0x2a3   :  { %v1262_v17 = vpop.f32.mrb[20].mxu0  ;;  %711 = vadd.xlane.f32.xlu0 %v1480_v16 }
 0x2a4   :  { %v672_v19 = vpop.f32.mrb[21].mxu0  ;;  %v1490_v22 = vadd.f32 %v1262_v17, %v1033_v57 }
 0x2a5   :  { %v1486_v20 = vadd.f32 %v1033_v57, %v672_v19 }
 0x2a6   :  { %713 = vadd.xlane.f32.xlu1 %v1484_v18 }
 0x2a7   :  { %v1265_v21 = vpop.f32.mrb[22].mxu0  ;;  %715 = vadd.xlane.f32.xlu0 %v1486_v20 }
 0x2a8   :  { %v682_v23 = vpop.f32.mrb[23].mxu0  ;;  %v1496_v25 = vadd.f32 %v1265_v21, %v1033_v57 }
 0x2a9   :  { %v1492_v24 = vadd.f32 %v1033_v57, %v682_v23 }
 0x2aa   :  { %717 = vadd.xlane.f32.xlu1 %v1490_v22 }
 0x2ab   :  { %719 = vadd.xlane.f32.xlu0 %v1492_v24 }
 0x2ae   :  { %721 = vadd.xlane.f32.xlu1 %v1496_v25 }
 0x31b   :  { %v694_v26 = vpop.xlane.xlu0 %693 }
 0x31c   :  { %v725_v27 = vmul.f32 0.0078125, %v694_v26 }
 0x31e   :  { %v1499_v28 = vsub.f32 %v618_v59, %v725_v27 }
 0x31f   :  { %v698_v29 = vpop.xlane.xlu1 %697  ;;  %v692_v30 = vpop.xlane.xlu0 %691 }
 0x320   :  { %v727_v31 = vmul.f32 0.0078125, %v698_v29  ;;  %v724_v32 = vmul.f32 0.0078125, %v692_v30  ;;  %v757_v33 = vmul.f32 %v1499_v28, %v1499_v28 }
 0x322   :  { %v1503_v34 = vsub.f32 %v628_v63, %v727_v31  ;;  %v1505_v35 = vsub.f32 %v613_v62, %v724_v32  ;;  %774 = vadd.xlane.f32.xlu1 %v757_v33 }
 0x323   :  { %v696_v36 = vpop.xlane.xlu1 %695 }
 0x324   :  { %v726_v37 = vmul.f32 0.0078125, %v696_v36  ;;  %v700_v38 = vpop.xlane.xlu0 %699  ;;  %v759_v39 = vmul.f32 %v1503_v34, %v1503_v34  ;;  %v756_v40 = vmul.f32 %v1505_v35, %v1505_v35 }
 0x325   :  { %v728_v41 = vmul.f32 0.0078125, %v700_v38 }
 0x326   :  { %v1511_v42 = vsub.f32 %v623_v2, %v726_v37  ;;  %778 = vadd.xlane.f32.xlu1 %v759_v39  ;;  %772 = vadd.xlane.f32.xlu0 %v756_v40 }
 0x327   :  { %v702_v43 = vpop.xlane.xlu1 %701  ;;  %v1513_v44 = vsub.f32 %v633_v4, %v728_v41 }
 0x328   :  { %v729_v45 = vmul.f32 0.0078125, %v702_v43  ;;  %v704_v46 = vpop.xlane.xlu0 %703  ;;  %v758_v47 = vmul.f32 %v1511_v42, %v1511_v42 }
 0x329   :  { %v730_v48 = vmul.f32 0.0078125, %v704_v46  ;;  %v760_v55 = vmul.f32 %v1513_v44, %v1513_v44 }
 0x32a   :  { %v1517_v49 = vsub.f32 %v638_v6, %v729_v45  ;;  %776 = vadd.xlane.f32.xlu0 %v758_v47 }
 0x32b   :  { %v706_v50 = vpop.xlane.xlu1 %705  ;;  %v1519_v51 = vsub.f32 %v643_v8, %v730_v48 }
 0x32c   :  { %v731_v52 = vmul.f32 0.0078125, %v706_v50  ;;  %v708_v53 = vpop.xlane.xlu0 %707  ;;  %v761_v54 = vmul.f32 %v1517_v49, %v1517_v49 }
 0x32d   :  { %v732_v56 = vmul.f32 0.0078125, %v708_v53  ;;  %v762_v63 = vmul.f32 %v1519_v51, %v1519_v51 }
 0x32e   :  { %v1525_v57 = vsub.f32 %v648_v10, %v731_v52  ;;  %782 = vadd.xlane.f32.xlu1 %v761_v54  ;;  %780 = vadd.xlane.f32.xlu0 %v760_v55  ;;  %v1574_v55 = vld [vmem:[%s1659_s7] ss:$0 sm:$0xff] }
 0x32f   :  { %v710_v58 = vpop.xlane.xlu1 %709  ;;  %v1527_v59 = vsub.f32 %v653_v12, %v732_v56 }
 0x330   :  { %v733_v60 = vmul.f32 0.0078125, %v710_v58  ;;  %v712_v61 = vpop.xlane.xlu0 %711  ;;  %v763_v62 = vmul.f32 %v1525_v57, %v1525_v57 }
 0x331   :  { %v734_v0 = vmul.f32 0.0078125, %v712_v61  ;;  %v764_v7 = vmul.f32 %v1527_v59, %v1527_v59 }
 0x332   :  { %v1534_v1 = vsub.f32 %v1478_v14, %v733_v60  ;;  %786 = vadd.xlane.f32.xlu1 %v763_v62  ;;  %784 = vadd.xlane.f32.xlu0 %v762_v63 }
 0x333   :  { %v714_v2 = vpop.xlane.xlu1 %713  ;;  %v1537_v3 = vsub.f32 %v1480_v16, %v734_v0 }
 0x334   :  { %v735_v4 = vmul.f32 0.0078125, %v714_v2  ;;  %v716_v5 = vpop.xlane.xlu0 %715  ;;  %v765_v6 = vmul.f32 %v1534_v1, %v1534_v1 }
 0x335   :  { %v736_v8 = vmul.f32 0.0078125, %v716_v5  ;;  %v766_v15 = vmul.f32 %v1537_v3, %v1537_v3  ;;  %v1581_v5 = vld [vmem:[%s1660_s8] ss:$0 sm:$0xff] }
 0x336   :  { %v1544_v9 = vsub.f32 %v1484_v18, %v735_v4  ;;  %790 = vadd.xlane.f32.xlu1 %v765_v6  ;;  %788 = vadd.xlane.f32.xlu0 %v764_v7 }
 0x337   :  { %v718_v10 = vpop.xlane.xlu1 %717  ;;  %v1547_v11 = vsub.f32 %v1486_v20, %v736_v8 }
 0x338   :  { %v737_v12 = vmul.f32 0.0078125, %v718_v10  ;;  %v720_v13 = vpop.xlane.xlu0 %719  ;;  %v767_v14 = vmul.f32 %v1544_v9, %v1544_v9 }
 0x339   :  { %v738_v16 = vmul.f32 0.0078125, %v720_v13  ;;  %v768_v23 = vmul.f32 %v1547_v11, %v1547_v11 }
 0x33a   :  { %v1554_v17 = vsub.f32 %v1490_v22, %v737_v12  ;;  %794 = vadd.xlane.f32.xlu1 %v767_v14  ;;  %792 = vadd.xlane.f32.xlu0 %v766_v15 }
 0x33b   :  { %v722_v18 = vpop.xlane.xlu1 %721  ;;  %v1557_v19 = vsub.f32 %v1492_v24, %v738_v16 }
 0x33c   :  { %v739_v20 = vmul.f32 0.0078125, %v722_v18  ;;  %v769_v21 = vmul.f32 %v1554_v17, %v1554_v17 }
 0x33d   :  { %v770_v27 = vmul.f32 %v1557_v19, %v1557_v19 }
 0x33e   :  { %v1564_v26 = vsub.f32 %v1496_v25, %v739_v20  ;;  %798 = vadd.xlane.f32.xlu1 %v769_v21  ;;  %796 = vadd.xlane.f32.xlu0 %v768_v23 }
 0x340   :  { %v771_v22 = vmul.f32 %v1564_v26, %v1564_v26 }
 0x342   :  { %802 = vadd.xlane.f32.xlu1 %v771_v22  ;;  %800 = vadd.xlane.f32.xlu0 %v770_v27 }
 0x3af   :  { %v775_v24 = vpop.xlane.xlu1 %774 }
 0x3b0   :  { %v805_v29 = vmul.f32 0.0078125, %v775_v24 }
 0x3b2   :  { %v821_v30 = vadd.f32 1e-05, %v805_v29 }
 0x3b3   :  { %v779_v31 = vpop.xlane.xlu1 %778  ;;  %v773_v32 = vpop.xlane.xlu0 %772 }
 0x3b4   :  { %1276 = vrsqrt.f32 %v821_v30  ;;  %v807_v33 = vmul.f32 0.0078125, %v779_v31  ;;  %v804_v36 = vmul.f32 0.0078125, %v773_v32 }
 0x3b6   :  { %v823_v25 = vadd.f32 1e-05, %v807_v33  ;;  %v820_v37 = vadd.f32 1e-05, %v804_v36 }
 0x3b7   :  { %v777_v38 = vpop.xlane.xlu0 %776 }
 0x3b8   :  { %1278 = vrsqrt.f32 %v823_v25  ;;  %v806_v39 = vmul.f32 0.0078125, %v777_v38 }
 0x3b9   :  { %1280 = vrsqrt.f32 %v820_v37 }
 0x3ba   :  { %v822_v40 = vadd.f32 1e-05, %v806_v39 }
 0x3bb   :  { %v783_v41 = vpop.xlane.xlu1 %782  ;;  %v781_v43 = vpop.xlane.xlu0 %780 }
 0x3bc   :  { %1282 = vrsqrt.f32 %v822_v40  ;;  %v809_v45 = vmul.f32 0.0078125, %v783_v41  ;;  %v808_v46 = vmul.f32 0.0078125, %v781_v43 }
 0x3be   :  { %v1277_v47 = vpop.eup %1276  ;;  %v825_v48 = vadd.f32 1e-05, %v809_v45  ;;  %v824_v50 = vadd.f32 1e-05, %v808_v46 }
 0x3bf   :  { %v853_v52 = vmul.f32 %v1277_v47, %v1499_v28  ;;  %v787_v53 = vpop.xlane.xlu1 %786  ;;  %v785_v54 = vpop.xlane.xlu0 %784 }
 0x3c0   :  { %1284 = vrsqrt.f32 %v825_v48  ;;  %v811_v56 = vmul.f32 0.0078125, %v787_v53  ;;  %v810_v58 = vmul.f32 0.0078125, %v785_v54 }
 0x3c1   :  { %1286 = vrsqrt.f32 %v824_v50  ;;  %v876_v0 = vmul.f32 %v1574_v55, %v853_v52 }
 0x3c2   :  { %v1279_v60 = vpop.eup %1278  ;;  %v827_v61 = vadd.f32 1e-05, %v811_v56  ;;  %v826_v62 = vadd.f32 1e-05, %v810_v58 }
 0x3c3   :  { %v1281_v63 = vpop.eup %1280  ;;  %v855_v2 = vmul.f32 %v1279_v60, %v1503_v34  ;;  %v791_v28 = vpop.xlane.xlu1 %790  ;;  %v899_v34 = vadd.f32 %v1581_v5, %v876_v0 }
 0x3c4   :  { %v789_v4 = vpop.xlane.xlu0 %788  ;;  %v852_v6 = vmul.f32 %v1281_v63, %v1505_v35  ;;  %1288 = vrsqrt.f32 %v827_v61  ;;  %v813_v7 = vmul.f32 0.0078125, %v791_v28 }
 0x3c5   :  { %v812_v8 = vmul.f32 0.0078125, %v789_v4  ;;  %1290 = vrsqrt.f32 %v826_v62  ;;  %v878_v15 = vmul.f32 %v1574_v55, %v855_v2 }
 0x3c6   :  { %v1283_v10 = vpop.eup %1282  ;;  %v875_v12 = vmul.f32 %v1574_v55, %v852_v6  ;;  %v829_v13 = vadd.f32 1e-05, %v813_v7 }
 0x3c7   :  { %v828_v14 = vadd.f32 1e-05, %v812_v8  ;;  %v854_v16 = vmul.f32 %v1283_v10, %v1511_v42  ;;  %v795_v18 = vpop.xlane.xlu1 %794  ;;  %v901_v32 = vadd.f32 %v1581_v5, %v878_v15 }
 0x3c8   :  { %v793_v20 = vpop.xlane.xlu0 %792  ;;  %v898_v21 = vadd.f32 %v1581_v5, %v875_v12  ;;  %1292 = vrsqrt.f32 %v829_v13  ;;  %v815_v35 = vmul.f32 0.0078125, %v795_v18 }
 0x3c9   :  { %v814_v23 = vmul.f32 0.0078125, %v793_v20  ;;  %v877_v22 = vmul.f32 %v1574_v55, %v854_v16  ;;  %1294 = vrsqrt.f32 %v828_v14 }
 0x3ca   :  { %v1285_v27 = vpop.eup %1284  ;;  %v1087_v24 = vpack.c.bf16 %v899_v34, %v898_v21  ;;  %v831_v29 = vadd.f32 1e-05, %v815_v35 }
 0x3cb   :  { %v830_v30 = vadd.f32 1e-05, %v814_v23  ;;  %v1287_v31 = vpop.eup %1286  ;;  %v900_v33 = vadd.f32 %v1581_v5, %v877_v22  ;;  %v857_v42 = vmul.f32 %v1285_v27, %v1517_v49  ;;  %v799_v36 = vpop.xlane.xlu1 %798 }
 0x3cc   :  { %v797_v25 = vpop.xlane.xlu0 %796  ;;  %1088 = vst [vmem:[%s1661_s9] sm:$0xff] %v1087_v24   ;;  %v856_v37 = vmul.f32 %v1287_v31, %v1513_v44  ;;  %1296 = vrsqrt.f32 %v831_v29  ;;  %v817_v38 = vmul.f32 0.0078125, %v799_v36 }
 0x3cd   :  { %v816_v39 = vmul.f32 0.0078125, %v797_v25  ;;  %v1092_v40 = vpack.c.bf16 %v901_v32, %v900_v33  ;;  %v880_v41 = vmul.f32 %v1574_v55, %v857_v42  ;;  %1298 = vrsqrt.f32 %v830_v30 }
 0x3ce   :  { %v1289_v43 = vpop.eup %1288  ;;  %v879_v45 = vmul.f32 %v1574_v55, %v856_v37  ;;  %v833_v46 = vadd.f32 1e-05, %v817_v38 }
 0x3cf   :  { %v832_v49 = vadd.f32 1e-05, %v816_v39  ;;  %v1291_v47 = vpop.eup %1290  ;;  %1124 = vst [vmem:[%s1661_s9 + $0x8] sm:$0xff] %v1092_v40   ;;  %v903_v48 = vadd.f32 %v1581_v5, %v880_v41  ;;  %v859_v44 = vmul.f32 %v1289_v43, %v1525_v57  ;;  %v803_v50 = vpop.xlane.xlu1 %802 }
 0x3d0   :  { %v801_v52 = vpop.xlane.xlu0 %800  ;;  %v902_v53 = vadd.f32 %v1581_v5, %v879_v45  ;;  %v858_v54 = vmul.f32 %v1291_v47, %v1519_v51  ;;  %1300 = vrsqrt.f32 %v833_v46  ;;  %v819_v56 = vmul.f32 0.0078125, %v803_v50 }
 0x3d1   :  { %v882_v58 = vmul.f32 %v1574_v55, %v859_v44  ;;  %1302 = vrsqrt.f32 %v832_v49  ;;  %v818_v60 = vmul.f32 0.0078125, %v801_v52 }
 0x3d2   :  { %v1293_v61 = vpop.eup %1292  ;;  %v1097_v62 = vpack.c.bf16 %v903_v48, %v902_v53  ;;  %v881_v63 = vmul.f32 %v1574_v55, %v858_v54  ;;  %v835_v0 = vadd.f32 1e-05, %v819_v56 }
 0x3d3   :  { %v1295_v2 = vpop.eup %1294  ;;  %v905_v57 = vadd.f32 %v1581_v5, %v882_v58  ;;  %v861_v28 = vmul.f32 %v1293_v61, %v1534_v1  ;;  %v834_v4 = vadd.f32 1e-05, %v818_v60 }
 0x3d4   :  { %1125 = vst [vmem:[%s1661_s9 + $0x10] sm:$0xff] %v1097_v62   ;;  %v904_v51 = vadd.f32 %v1581_v5, %v881_v63  ;;  %v860_v6 = vmul.f32 %v1295_v2, %v1527_v59  ;;  %1304 = vrsqrt.f32 %v835_v0 }
 0x3d5   :  { %v884_v7 = vmul.f32 %v1574_v55, %v861_v28  ;;  %1306 = vrsqrt.f32 %v834_v4 }
 0x3d6   :  { %v1297_v8 = vpop.eup %1296  ;;  %v1102_v10 = vpack.c.bf16 %v905_v57, %v904_v51  ;;  %v883_v12 = vmul.f32 %v1574_v55, %v860_v6 }
 0x3d7   :  { %v1299_v13 = vpop.eup %1298  ;;  %v907_v1 = vadd.f32 %v1581_v5, %v884_v7  ;;  %v863_v14 = vmul.f32 %v1297_v8, %v1544_v9 }
 0x3d8   :  { %1126 = vst [vmem:[%s1661_s9 + $0x18] sm:$0xff] %v1102_v10   ;;  %v906_v34 = vadd.f32 %v1581_v5, %v883_v12  ;;  %v862_v59 = vmul.f32 %v1299_v13, %v1537_v3 }
 0x3d9   :  { %v886_v15 = vmul.f32 %v1574_v55, %v863_v14 }
 0x3da   :  { %v1301_v16 = vpop.eup %1300  ;;  %v1107_v18 = vpack.c.bf16 %v907_v1, %v906_v34  ;;  %v885_v20 = vmul.f32 %v1574_v55, %v862_v59 }
 0x3db   :  { %v1303_v21 = vpop.eup %1302  ;;  %v909_v35 = vadd.f32 %v1581_v5, %v886_v15  ;;  %v865_v23 = vmul.f32 %v1301_v16, %v1554_v17 }
 0x3dc   :  { %1127 = vst [vmem:[%s1661_s9 + $0x20] sm:$0xff] %v1107_v18   ;;  %v908_v9 = vadd.f32 %v1581_v5, %v885_v20  ;;  %v864_v22 = vmul.f32 %v1303_v21, %v1547_v11 }
 0x3dd   :  { %v888_v3 = vmul.f32 %v1574_v55, %v865_v23 }
 0x3de   :  { %v1305_v27 = vpop.eup %1304  ;;  %v1112_v24 = vpack.c.bf16 %v909_v35, %v908_v9  ;;  %v887_v29 = vmul.f32 %v1574_v55, %v864_v22 }
 0x3df   :  { %v1307_v30 = vpop.eup %1306  ;;  %v911_v31 = vadd.f32 %v1581_v5, %v888_v3  ;;  %v867_v32 = vmul.f32 %v1305_v27, %v1564_v26 }
 0x3e0   :  { %1128 = vst [vmem:[%s1661_s9 + $0x28] sm:$0xff] %v1112_v24   ;;  %v910_v17 = vadd.f32 %v1581_v5, %v887_v29  ;;  %v866_v33 = vmul.f32 %v1307_v30, %v1557_v19 }
 0x3e1   :  { %v890_v11 = vmul.f32 %v1574_v55, %v867_v32 }
 0x3e2   :  { %v1117_v42 = vpack.c.bf16 %v911_v31, %v910_v17  ;;  %v889_v36 = vmul.f32 %v1574_v55, %v866_v33 }
 0x3e3   :  { %v913_v25 = vadd.f32 %v1581_v5, %v890_v11 }
 0x3e4   :  { %1129 = vst [vmem:[%s1661_s9 + $0x30] sm:$0xff] %v1117_v42   ;;  %v912_v26 = vadd.f32 %v1581_v5, %v889_v36 }
 0x3e6   :  { %v1122_v37 = vpack.c.bf16 %v913_v25, %v912_v26 }
 0x3e8   :  { %1130 = vst [vmem:[%s1661_s9 + $0x38] sm:$0xff] %v1122_v37  }

// kernel: _lambda_.12
= control target key start
LH: loop header
LB: loop body
LE: loop exit
PB: predicated region body
PF: predicated region fallthrough
CT: control target
= control target key end

     0   :  { %v25_v0 = vlaneseq  ;;  %v409_v11 = vmov 1.0|1.0   ;;  %s464_s1 = inlined_call_operand.vmem [shape: bf16[128,128], index: 1, kind: input, shape index: {}]   ;;  %s465_s0 = inlined_call_operand.vmem [shape: s32[1,128], index: 0, kind: input, shape index: {}]   ;;  %s466_s2 = inlined_call_operand.vmem [shape: bf16[64,128], index: 2, kind: output, shape index: {}]  }
   0x1   :  { %v401_v1 = vld [vmem:[%s464_s1] sm:$0xff]   ;;  %v402_v2 = vld [vmem:[%s464_s1 + $0x8] sm:$0xff]   ;;  %v403_v4 = vld [vmem:[%s464_s1 + $0x10] sm:$0xff]  }
   0x2   :  { %v26_v3 = vshrl.u32 %v25_v0, 7  ;;  %360 = vmatprep.subr.bf16.mxu0 %v401_v1  ;;  %384 = vmatprep.subr.bf16.mxu1 %v401_v1  ;;  %v404_v8 = vld [vmem:[%s464_s1 + $0x18] sm:$0xff]   ;;  %v284_v9 = vld [vmem:[%s465_s0] ss:$0 sm:$0xff]  ;;  %v406_v12 = vld [vmem:[%s464_s1 + $0x28] sm:$0xff]  }
   0x3   :  { %361 = vmatpush3.bf16.msra.mxu0 %v401_v1  ;;  %392 = vmatpush3.bf16.msra.mxu1 %v401_v1  ;;  %v405_v10 = vld [vmem:[%s464_s1 + $0x20] sm:$0xff]   ;;  %v407_v13 = vld [vmem:[%s464_s1 + $0x30] sm:$0xff]   ;;  %v408_v16 = vld [vmem:[%s464_s1 + $0x38] sm:$0xff]  }
   0x4   :  { %362 = vmatprep.subr.bf16.mxu0 %v402_v2  ;;  %385 = vmatprep.subr.bf16.mxu1 %v402_v2  ;;  %v27_v5 = vadd.s32 8, %v26_v3  ;;  %v30_v6 = vadd.s32 32, %v26_v3  ;;  %v31_v7 = vadd.s32 40, %v26_v3  ;;  %vm48_vm0 = vcmp.eq.s32.totalorder %v26_v3, %v284_v9 }
   0x5   :  { %v28_v14 = vadd.s32 16, %v26_v3  ;;  %v29_v15 = vadd.s32 24, %v26_v3  ;;  %v32_v17 = vadd.s32 48, %v26_v3  ;;  %v33_v18 = vadd.s32 56, %v26_v3 }
   0x6   :  { %vm49_vm1 = vcmp.eq.s32.totalorder %v27_v5, %v284_v9  ;;  %vm52_vm2 = vcmp.eq.s32.totalorder %v30_v6, %v284_v9  ;;  %vm53_vm3 = vcmp.eq.s32.totalorder %v31_v7, %v284_v9 }
   0x7   :  { %363 = vmatpush3.bf16.msra.mxu0 %v402_v2  ;;  %393 = vmatpush3.bf16.msra.mxu1 %v402_v2  ;;  %vm301_vm4 = vmpackc.low %vm49_vm1, %vm48_vm0  ;;  %vm50_vm6 = vcmp.eq.s32.totalorder %v28_v14, %v284_v9  ;;  %vm51_vm7 = vcmp.eq.s32.totalorder %v29_v15, %v284_v9  ;;  %vm54_vm8 = vcmp.eq.s32.totalorder %v32_v17, %v284_v9 }
   0x8   :  { %364 = vmatprep.subr.bf16.mxu0 %v403_v4  ;;  %386 = vmatprep.subr.bf16.mxu1 %v403_v4  ;;  %vm305_vm5 = vmpackc.low %vm53_vm3, %vm52_vm2  ;;  %vm55_vm9 = vcmp.eq.s32.totalorder %v33_v18, %v284_v9 }
   0x9   :  { %376 = vmatprep.mubr.msk.bf16.mxu0 %vm301_vm4, %v409_v11  ;;  %380 = vmatprep.mubr.msk.bf16.mxu1 %vm305_vm5, %v409_v11  ;;  %vm303_vm10 = vmpackc.low %vm51_vm7, %vm50_vm6 }
   0xa   :  { %vm307_vm11 = vmpackc.low %vm55_vm9, %vm54_vm8 }
   0xb   :  { %365 = vmatpush3.bf16.msra.mxu0 %v403_v4  ;;  %394 = vmatpush3.bf16.msra.mxu1 %v403_v4 }
   0xc   :  { %366 = vmatprep.subr.bf16.mxu0 %v404_v8  ;;  %387 = vmatprep.subr.bf16.mxu1 %v404_v8 }
   0xf   :  { %367 = vmatpush3.bf16.msra.mxu0 %v404_v8  ;;  %395 = vmatpush3.bf16.msra.mxu1 %v404_v8 }
  0x10   :  { %368 = vmatprep.subr.bf16.mxu0 %v405_v10  ;;  %388 = vmatprep.subr.bf16.mxu1 %v405_v10 }
  0x13   :  { %369 = vmatpush3.bf16.msra.mxu0 %v405_v10  ;;  %396 = vmatpush3.bf16.msra.mxu1 %v405_v10 }
  0x14   :  { %370 = vmatprep.subr.bf16.mxu0 %v406_v12  ;;  %389 = vmatprep.subr.bf16.mxu1 %v406_v12 }
  0x17   :  { %371 = vmatpush3.bf16.msra.mxu0 %v406_v12  ;;  %397 = vmatpush3.bf16.msra.mxu1 %v406_v12 }
  0x18   :  { %372 = vmatprep.subr.bf16.mxu0 %v407_v13  ;;  %390 = vmatprep.subr.bf16.mxu1 %v407_v13 }
  0x1b   :  { %373 = vmatpush3.bf16.msra.mxu0 %v407_v13  ;;  %398 = vmatpush3.bf16.msra.mxu1 %v407_v13 }
  0x1c   :  { %374 = vmatprep.subr.bf16.mxu0 %v408_v16  ;;  %391 = vmatprep.subr.bf16.mxu1 %v408_v16 }
  0x1f   :  { %375 = vmatpush3.bf16.msra.mxu0 %v408_v16  ;;  %399 = vmatpush3.bf16.msra.mxu1 %v408_v16 }
  0x22   :  { %377 = vmatmul.mubr.msk.bf16.vlgmr.msra.gmra.mrb[0].mxu0 %vm303_vm10, %v409_v11  ;;  %381 = vmatmul.mubr.msk.bf16.vlgmr.msra.gmra.mrb[0].mxu1 %vm307_vm11, %v409_v11 }
  0xf5   :  { %v378_v19 = vpop.f32.mrb[0].mxu0  ;;  %v382_v20 = vpop.f32.mrb[0].mxu1 }
  0xf6   :  { %v182_v21 = vpop.f32.mrb[1].mxu0  ;;  %v198_v22 = vpop.f32.mrb[1].mxu1 }
  0xf7   :  { %v379_v23 = vpop.f32.mrb[2].mxu0  ;;  %v383_v24 = vpop.f32.mrb[2].mxu1 }
  0xf8   :  { %v333_v25 = vpack.c.bf16 %v379_v23, %v378_v19  ;;  %v343_v26 = vpack.c.bf16 %v383_v24, %v382_v20  ;;  %v185_v27 = vpop.f32.mrb[3].mxu0  ;;  %v201_v28 = vpop.f32.mrb[3].mxu1 }
  0xf9   :  { %v328_v29 = vpack.c.bf16 %v185_v27, %v182_v21  ;;  %v338_v30 = vpack.c.bf16 %v201_v28, %v198_v22 }
  0xfa   :  { %345 = vst [vmem:[%s466_s2 + $0x8] sm:$0xff] %v333_v25   ;;  %347 = vst [vmem:[%s466_s2 + $0x18] sm:$0xff] %v343_v26  }
  0xfb   :  { %329 = vst [vmem:[%s466_s2] sm:$0xff] %v328_v29   ;;  %346 = vst [vmem:[%s466_s2 + $0x10] sm:$0xff] %v338_v30  }

// kernel: _lambda_.11
= control target key start
LH: loop header
LB: loop body
LE: loop exit
PB: predicated region body
PF: predicated region fallthrough
CT: control target
= control target key end

     0   :  { %s2433_s4 = inlined_call_operand.vmem [shape: bf16[128,128], index: 4, kind: input, shape index: {}]   ;;  %s2434_s1 = inlined_call_operand.vmem [shape: bf16[128,128], index: 1, kind: input, shape index: {}]   ;;  %s2435_s3 = inlined_call_operand.vmem [shape: bf16[128,128], index: 3, kind: input, shape index: {}]   ;;  %s2436_s0 = inlined_call_operand.vmem [shape: bf16[128,128], index: 0, kind: input, shape index: {}]   ;;  %s2437_s5 = inlined_call_operand.vmem [shape: bf16[128,128], index: 5, kind: input, shape index: {}]   ;;  %s2438_s2 = inlined_call_operand.vmem [shape: bf16[128,128], index: 2, kind: input, shape index: {}]   ;;  %s2439_s7 = inlined_call_operand.vmem [shape: bf16[128,128], index: 7, kind: input, shape index: {}]   ;;  %s2440_s9 = inlined_call_operand.vmem [shape: bf16[128,128], index: 9, kind: input, shape index: {}]   ;;  %s2441_s6 = inlined_call_operand.vmem [shape: f32[1,128], index: 6, kind: input, shape index: {}]   ;;  %s2442_s8 = inlined_call_operand.vmem [shape: f32[1,128], index: 8, kind: input, shape index: {}]   ;;  %s2443_s10 = inlined_call_operand.vmem [shape: f32[1,128], index: 10, kind: input, shape index: {}]   ;;  %s2444_s11 = inlined_call_operand.vmem [shape: f32[1,128], index: 11, kind: input, shape index: {}]   ;;  %s2445_s12 = inlined_call_operand.vmem [shape: f32[1,128], index: 12, kind: input, shape index: {}]   ;;  %s2446_s13 = inlined_call_operand.vmem [shape: bf16[128,128], index: 13, kind: output, shape index: {}]  }
   0x1   :  { %v1870_v0 = vld [vmem:[%s2433_s4] sm:$0xff]   ;;  %v1871_v1 = vld [vmem:[%s2433_s4 + $0x8] sm:$0xff]   ;;  %v1872_v2 = vld [vmem:[%s2433_s4 + $0x10] sm:$0xff]  }
   0x2   :  { %1678 = vmatprep.subr.bf16.mxu0 %v1870_v0  ;;  %v1873_v3 = vld [vmem:[%s2433_s4 + $0x18] sm:$0xff]   ;;  %v1878_v4 = vld [vmem:[%s2434_s1] sm:$0xff]   ;;  %v1875_v6 = vld [vmem:[%s2433_s4 + $0x28] sm:$0xff]  }
   0x3   :  { %1679 = vmatpush3.bf16.msra.mxu0 %v1870_v0  ;;  %1694 = vmatprep.mubr.bf16.mxu0 %v1878_v4  ;;  %v1874_v5 = vld [vmem:[%s2433_s4 + $0x20] sm:$0xff]   ;;  %v1876_v7 = vld [vmem:[%s2433_s4 + $0x30] sm:$0xff]   ;;  %v1877_v8 = vld [vmem:[%s2433_s4 + $0x38] sm:$0xff]  }
   0x4   :  { %1680 = vmatprep.subr.bf16.mxu0 %v1871_v1  ;;  %v1880_v9 = vld [vmem:[%s2435_s3] sm:$0xff]   ;;  %v1879_v10 = vld [vmem:[%s2434_s1 + $0x8] sm:$0xff]   ;;  %v1882_v11 = vld [vmem:[%s2434_s1 + $0x10] sm:$0xff]  }
   0x5   :  { %v1881_v12 = vld [vmem:[%s2435_s3 + $0x8] sm:$0xff]   ;;  %v1884_v13 = vld [vmem:[%s2435_s3 + $0x10] sm:$0xff]   ;;  %v1883_v14 = vld [vmem:[%s2434_s1 + $0x18] sm:$0xff]  }
   0x6   :  { %v1886_v15 = vld [vmem:[%s2434_s1 + $0x20] sm:$0xff]   ;;  %v1885_v16 = vld [vmem:[%s2435_s3 + $0x18] sm:$0xff]   ;;  %v1887_v18 = vld [vmem:[%s2434_s1 + $0x28] sm:$0xff]  }
   0x7   :  { %1681 = vmatpush3.bf16.msra.mxu0 %v1871_v1  ;;  %v1888_v17 = vld [vmem:[%s2435_s3 + $0x20] sm:$0xff]   ;;  %v1889_v19 = vld [vmem:[%s2435_s3 + $0x28] sm:$0xff]   ;;  %v1890_v20 = vld [vmem:[%s2434_s1 + $0x30] sm:$0xff]  }
   0x8   :  { %1682 = vmatprep.subr.bf16.mxu0 %v1872_v2  ;;  %v1918_v21 = vld [vmem:[%s2439_s7] sm:$0xff]   ;;  %v1919_v22 = vld [vmem:[%s2439_s7 + $0x8] sm:$0xff]   ;;  %v1891_v23 = vld [vmem:[%s2434_s1 + $0x38] sm:$0xff]  }
   0x9   :  { %1774 = vmatprep.subr.bf16.mxu1 %v1918_v21  ;;  %v1892_v24 = vld [vmem:[%s2435_s3 + $0x30] sm:$0xff]   ;;  %v1894_v26 = vld [vmem:[%s2436_s0] sm:$0xff]   ;;  %v1893_v27 = vld [vmem:[%s2435_s3 + $0x38] sm:$0xff]  }
   0xa   :  { %1775 = vmatpush3.bf16.msra.mxu1 %v1918_v21  ;;  %v1920_v25 = vld [vmem:[%s2439_s7 + $0x10] sm:$0xff]   ;;  %v1921_v28 = vld [vmem:[%s2439_s7 + $0x18] sm:$0xff]   ;;  %v1896_v29 = vld [vmem:[%s2437_s5] sm:$0xff]  }
   0xb   :  { %1683 = vmatpush3.bf16.msra.mxu0 %v1872_v2  ;;  %1776 = vmatprep.subr.bf16.mxu1 %v1919_v22  ;;  %v1922_v30 = vld [vmem:[%s2439_s7 + $0x20] sm:$0xff]   ;;  %v1895_v31 = vld [vmem:[%s2436_s0 + $0x8] sm:$0xff]   ;;  %v1898_v32 = vld [vmem:[%s2436_s0 + $0x10] sm:$0xff]  }
   0xc   :  { %1684 = vmatprep.subr.bf16.mxu0 %v1873_v3  ;;  %v1897_v33 = vld [vmem:[%s2437_s5 + $0x8] sm:$0xff]   ;;  %v1900_v35 = vld [vmem:[%s2437_s5 + $0x10] sm:$0xff]   ;;  %v1899_v36 = vld [vmem:[%s2436_s0 + $0x18] sm:$0xff]  }
   0xd   :  { %v1923_v34 = vld [vmem:[%s2439_s7 + $0x28] sm:$0xff]   ;;  %v1902_v37 = vld [vmem:[%s2436_s0 + $0x20] sm:$0xff]   ;;  %v1901_v38 = vld [vmem:[%s2437_s5 + $0x18] sm:$0xff]  }
   0xe   :  { %1777 = vmatpush3.bf16.msra.mxu1 %v1919_v22  ;;  %v1904_v39 = vld [vmem:[%s2437_s5 + $0x20] sm:$0xff]   ;;  %v1903_v40 = vld [vmem:[%s2436_s0 + $0x28] sm:$0xff]   ;;  %v1906_v41 = vld [vmem:[%s2436_s0 + $0x30] sm:$0xff]  }
   0xf   :  { %1685 = vmatpush3.bf16.msra.mxu0 %v1873_v3  ;;  %1778 = vmatprep.subr.bf16.mxu1 %v1920_v25  ;;  %v1905_v42 = vld [vmem:[%s2437_s5 + $0x28] sm:$0xff]   ;;  %v1908_v43 = vld [vmem:[%s2437_s5 + $0x30] sm:$0xff]   ;;  %v1907_v44 = vld [vmem:[%s2436_s0 + $0x38] sm:$0xff]  }
  0x10   :  { %1686 = vmatprep.subr.bf16.mxu0 %v1874_v5  ;;  %v1910_v45 = vld [vmem:[%s2438_s2] sm:$0xff]   ;;  %v1909_v46 = vld [vmem:[%s2437_s5 + $0x38] sm:$0xff]   ;;  %v1911_v47 = vld [vmem:[%s2438_s2 + $0x8] sm:$0xff]  }
  0x11   :  { %v1912_v48 = vld [vmem:[%s2438_s2 + $0x10] sm:$0xff]   ;;  %v1913_v49 = vld [vmem:[%s2438_s2 + $0x18] sm:$0xff]   ;;  %v1914_v50 = vld [vmem:[%s2438_s2 + $0x20] sm:$0xff]  }
  0x12   :  { %1779 = vmatpush3.bf16.msra.mxu1 %v1920_v25  ;;  %v1915_v51 = vld [vmem:[%s2438_s2 + $0x28] sm:$0xff]   ;;  %v1916_v52 = vld [vmem:[%s2438_s2 + $0x30] sm:$0xff]   ;;  %v1917_v53 = vld [vmem:[%s2438_s2 + $0x38] sm:$0xff]  }
  0x13   :  { %1687 = vmatpush3.bf16.msra.mxu0 %v1874_v5  ;;  %1780 = vmatprep.subr.bf16.mxu1 %v1921_v28  ;;  %v1924_v54 = vld [vmem:[%s2439_s7 + $0x30] sm:$0xff]   ;;  %v1925_v55 = vld [vmem:[%s2439_s7 + $0x38] sm:$0xff]   ;;  %v1926_v56 = vld [vmem:[%s2440_s9] sm:$0xff]  }
  0x14   :  { %1688 = vmatprep.subr.bf16.mxu0 %v1875_v6  ;;  %v2210_v57 = vld [vmem:[%s2441_s6] ss:$0 sm:$0xff] }
  0x16   :  { %1781 = vmatpush3.bf16.msra.mxu1 %v1921_v28 }
  0x17   :  { %1689 = vmatpush3.bf16.msra.mxu0 %v1875_v6  ;;  %1782 = vmatprep.subr.bf16.mxu1 %v1922_v30 }
  0x18   :  { %1690 = vmatprep.subr.bf16.mxu0 %v1876_v7 }
  0x1a   :  { %1783 = vmatpush3.bf16.msra.mxu1 %v1922_v30 }
  0x1b   :  { %1691 = vmatpush3.bf16.msra.mxu0 %v1876_v7  ;;  %1784 = vmatprep.subr.bf16.mxu1 %v1923_v34 }
  0x1c   :  { %1692 = vmatprep.subr.bf16.mxu0 %v1877_v8 }
  0x1e   :  { %1785 = vmatpush3.bf16.msra.mxu1 %v1923_v34 }
  0x1f   :  { %1693 = vmatpush3.bf16.msra.mxu0 %v1877_v8  ;;  %1786 = vmatprep.subr.bf16.mxu1 %v1924_v54 }
  0x20   :  { %1710 = vmatprep.subr.bf16.mxu0 %v1880_v9 }
  0x22   :  { %1695 = vmatmul.mubr.bf16.vlgmr.msra.gmra.mrb[0].mxu0 %v1879_v10  ;;  %1787 = vmatpush3.bf16.msra.mxu1 %v1924_v54 }
  0x23   :  { %1711 = vmatpush3.bf16.msra.mxu0 %v1880_v9  ;;  %1698 = vmatprep.mubr.bf16.mxu0 %v1882_v11  ;;  %v1927_v11 = vld [vmem:[%s2440_s9 + $0x8] sm:$0xff]  }
  0x24   :  { %1712 = vmatprep.subr.bf16.mxu0 %v1881_v12  ;;  %1788 = vmatprep.subr.bf16.mxu1 %v1925_v55 }
  0x26   :  { %1789 = vmatpush3.bf16.msra.mxu1 %v1925_v55  ;;  %v1932_v55 = vld [vmem:[%s2440_s9 + $0x30] sm:$0xff]  }
  0x27   :  { %1713 = vmatpush3.bf16.msra.mxu0 %v1881_v12  ;;  %1806 = vmatprep.subr.bf16.mxu1 %v1926_v56 }
  0x28   :  { %1714 = vmatprep.subr.bf16.mxu0 %v1884_v13 }
  0x2a   :  { %1699 = vmatmul.mubr.bf16.gmra.mrb[4].mxu0 %v1883_v14 }
  0x2b   :  { %1715 = vmatpush3.bf16.msra.mxu0 %v1884_v13  ;;  %1702 = vmatprep.mubr.bf16.mxu0 %v1886_v15 }
  0x2c   :  { %1716 = vmatprep.subr.bf16.mxu0 %v1885_v16 }
  0x2f   :  { %1717 = vmatpush3.bf16.msra.mxu0 %v1885_v16 }
  0x30   :  { %1718 = vmatprep.subr.bf16.mxu0 %v1888_v17 }
  0x32   :  { %1703 = vmatmul.mubr.bf16.gmra.mrb[8].mxu0 %v1887_v18 }
  0x33   :  { %1719 = vmatpush3.bf16.msra.mxu0 %v1888_v17  ;;  %1706 = vmatprep.mubr.bf16.mxu0 %v1890_v20 }
  0x34   :  { %1720 = vmatprep.subr.bf16.mxu0 %v1889_v19 }
  0x37   :  { %1721 = vmatpush3.bf16.msra.mxu0 %v1889_v19  ;;  %v1928_v19 = vld [vmem:[%s2440_s9 + $0x10] sm:$0xff]  }
  0x38   :  { %1722 = vmatprep.subr.bf16.mxu0 %v1892_v24 }
  0x3a   :  { %1707 = vmatmul.mubr.bf16.gmra.mrb[12].mxu0 %v1891_v23 }
  0x3b   :  { %1723 = vmatpush3.bf16.msra.mxu0 %v1892_v24  ;;  %1726 = vmatprep.mubr.bf16.mxu0 %v1894_v26 }
  0x3c   :  { %1724 = vmatprep.subr.bf16.mxu0 %v1893_v27 }
  0x3f   :  { %1725 = vmatpush3.bf16.msra.mxu0 %v1893_v27  ;;  %v1929_v27 = vld [vmem:[%s2440_s9 + $0x18] sm:$0xff]  }
  0x40   :  { %1742 = vmatprep.subr.bf16.mxu0 %v1896_v29 }
  0x42   :  { %1727 = vmatmul.mubr.bf16.vlgmr.msra.gmra.mrb[0].mxu0 %v1895_v31 }
  0x43   :  { %1743 = vmatpush3.bf16.msra.mxu0 %v1896_v29  ;;  %1730 = vmatprep.mubr.bf16.mxu0 %v1898_v32 }
  0x44   :  { %1744 = vmatprep.subr.bf16.mxu0 %v1897_v33 }
  0x47   :  { %1745 = vmatpush3.bf16.msra.mxu0 %v1897_v33 }
  0x48   :  { %1746 = vmatprep.subr.bf16.mxu0 %v1900_v35 }
  0x4a   :  { %1731 = vmatmul.mubr.bf16.gmra.mrb[4].mxu0 %v1899_v36 }
  0x4b   :  { %1747 = vmatpush3.bf16.msra.mxu0 %v1900_v35  ;;  %1734 = vmatprep.mubr.bf16.mxu0 %v1902_v37  ;;  %v1930_v35 = vld [vmem:[%s2440_s9 + $0x20] sm:$0xff]  }
  0x4c   :  { %1748 = vmatprep.subr.bf16.mxu0 %v1901_v38 }
  0x4f   :  { %1749 = vmatpush3.bf16.msra.mxu0 %v1901_v38 }
  0x50   :  { %1750 = vmatprep.subr.bf16.mxu0 %v1904_v39 }
  0x52   :  { %1735 = vmatmul.mubr.bf16.gmra.mrb[8].mxu0 %v1903_v40 }
  0x53   :  { %1751 = vmatpush3.bf16.msra.mxu0 %v1904_v39  ;;  %1738 = vmatprep.mubr.bf16.mxu0 %v1906_v41 }
  0x54   :  { %1752 = vmatprep.subr.bf16.mxu0 %v1905_v42 }
  0x57   :  { %1753 = vmatpush3.bf16.msra.mxu0 %v1905_v42 }
  0x58   :  { %1754 = vmatprep.subr.bf16.mxu0 %v1908_v43 }
  0x5a   :  { %1739 = vmatmul.mubr.bf16.gmra.mrb[12].mxu0 %v1907_v44 }
  0x5b   :  { %1755 = vmatpush3.bf16.msra.mxu0 %v1908_v43  ;;  %1758 = vmatprep.mubr.bf16.mxu0 %v1910_v45  ;;  %v1931_v43 = vld [vmem:[%s2440_s9 + $0x28] sm:$0xff]  }
  0x5c   :  { %1756 = vmatprep.subr.bf16.mxu0 %v1909_v46 }
  0x5f   :  { %1757 = vmatpush3.bf16.msra.mxu0 %v1909_v46 }
  0x62   :  { %1759 = vmatmul.mubr.bf16.vlgmr.msra.gmra.mrb[0].mxu0 %v1911_v47 }
  0x63   :  { %1762 = vmatprep.mubr.bf16.mxu0 %v1912_v48 }
  0x6a   :  { %1763 = vmatmul.mubr.bf16.gmra.mrb[4].mxu0 %v1913_v49 }
  0x6b   :  { %1766 = vmatprep.mubr.bf16.mxu0 %v1914_v50 }
  0x72   :  { %1767 = vmatmul.mubr.bf16.gmra.mrb[8].mxu0 %v1915_v51 }
  0x73   :  { %1770 = vmatprep.mubr.bf16.mxu0 %v1916_v52 }
  0x7a   :  { %1771 = vmatmul.mubr.bf16.gmra.mrb[12].mxu0 %v1917_v53 }
 0x135   :  { %v1760_v58 = vpop.f32.mrb[0].mxu0 }
 0x136   :  { %v745_v59 = vadd.f32 %v1760_v58, %v2210_v57  ;;  %v657_v60 = vpop.f32.mrb[1].mxu0 }
 0x137   :  { %v743_v61 = vadd.f32 %v2210_v57, %v657_v60  ;;  %v1761_v62 = vpop.f32.mrb[2].mxu0 }
 0x138   :  { %v746_v63 = vadd.f32 %v1761_v62, %v2210_v57  ;;  %v660_v0 = vpop.f32.mrb[3].mxu0  ;;  %v761_v2 = vmax.f32 %v745_v59, 0.0 }
 0x139   :  { %v744_v1 = vadd.f32 %v2210_v57, %v660_v0  ;;  %v759_v4 = vmax.f32 %v743_v61, 0.0 }
 0x13a   :  { %v762_v3 = vmax.f32 %v746_v63, 0.0 }
 0x13b   :  { %v760_v5 = vmax.f32 %v744_v1, 0.0 }
 0x13c   :  { %v776_v6 = vpack.c.bf16 %v762_v3, %v761_v2 }
 0x13d   :  { %v1764_v7 = vpop.f32.mrb[4].mxu0  ;;  %v775_v8 = vpack.c.bf16 %v760_v5, %v759_v4 }
 0x13e   :  { %v749_v9 = vadd.f32 %v1764_v7, %v2210_v57  ;;  %v673_v10 = vpop.f32.mrb[5].mxu0 }
 0x13f   :  { %v747_v12 = vadd.f32 %v2210_v57, %v673_v10  ;;  %v1765_v13 = vpop.f32.mrb[6].mxu0  ;;  %1790 = vmatprep.mubr.bf16.mxu1 %v775_v8 }
 0x140   :  { %v750_v14 = vadd.f32 %v1765_v13, %v2210_v57  ;;  %v676_v15 = vpop.f32.mrb[7].mxu0  ;;  %1791 = vmatmul.mubr.bf16.vlgmr.msra.gmra.mrb[0].mxu1 %v776_v6  ;;  %v765_v17 = vmax.f32 %v749_v9, 0.0 }
 0x141   :  { %v748_v16 = vadd.f32 %v2210_v57, %v676_v15  ;;  %1807 = vmatpush3.bf16.msra.mxu1 %v1926_v56  ;;  %v763_v20 = vmax.f32 %v747_v12, 0.0  ;;  %v1933_v56 = vld [vmem:[%s2440_s9 + $0x38] sm:$0xff]  }
 0x142   :  { %v766_v18 = vmax.f32 %v750_v14, 0.0  ;;  %1808 = vmatprep.subr.bf16.mxu1 %v1927_v11 }
 0x143   :  { %v764_v21 = vmax.f32 %v748_v16, 0.0 }
 0x144   :  { %v778_v22 = vpack.c.bf16 %v766_v18, %v765_v17 }
 0x145   :  { %v777_v23 = vpack.c.bf16 %v764_v21, %v763_v20  ;;  %v1768_v24 = vpop.f32.mrb[8].mxu0  ;;  %1809 = vmatpush3.bf16.msra.mxu1 %v1927_v11 }
 0x146   :  { %v753_v25 = vadd.f32 %v1768_v24, %v2210_v57  ;;  %v689_v26 = vpop.f32.mrb[9].mxu0  ;;  %1810 = vmatprep.subr.bf16.mxu1 %v1928_v19 }
 0x147   :  { %v751_v28 = vadd.f32 %v2210_v57, %v689_v26  ;;  %v1769_v29 = vpop.f32.mrb[10].mxu0  ;;  %1794 = vmatprep.mubr.bf16.mxu1 %v777_v23 }
 0x148   :  { %v754_v30 = vadd.f32 %v1769_v29, %v2210_v57  ;;  %v692_v31 = vpop.f32.mrb[11].mxu0  ;;  %1795 = vmatmul.mubr.bf16.gmra.mrb[4].mxu1 %v778_v22  ;;  %v769_v33 = vmax.f32 %v753_v25, 0.0 }
 0x149   :  { %v752_v32 = vadd.f32 %v2210_v57, %v692_v31  ;;  %1811 = vmatpush3.bf16.msra.mxu1 %v1928_v19  ;;  %v767_v36 = vmax.f32 %v751_v28, 0.0 }
 0x14a   :  { %v770_v34 = vmax.f32 %v754_v30, 0.0  ;;  %1812 = vmatprep.subr.bf16.mxu1 %v1929_v27 }
 0x14b   :  { %v768_v37 = vmax.f32 %v752_v32, 0.0 }
 0x14c   :  { %v780_v38 = vpack.c.bf16 %v770_v34, %v769_v33 }
 0x14d   :  { %v779_v39 = vpack.c.bf16 %v768_v37, %v767_v36  ;;  %v1772_v40 = vpop.f32.mrb[12].mxu0  ;;  %1813 = vmatpush3.bf16.msra.mxu1 %v1929_v27 }
 0x14e   :  { %v757_v41 = vadd.f32 %v1772_v40, %v2210_v57  ;;  %v705_v42 = vpop.f32.mrb[13].mxu0  ;;  %1814 = vmatprep.subr.bf16.mxu1 %v1930_v35 }
 0x14f   :  { %v755_v44 = vadd.f32 %v2210_v57, %v705_v42  ;;  %v1773_v45 = vpop.f32.mrb[14].mxu0  ;;  %1798 = vmatprep.mubr.bf16.mxu1 %v779_v39 }
 0x150   :  { %v758_v46 = vadd.f32 %v1773_v45, %v2210_v57  ;;  %v708_v47 = vpop.f32.mrb[15].mxu0  ;;  %1799 = vmatmul.mubr.bf16.gmra.mrb[8].mxu1 %v780_v38  ;;  %v773_v49 = vmax.f32 %v757_v41, 0.0 }
 0x151   :  { %v756_v48 = vadd.f32 %v2210_v57, %v708_v47  ;;  %1815 = vmatpush3.bf16.msra.mxu1 %v1930_v35  ;;  %v771_v51 = vmax.f32 %v755_v44, 0.0  ;;  %v1499_v57 = vld [vmem:[%s2442_s8] ss:$0 sm:$0xff] }
 0x152   :  { %v774_v50 = vmax.f32 %v758_v46, 0.0  ;;  %1816 = vmatprep.subr.bf16.mxu1 %v1931_v43 }
 0x153   :  { %v772_v52 = vmax.f32 %v756_v48, 0.0 }
 0x154   :  { %v782_v53 = vpack.c.bf16 %v774_v50, %v773_v49  ;;  %v1508_v50 = vld [vmem:[%s2443_s10] ss:$0 sm:$0xff] }
 0x155   :  { %v781_v54 = vpack.c.bf16 %v772_v52, %v771_v51  ;;  %1817 = vmatpush3.bf16.msra.mxu1 %v1931_v43 }
 0x156   :  { %1818 = vmatprep.subr.bf16.mxu1 %v1932_v55 }
 0x157   :  { %1802 = vmatprep.mubr.bf16.mxu1 %v781_v54 }
 0x158   :  { %1803 = vmatmul.mubr.bf16.gmra.mrb[12].mxu1 %v782_v53 }
 0x159   :  { %1819 = vmatpush3.bf16.msra.mxu1 %v1932_v55 }
 0x15a   :  { %1820 = vmatprep.subr.bf16.mxu1 %v1933_v56 }
 0x15d   :  { %1821 = vmatpush3.bf16.msra.mxu1 %v1933_v56 }
 0x213   :  { %v1792_v58 = vpop.f32.mrb[0].mxu1 }
 0x214   :  { %v897_v59 = vadd.f32 %v1792_v58, %v1499_v57  ;;  %v888_v60 = vpop.f32.mrb[1].mxu1 }
 0x215   :  { %v889_v61 = vadd.f32 %v1499_v57, %v888_v60  ;;  %v1793_v62 = vpop.f32.mrb[2].mxu1 }
 0x216   :  { %v900_v63 = vadd.f32 %v1793_v62, %v1499_v57  ;;  %v891_v0 = vpop.f32.mrb[3].mxu1  ;;  %v953_v2 = vmax.f32 %v897_v59, 0.0 }
 0x217   :  { %v892_v1 = vadd.f32 %v1499_v57, %v891_v0  ;;  %v951_v4 = vmax.f32 %v889_v61, 0.0 }
 0x218   :  { %v954_v3 = vmax.f32 %v900_v63, 0.0 }
 0x219   :  { %v952_v5 = vmax.f32 %v892_v1, 0.0 }
 0x21a   :  { %v968_v6 = vpack.c.bf16 %v954_v3, %v953_v2 }
 0x21b   :  { %v967_v7 = vpack.c.bf16 %v952_v5, %v951_v4  ;;  %v1796_v8 = vpop.f32.mrb[4].mxu1 }
 0x21c   :  { %v913_v9 = vadd.f32 %v1796_v8, %v1499_v57  ;;  %v904_v10 = vpop.f32.mrb[5].mxu1 }
 0x21d   :  { %v905_v11 = vadd.f32 %v1499_v57, %v904_v10  ;;  %v1797_v12 = vpop.f32.mrb[6].mxu1  ;;  %1822 = vmatprep.mubr.bf16.mxu1 %v967_v7 }
 0x21e   :  { %v916_v13 = vadd.f32 %v1797_v12, %v1499_v57  ;;  %v907_v14 = vpop.f32.mrb[7].mxu1  ;;  %1823 = vmatmul.mubr.bf16.vlgmr.msra.gmra.mrb[16].mxu1 %v968_v6  ;;  %v957_v16 = vmax.f32 %v913_v9, 0.0 }
 0x21f   :  { %v908_v15 = vadd.f32 %v1499_v57, %v907_v14  ;;  %v955_v18 = vmax.f32 %v905_v11, 0.0 }
 0x220   :  { %v958_v17 = vmax.f32 %v916_v13, 0.0 }
 0x221   :  { %v956_v19 = vmax.f32 %v908_v15, 0.0 }
 0x222   :  { %v970_v20 = vpack.c.bf16 %v958_v17, %v957_v16 }
 0x223   :  { %v969_v21 = vpack.c.bf16 %v956_v19, %v955_v18  ;;  %v1800_v22 = vpop.f32.mrb[8].mxu1 }
 0x224   :  { %v929_v23 = vadd.f32 %v1800_v22, %v1499_v57  ;;  %v920_v24 = vpop.f32.mrb[9].mxu1 }
 0x225   :  { %v921_v25 = vadd.f32 %v1499_v57, %v920_v24  ;;  %v1801_v26 = vpop.f32.mrb[10].mxu1  ;;  %1826 = vmatprep.mubr.bf16.mxu1 %v969_v21 }
 0x226   :  { %v932_v27 = vadd.f32 %v1801_v26, %v1499_v57  ;;  %v923_v28 = vpop.f32.mrb[11].mxu1  ;;  %1827 = vmatmul.mubr.bf16.gmra.mrb[20].mxu1 %v970_v20  ;;  %v961_v30 = vmax.f32 %v929_v23, 0.0 }
 0x227   :  { %v924_v29 = vadd.f32 %v1499_v57, %v923_v28  ;;  %v959_v32 = vmax.f32 %v921_v25, 0.0 }
 0x228   :  { %v962_v31 = vmax.f32 %v932_v27, 0.0 }
 0x229   :  { %v960_v33 = vmax.f32 %v924_v29, 0.0 }
 0x22a   :  { %v972_v34 = vpack.c.bf16 %v962_v31, %v961_v30 }
 0x22b   :  { %v971_v35 = vpack.c.bf16 %v960_v33, %v959_v32  ;;  %v1804_v36 = vpop.f32.mrb[12].mxu1 }
 0x22c   :  { %v945_v37 = vadd.f32 %v1804_v36, %v1499_v57  ;;  %v936_v38 = vpop.f32.mrb[13].mxu1 }
 0x22d   :  { %v937_v39 = vadd.f32 %v1499_v57, %v936_v38  ;;  %v1805_v40 = vpop.f32.mrb[14].mxu1  ;;  %1830 = vmatprep.mubr.bf16.mxu1 %v971_v35 }
 0x22e   :  { %v948_v41 = vadd.f32 %v1805_v40, %v1499_v57  ;;  %v939_v42 = vpop.f32.mrb[15].mxu1  ;;  %1831 = vmatmul.mubr.bf16.gmra.mrb[24].mxu1 %v972_v34  ;;  %v965_v44 = vmax.f32 %v945_v37, 0.0 }
 0x22f   :  { %v940_v43 = vadd.f32 %v1499_v57, %v939_v42  ;;  %v963_v46 = vmax.f32 %v937_v39, 0.0 }
 0x230   :  { %v966_v45 = vmax.f32 %v948_v41, 0.0 }
 0x231   :  { %v964_v47 = vmax.f32 %v940_v43, 0.0 }
 0x232   :  { %v974_v48 = vpack.c.bf16 %v966_v45, %v965_v44 }
 0x233   :  { %v973_v49 = vpack.c.bf16 %v964_v47, %v963_v46 }
 0x235   :  { %1834 = vmatprep.mubr.bf16.mxu1 %v973_v49 }
 0x236   :  { %1835 = vmatmul.mubr.bf16.gmra.mrb[28].mxu1 %v974_v48 }
 0x2f1   :  { %v1824_v51 = vpop.f32.mrb[16].mxu1 }
 0x2f2   :  { %v1089_v52 = vadd.f32 %v1824_v51, %v1508_v50  ;;  %v1080_v53 = vpop.f32.mrb[17].mxu1 }
 0x2f3   :  { %v1081_v54 = vadd.f32 %v1508_v50, %v1080_v53  ;;  %v1825_v55 = vpop.f32.mrb[18].mxu1 }
 0x2f4   :  { %1147 = vadd.xlane.f32.xlu1 %v1089_v52  ;;  %v1083_v56 = vpop.f32.mrb[19].mxu1  ;;  %v1092_v57 = vadd.f32 %v1825_v55, %v1508_v50 }
 0x2f5   :  { %1143 = vadd.xlane.f32.xlu0 %v1081_v54  ;;  %v1084_v58 = vadd.f32 %v1508_v50, %v1083_v56 }
 0x2f8   :  { %1149 = vadd.xlane.f32.xlu1 %v1092_v57 }
 0x2f9   :  { %v1828_v59 = vpop.f32.mrb[20].mxu1  ;;  %1145 = vadd.xlane.f32.xlu0 %v1084_v58 }
 0x2fa   :  { %v1105_v60 = vadd.f32 %v1828_v59, %v1508_v50  ;;  %v1096_v61 = vpop.f32.mrb[21].mxu1 }
 0x2fb   :  { %v1829_v62 = vpop.f32.mrb[22].mxu1  ;;  %v1097_v1 = vadd.f32 %v1508_v50, %v1096_v61 }
 0x2fc   :  { %v1108_v63 = vadd.f32 %v1829_v62, %v1508_v50  ;;  %v1099_v0 = vpop.f32.mrb[23].mxu1 }
 0x2fd   :  { %1155 = vadd.xlane.f32.xlu0 %v1105_v60  ;;  %v1100_v2 = vadd.f32 %v1508_v50, %v1099_v0 }
 0x2fe   :  { %1157 = vadd.xlane.f32.xlu1 %v1108_v63 }
 0x301   :  { %v1832_v3 = vpop.f32.mrb[24].mxu1  ;;  %1151 = vadd.xlane.f32.xlu0 %v1097_v1 }
 0x302   :  { %v2255_v4 = vadd.f32 %v1832_v3, %v1508_v50  ;;  %v1112_v5 = vpop.f32.mrb[25].mxu1  ;;  %1153 = vadd.xlane.f32.xlu1 %v1100_v2 }
 0x303   :  { %v1833_v6 = vpop.f32.mrb[26].mxu1  ;;  %v2261_v9 = vadd.f32 %v1508_v50, %v1112_v5 }
 0x304   :  { %v2257_v7 = vadd.f32 %v1833_v6, %v1508_v50  ;;  %v1115_v8 = vpop.f32.mrb[27].mxu1 }
 0x305   :  { %1163 = vadd.xlane.f32.xlu0 %v2255_v4  ;;  %v2263_v10 = vadd.f32 %v1508_v50, %v1115_v8 }
 0x306   :  { %1165 = vadd.xlane.f32.xlu1 %v2257_v7 }
 0x309   :  { %1159 = vadd.xlane.f32.xlu0 %v2261_v9  ;;  %v1836_v11 = vpop.f32.mrb[28].mxu1 }
 0x30a   :  { %1161 = vadd.xlane.f32.xlu1 %v2263_v10  ;;  %v1128_v12 = vpop.f32.mrb[29].mxu1  ;;  %v2272_v17 = vadd.f32 %v1836_v11, %v1508_v50 }
 0x30b   :  { %v2267_v13 = vadd.f32 %v1508_v50, %v1128_v12  ;;  %v1837_v14 = vpop.f32.mrb[30].mxu1 }
 0x30c   :  { %v1131_v15 = vpop.f32.mrb[31].mxu1  ;;  %v2275_v18 = vadd.f32 %v1837_v14, %v1508_v50 }
 0x30d   :  { %v2269_v16 = vadd.f32 %v1508_v50, %v1131_v15  ;;  %1167 = vadd.xlane.f32.xlu0 %v2267_v13 }
 0x30f   :  { %1169 = vadd.xlane.f32.xlu1 %v2269_v16 }
 0x311   :  { %1171 = vadd.xlane.f32.xlu0 %v2272_v17 }
 0x313   :  { %1173 = vadd.xlane.f32.xlu1 %v2275_v18 }
 0x381   :  { %v1148_v19 = vpop.xlane.xlu1 %1147 }
 0x382   :  { %v1178_v20 = vmul.f32 0.0078125, %v1148_v19  ;;  %v1144_v21 = vpop.xlane.xlu0 %1143 }
 0x383   :  { %v1176_v22 = vmul.f32 0.0078125, %v1144_v21 }
 0x384   :  { %v2279_v23 = vsub.f32 %v1089_v52, %v1178_v20 }
 0x385   :  { %v1150_v24 = vpop.xlane.xlu1 %1149  ;;  %v2281_v25 = vsub.f32 %v1081_v54, %v1176_v22 }
 0x386   :  { %v1179_v26 = vmul.f32 0.0078125, %v1150_v24  ;;  %v1146_v27 = vpop.xlane.xlu0 %1145  ;;  %v1210_v28 = vmul.f32 %v2279_v23, %v2279_v23 }
 0x387   :  { %v1177_v29 = vmul.f32 0.0078125, %v1146_v27  ;;  %v1208_v34 = vmul.f32 %v2281_v25, %v2281_v25 }
 0x388   :  { %v2285_v30 = vsub.f32 %v1092_v57, %v1179_v26  ;;  %1228 = vadd.xlane.f32.xlu0 %v1210_v28 }
 0x389   :  { %v2287_v31 = vsub.f32 %v1084_v58, %v1177_v29 }
 0x38a   :  { %v1156_v32 = vpop.xlane.xlu0 %1155  ;;  %v1211_v33 = vmul.f32 %v2285_v30, %v2285_v30 }
 0x38b   :  { %v1182_v35 = vmul.f32 0.0078125, %v1156_v32  ;;  %v1158_v36 = vpop.xlane.xlu1 %1157  ;;  %v1209_v41 = vmul.f32 %v2287_v31, %v2287_v31 }
 0x38c   :  { %v1183_v37 = vmul.f32 0.0078125, %v1158_v36  ;;  %1230 = vadd.xlane.f32.xlu1 %v1211_v33  ;;  %1224 = vadd.xlane.f32.xlu0 %v1208_v34 }
 0x38d   :  { %v2293_v38 = vsub.f32 %v1105_v60, %v1182_v35 }
 0x38e   :  { %v2295_v39 = vsub.f32 %v1108_v63, %v1183_v37  ;;  %v1152_v40 = vpop.xlane.xlu0 %1151 }
 0x38f   :  { %v1180_v42 = vmul.f32 0.0078125, %v1152_v40  ;;  %v1154_v43 = vpop.xlane.xlu1 %1153  ;;  %v1214_v44 = vmul.f32 %v2293_v38, %v2293_v38 }
 0x390   :  { %v1181_v45 = vmul.f32 0.0078125, %v1154_v43  ;;  %1226 = vadd.xlane.f32.xlu1 %v1209_v41  ;;  %v1215_v49 = vmul.f32 %v2295_v39, %v2295_v39 }
 0x391   :  { %v2301_v46 = vsub.f32 %v1097_v1, %v1180_v42  ;;  %1236 = vadd.xlane.f32.xlu0 %v1214_v44 }
 0x392   :  { %v2303_v47 = vsub.f32 %v1100_v2, %v1181_v45  ;;  %v1164_v48 = vpop.xlane.xlu0 %1163 }
 0x393   :  { %v1186_v50 = vmul.f32 0.0078125, %v1164_v48  ;;  %v1166_v51 = vpop.xlane.xlu1 %1165  ;;  %v1212_v52 = vmul.f32 %v2301_v46, %v2301_v46  ;;  %v2354_v48 = vld [vmem:[%s2444_s11] ss:$0 sm:$0xff] }
 0x394   :  { %v1187_v53 = vmul.f32 0.0078125, %v1166_v51  ;;  %1238 = vadd.xlane.f32.xlu1 %v1215_v49  ;;  %v1213_v57 = vmul.f32 %v2303_v47, %v2303_v47 }
 0x395   :  { %v2310_v54 = vsub.f32 %v2255_v4, %v1186_v50  ;;  %1232 = vadd.xlane.f32.xlu0 %v1212_v52 }
 0x396   :  { %v2313_v55 = vsub.f32 %v2257_v7, %v1187_v53  ;;  %v1160_v56 = vpop.xlane.xlu0 %1159 }
 0x397   :  { %v1184_v58 = vmul.f32 0.0078125, %v1160_v56  ;;  %v1162_v59 = vpop.xlane.xlu1 %1161  ;;  %v1218_v60 = vmul.f32 %v2310_v54, %v2310_v54 }
 0x398   :  { %v1185_v61 = vmul.f32 0.0078125, %v1162_v59  ;;  %1234 = vadd.xlane.f32.xlu1 %v1213_v57  ;;  %v1219_v1 = vmul.f32 %v2313_v55, %v2313_v55 }
 0x399   :  { %v2320_v62 = vsub.f32 %v2261_v9, %v1184_v58  ;;  %1244 = vadd.xlane.f32.xlu0 %v1218_v60 }
 0x39a   :  { %v2323_v63 = vsub.f32 %v2263_v10, %v1185_v61  ;;  %v1168_v0 = vpop.xlane.xlu0 %1167  ;;  %v2361_v61 = vld [vmem:[%s2445_s12] ss:$0 sm:$0xff] }
 0x39b   :  { %v1188_v2 = vmul.f32 0.0078125, %v1168_v0  ;;  %v1216_v3 = vmul.f32 %v2320_v62, %v2320_v62 }
 0x39c   :  { %1246 = vadd.xlane.f32.xlu1 %v1219_v1  ;;  %v1170_v4 = vpop.xlane.xlu1 %1169  ;;  %v1217_v8 = vmul.f32 %v2323_v63, %v2323_v63 }
 0x39d   :  { %v2330_v5 = vsub.f32 %v2267_v13, %v1188_v2  ;;  %v1189_v6 = vmul.f32 0.0078125, %v1170_v4  ;;  %1240 = vadd.xlane.f32.xlu0 %v1216_v3 }
 0x39e   :  { %v1172_v7 = vpop.xlane.xlu0 %1171 }
 0x39f   :  { %v2335_v9 = vsub.f32 %v2269_v16, %v1189_v6  ;;  %v1190_v10 = vmul.f32 0.0078125, %v1172_v7  ;;  %v1220_v11 = vmul.f32 %v2330_v5, %v2330_v5 }
 0x3a0   :  { %1242 = vadd.xlane.f32.xlu1 %v1217_v8  ;;  %v1174_v12 = vpop.xlane.xlu1 %1173 }
 0x3a1   :  { %v2340_v14 = vsub.f32 %v2272_v17, %v1190_v10  ;;  %v1191_v13 = vmul.f32 0.0078125, %v1174_v12  ;;  %1248 = vadd.xlane.f32.xlu0 %v1220_v11  ;;  %v1221_v15 = vmul.f32 %v2335_v9, %v2335_v9 }
 0x3a3   :  { %v2345_v19 = vsub.f32 %v2275_v18, %v1191_v13  ;;  %v1222_v16 = vmul.f32 %v2340_v14, %v2340_v14 }
 0x3a4   :  { %1250 = vadd.xlane.f32.xlu1 %v1221_v15 }
 0x3a5   :  { %1252 = vadd.xlane.f32.xlu0 %v1222_v16  ;;  %v1223_v20 = vmul.f32 %v2345_v19, %v2345_v19 }
 0x3a8   :  { %1254 = vadd.xlane.f32.xlu1 %v1223_v20 }
 0x415   :  { %v1229_v21 = vpop.xlane.xlu0 %1228 }
 0x416   :  { %v1258_v17 = vmul.f32 0.0078125, %v1229_v21 }
 0x418   :  { %v1274_v22 = vadd.f32 1e-05, %v1258_v17 }
 0x419   :  { %v1231_v24 = vpop.xlane.xlu1 %1230  ;;  %v1225_v26 = vpop.xlane.xlu0 %1224 }
 0x41a   :  { %1934 = vrsqrt.f32 %v1274_v22  ;;  %v1259_v27 = vmul.f32 0.0078125, %v1231_v24  ;;  %v1256_v28 = vmul.f32 0.0078125, %v1225_v26 }
 0x41c   :  { %v1275_v29 = vadd.f32 1e-05, %v1259_v27  ;;  %v1272_v18 = vadd.f32 1e-05, %v1256_v28 }
 0x41d   :  { %v1227_v32 = vpop.xlane.xlu1 %1226 }
 0x41e   :  { %1936 = vrsqrt.f32 %v1275_v29  ;;  %v1257_v33 = vmul.f32 0.0078125, %v1227_v32  ;;  %v1237_v34 = vpop.xlane.xlu0 %1236 }
 0x41f   :  { %1938 = vrsqrt.f32 %v1272_v18  ;;  %v1262_v35 = vmul.f32 0.0078125, %v1237_v34 }
 0x420   :  { %v1273_v36 = vadd.f32 1e-05, %v1257_v33 }
 0x421   :  { %v1278_v37 = vadd.f32 1e-05, %v1262_v35  ;;  %v1239_v40 = vpop.xlane.xlu1 %1238 }
 0x422   :  { %1940 = vrsqrt.f32 %v1273_v36  ;;  %v1263_v41 = vmul.f32 0.0078125, %v1239_v40  ;;  %v1233_v42 = vpop.xlane.xlu0 %1232 }
 0x423   :  { %1942 = vrsqrt.f32 %v1278_v37  ;;  %v1260_v43 = vmul.f32 0.0078125, %v1233_v42 }
 0x424   :  { %v1935_v44 = vpop.eup %1934  ;;  %v1279_v45 = vadd.f32 1e-05, %v1263_v41 }
 0x425   :  { %v1306_v49 = vmul.f32 %v1935_v44, %v2279_v23  ;;  %v1276_v50 = vadd.f32 1e-05, %v1260_v43  ;;  %v1235_v51 = vpop.xlane.xlu1 %1234 }
 0x426   :  { %1944 = vrsqrt.f32 %v1279_v45  ;;  %v1261_v52 = vmul.f32 0.0078125, %v1235_v51  ;;  %v1245_v53 = vpop.xlane.xlu0 %1244 }
 0x427   :  { %1946 = vrsqrt.f32 %v1276_v50  ;;  %v1266_v56 = vmul.f32 0.0078125, %v1245_v53  ;;  %v1329_v58 = vmul.f32 %v2354_v48, %v1306_v49 }
 0x428   :  { %v1937_v57 = vpop.eup %1936  ;;  %v1277_v59 = vadd.f32 1e-05, %v1261_v52 }
 0x429   :  { %v1939_v60 = vpop.eup %1938  ;;  %v1307_v0 = vmul.f32 %v1937_v57, %v2285_v30  ;;  %v1282_v23 = vadd.f32 1e-05, %v1266_v56  ;;  %v1247_v1 = vpop.xlane.xlu1 %1246  ;;  %v1352_v10 = vadd.f32 %v2361_v61, %v1329_v58 }
 0x42a   :  { %v1304_v2 = vmul.f32 %v1939_v60, %v2281_v25  ;;  %1948 = vrsqrt.f32 %v1277_v59  ;;  %v1267_v3 = vmul.f32 0.0078125, %v1247_v1  ;;  %v1241_v4 = vpop.xlane.xlu0 %1240 }
 0x42b   :  { %v1330_v6 = vmul.f32 %v2354_v48, %v1307_v0  ;;  %1950 = vrsqrt.f32 %v1282_v23  ;;  %v1264_v7 = vmul.f32 0.0078125, %v1241_v4 }
 0x42c   :  { %v1941_v8 = vpop.eup %1940  ;;  %v1283_v11 = vadd.f32 1e-05, %v1267_v3  ;;  %v1327_v30 = vmul.f32 %v2354_v48, %v1304_v2 }
 0x42d   :  { %v1943_v12 = vpop.eup %1942  ;;  %v1353_v13 = vadd.f32 %v2361_v61, %v1330_v6  ;;  %v1305_v15 = vmul.f32 %v1941_v8, %v2287_v31  ;;  %v1280_v16 = vadd.f32 1e-05, %v1264_v7  ;;  %v1243_v25 = vpop.xlane.xlu1 %1242 }
 0x42e   :  { %v1310_v20 = vmul.f32 %v1943_v12, %v2293_v38  ;;  %1952 = vrsqrt.f32 %v1283_v11  ;;  %v1265_v21 = vmul.f32 0.0078125, %v1243_v25  ;;  %v1249_v17 = vpop.xlane.xlu0 %1248  ;;  %v1350_v31 = vadd.f32 %v2361_v61, %v1327_v30 }
 0x42f   :  { %v1559_v22 = vpack.c.bf16 %v1353_v13, %v1352_v10  ;;  %v1328_v24 = vmul.f32 %v2354_v48, %v1305_v15  ;;  %1954 = vrsqrt.f32 %v1280_v16  ;;  %v1268_v26 = vmul.f32 0.0078125, %v1249_v17 }
 0x430   :  { %v1945_v27 = vpop.eup %1944  ;;  %v1333_v28 = vmul.f32 %v2354_v48, %v1310_v20  ;;  %v1281_v29 = vadd.f32 1e-05, %v1265_v21 }
 0x431   :  { %v1947_v18 = vpop.eup %1946  ;;  %1591 = vst [vmem:[%s2446_s13 + $0x8] sm:$0xff] %v1559_v22   ;;  %v1351_v38 = vadd.f32 %v2361_v61, %v1328_v24  ;;  %v1311_v32 = vmul.f32 %v1945_v27, %v2295_v39  ;;  %v1284_v33 = vadd.f32 1e-05, %v1268_v26  ;;  %v1251_v34 = vpop.xlane.xlu1 %1250 }
 0x432   :  { %v1308_v35 = vmul.f32 %v1947_v18, %v2301_v46  ;;  %1956 = vrsqrt.f32 %v1281_v29  ;;  %v1269_v36 = vmul.f32 0.0078125, %v1251_v34  ;;  %v1253_v37 = vpop.xlane.xlu0 %1252  ;;  %v1356_v44 = vadd.f32 %v2361_v61, %v1333_v28 }
 0x433   :  { %v1554_v40 = vpack.c.bf16 %v1351_v38, %v1350_v31  ;;  %v1334_v41 = vmul.f32 %v2354_v48, %v1311_v32  ;;  %1958 = vrsqrt.f32 %v1284_v33  ;;  %v1270_v42 = vmul.f32 0.0078125, %v1253_v37 }
 0x434   :  { %v1949_v43 = vpop.eup %1948  ;;  %v1285_v45 = vadd.f32 1e-05, %v1269_v36  ;;  %v1331_v46 = vmul.f32 %v2354_v48, %v1308_v35 }
 0x435   :  { %v1951_v49 = vpop.eup %1950  ;;  %1555 = vst [vmem:[%s2446_s13] sm:$0xff] %v1554_v40   ;;  %v1357_v39 = vadd.f32 %v2361_v61, %v1334_v41  ;;  %v1309_v50 = vmul.f32 %v1949_v43, %v2303_v47  ;;  %v1286_v51 = vadd.f32 1e-05, %v1270_v42  ;;  %v1255_v52 = vpop.xlane.xlu1 %1254 }
 0x436   :  { %v1314_v53 = vmul.f32 %v1951_v49, %v2310_v54  ;;  %1960 = vrsqrt.f32 %v1285_v45  ;;  %v1271_v56 = vmul.f32 0.0078125, %v1255_v52  ;;  %v1354_v23 = vadd.f32 %v2361_v61, %v1331_v46 }
 0x437   :  { %v1569_v57 = vpack.c.bf16 %v1357_v39, %v1356_v44  ;;  %v1332_v58 = vmul.f32 %v2354_v48, %v1309_v50  ;;  %1962 = vrsqrt.f32 %v1286_v51 }
 0x438   :  { %v1953_v59 = vpop.eup %1952  ;;  %v1287_v60 = vadd.f32 1e-05, %v1271_v56  ;;  %v1337_v1 = vmul.f32 %v2354_v48, %v1314_v53 }
 0x439   :  { %v1955_v0 = vpop.eup %1954  ;;  %1593 = vst [vmem:[%s2446_s13 + $0x18] sm:$0xff] %v1569_v57   ;;  %v1355_v47 = vadd.f32 %v2361_v61, %v1332_v58  ;;  %v1315_v54 = vmul.f32 %v1953_v59, %v2313_v55 }
 0x43a   :  { %v1312_v2 = vmul.f32 %v1955_v0, %v2320_v62  ;;  %1964 = vrsqrt.f32 %v1287_v60  ;;  %v1360_v8 = vadd.f32 %v2361_v61, %v1337_v1 }
 0x43b   :  { %v1564_v3 = vpack.c.bf16 %v1355_v47, %v1354_v23  ;;  %v1338_v4 = vmul.f32 %v2354_v48, %v1315_v54 }
 0x43c   :  { %v1957_v6 = vpop.eup %1956  ;;  %v1335_v11 = vmul.f32 %v2354_v48, %v1312_v2 }
 0x43d   :  { %v1959_v7 = vpop.eup %1958  ;;  %1592 = vst [vmem:[%s2446_s13 + $0x10] sm:$0xff] %v1564_v3   ;;  %v1361_v10 = vadd.f32 %v2361_v61, %v1338_v4  ;;  %v1313_v55 = vmul.f32 %v1957_v6, %v2323_v63 }
 0x43e   :  { %v1316_v62 = vmul.f32 %v1959_v7, %v2330_v5  ;;  %v1358_v16 = vadd.f32 %v2361_v61, %v1335_v11 }
 0x43f   :  { %v1579_v12 = vpack.c.bf16 %v1361_v10, %v1360_v8  ;;  %v1336_v13 = vmul.f32 %v2354_v48, %v1313_v55 }
 0x440   :  { %v1961_v30 = vpop.eup %1960  ;;  %v1339_v20 = vmul.f32 %v2354_v48, %v1316_v62 }
 0x441   :  { %v1963_v15 = vpop.eup %1962  ;;  %1595 = vst [vmem:[%s2446_s13 + $0x28] sm:$0xff] %v1579_v12   ;;  %v1359_v25 = vadd.f32 %v2361_v61, %v1336_v13  ;;  %v1317_v21 = vmul.f32 %v1961_v30, %v2335_v9 }
 0x442   :  { %v1318_v63 = vmul.f32 %v1963_v15, %v2340_v14  ;;  %v1362_v24 = vadd.f32 %v2361_v61, %v1339_v20 }
 0x443   :  { %v1574_v5 = vpack.c.bf16 %v1359_v25, %v1358_v16  ;;  %v1340_v17 = vmul.f32 %v2354_v48, %v1317_v21 }
 0x444   :  { %v1965_v22 = vpop.eup %1964  ;;  %v1341_v27 = vmul.f32 %v2354_v48, %v1318_v63 }
 0x445   :  { %1594 = vst [vmem:[%s2446_s13 + $0x20] sm:$0xff] %v1574_v5   ;;  %v1363_v26 = vadd.f32 %v2361_v61, %v1340_v17  ;;  %v1319_v28 = vmul.f32 %v1965_v22, %v2345_v19 }
 0x446   :  { %v1364_v14 = vadd.f32 %v2361_v61, %v1341_v27 }
 0x447   :  { %v1584_v29 = vpack.c.bf16 %v1363_v26, %v1362_v24  ;;  %v1342_v9 = vmul.f32 %v2354_v48, %v1319_v28 }
 0x449   :  { %1596 = vst [vmem:[%s2446_s13 + $0x30] sm:$0xff] %v1584_v29   ;;  %v1365_v18 = vadd.f32 %v2361_v61, %v1342_v9 }
 0x44b   :  { %v1589_v31 = vpack.c.bf16 %v1365_v18, %v1364_v14 }
 0x44d   :  { %1597 = vst [vmem:[%s2446_s13 + $0x38] sm:$0xff] %v1589_v31  }

// kernel: _lambda_.17
= control target key start
LH: loop header
LB: loop body
LE: loop exit
PB: predicated region body
PF: predicated region fallthrough
CT: control target
= control target key end

     0   :  { %vm193_vm0 = vcmask 130048   ;;  %vm469_vm1 = vcmask 23552   ;;  %s859_s1 = inlined_call_operand.vmem [shape: f32[128,16], index: 1, kind: input, shape index: {}]   ;;  %s860_s7 = inlined_call_operand.vmem [shape: f32[1,3], index: 7, kind: input, shape index: {}]   ;;  %s861_s8 = inlined_call_operand.vmem [shape: f32[1,3], index: 8, kind: input, shape index: {}]   ;;  %s862_s0 = inlined_call_operand.vmem [shape: bf16[64,128], index: 0, kind: input, shape index: {}]   ;;  %s863_s3 = inlined_call_operand.vmem [shape: f32[16,16], index: 3, kind: input, shape index: {}]   ;;  %s864_s5 = inlined_call_operand.vmem [shape: f32[16,3], index: 5, kind: input, shape index: {}]   ;;  %s865_s2 = inlined_call_operand.vmem [shape: f32[1,16], index: 2, kind: input, shape index: {}]   ;;  %s866_s4 = inlined_call_operand.vmem [shape: f32[1,16], index: 4, kind: input, shape index: {}]   ;;  %s867_s6 = inlined_call_operand.vmem [shape: f32[1,3], index: 6, kind: input, shape index: {}]   ;;  %s868_s9 = inlined_call_operand.vmem [shape: f32[64,3], index: 9, kind: output, shape index: {}]  }
   0x1   :  { %v48_v0 = vld [vmem:[%s859_s1] sm:$0xff]  ;;  %v49_v1 = vld [vmem:[%s859_s1 + $0x8] sm:$0xff]  ;;  %v50_v2 = vld [vmem:[%s859_s1 + $0x10] sm:$0xff] }
   0x2   :  { %v640_v3 = vpack.c.bf16 %v49_v1, %v48_v0  ;;  %v51_v4 = vld [vmem:[%s859_s1 + $0x18] sm:$0xff]  ;;  %v52_v6 = vld [vmem:[%s859_s1 + $0x20] sm:$0xff]  ;;  %v53_v7 = vld [vmem:[%s859_s1 + $0x28] sm:$0xff] }
   0x3   :  { %v644_v5 = vpack.c.bf16 %v51_v4, %v50_v2  ;;  %v648_v8 = vpack.c.bf16 %v53_v7, %v52_v6  ;;  %v502_v9 = vld [vmem:[%s862_s0] sm:$0xff]   ;;  %v54_v10 = vld [vmem:[%s859_s1 + $0x30] sm:$0xff]  ;;  %v55_v11 = vld [vmem:[%s859_s1 + $0x38] sm:$0xff] }
   0x4   :  { %641 = vmatprep.subr.bf16.mxu0 %v640_v3  ;;  %v503_v12 = vunpack.c.l.bf16 %v502_v9  ;;  %v652_v13 = vpack.c.bf16 %v55_v11, %v54_v10  ;;  %v56_v14 = vld [vmem:[%s859_s1 + $0x40] sm:$0xff]  ;;  %v57_v15 = vld [vmem:[%s859_s1 + $0x48] sm:$0xff]  ;;  %v58_v17 = vld [vmem:[%s859_s1 + $0x50] sm:$0xff]  ;;  %v504_v27 = vunpack.c.h.bf16 %v502_v9 }
   0x5   :  { %643 = vmatpush3.bf16.msra.mxu0 %v640_v3  ;;  %v656_v16 = vpack.c.bf16 %v57_v15, %v56_v14  ;;  %v59_v18 = vld [vmem:[%s859_s1 + $0x58] sm:$0xff]  ;;  %v60_v20 = vld [vmem:[%s859_s1 + $0x60] sm:$0xff]  ;;  %v61_v21 = vld [vmem:[%s859_s1 + $0x68] sm:$0xff] }
   0x6   :  { %645 = vmatprep.subr.bf16.mxu0 %v644_v5  ;;  %596 = vmatprep.mubr.f32.mxu0 %v503_v12  ;;  %v660_v19 = vpack.c.bf16 %v59_v18, %v58_v17  ;;  %v664_v22 = vpack.c.bf16 %v61_v21, %v60_v20  ;;  %v62_v23 = vld [vmem:[%s859_s1 + $0x70] sm:$0xff]  ;;  %v63_v24 = vld [vmem:[%s859_s1 + $0x78] sm:$0xff]  ;;  %v517_v26 = vld [vmem:[%s862_s0 + $0x8] sm:$0xff]  }
   0x7   :  { %v668_v25 = vpack.c.bf16 %v63_v24, %v62_v23  ;;  %v507_v28 = vunpack.c.l.bf16 %v517_v26  ;;  %v518_v29 = vld [vmem:[%s862_s0 + $0x10] sm:$0xff]   ;;  %v508_v30 = vunpack.c.h.bf16 %v517_v26  ;;  %v519_v32 = vld [vmem:[%s862_s0 + $0x18] sm:$0xff]   ;;  %v184_v36 = vld [vmem:[%s863_s3] sm:$0xff] }
   0x8   :  { %v511_v31 = vunpack.c.l.bf16 %v518_v29  ;;  %v512_v33 = vunpack.c.h.bf16 %v518_v29  ;;  %v515_v34 = vunpack.c.l.bf16 %v519_v32  ;;  %v516_v35 = vunpack.c.h.bf16 %v519_v32  ;;  %v185_v37 = vld [vmem:[%s863_s3 + $0x8] sm:$0xff]  ;;  %v331_v39 = vld [vmem:[%s864_s5] sm:$0xff] }
   0x9   :  { %647 = vmatpush3.bf16.msra.mxu0 %v644_v5  ;;  %v672_v38 = vpack.c.bf16 %v185_v37, %v184_v36  ;;  %v332_v40 = vld [vmem:[%s864_s5 + $0x8] sm:$0xff]  ;;  %v482_v42 = vld [vmem:[%s865_s2] ss:$0 sm:$0xff] }
   0xa   :  { %649 = vmatprep.subr.bf16.mxu0 %v648_v8  ;;  %v676_v41 = vpack.c.bf16 %v332_v40, %v331_v39  ;;  %v483_v3 = vld [vmem:[%s866_s4] ss:$0 sm:$0xff] }
   0xb   :  { %673 = vmatprep.subr.bf16.mxu1 %v672_v38 }
   0xc   :  { %675 = vmatpush3.bf16.msra.mxu1 %v672_v38 }
   0xd   :  { %651 = vmatpush3.bf16.msra.mxu0 %v648_v8  ;;  %677 = vmatprep.subr.bf16.mxu1 %v676_v41 }
   0xe   :  { %653 = vmatprep.subr.bf16.mxu0 %v652_v13 }
  0x11   :  { %655 = vmatpush3.bf16.msra.mxu0 %v652_v13 }
  0x12   :  { %657 = vmatprep.subr.bf16.mxu0 %v656_v16 }
  0x15   :  { %659 = vmatpush3.bf16.msra.mxu0 %v656_v16 }
  0x16   :  { %661 = vmatprep.subr.bf16.mxu0 %v660_v19 }
  0x19   :  { %663 = vmatpush3.bf16.msra.mxu0 %v660_v19 }
  0x1a   :  { %665 = vmatprep.subr.bf16.mxu0 %v664_v22 }
  0x1d   :  { %667 = vmatpush3.bf16.msra.mxu0 %v664_v22 }
  0x1e   :  { %669 = vmatprep.subr.bf16.mxu0 %v668_v25 }
  0x21   :  { %671 = vmatpush3.bf16.msra.mxu0 %v668_v25 }
  0x24   :  { %597 = vmatmul.mubr.f32.vlgmr.msra.gmra.mrb[0].mxu0 %v504_v27 }
  0x25   :  { %599 = vmatprep.mubr.f32.mxu0 %v507_v28  ;;  %v492_v28 = vld [vmem:[%s867_s6] ss:$0 sm:$0xff] }
  0x28   :  { %600 = vmatmul.mubr.f32.gmra.mrb[2].mxu0 %v508_v30 }
  0x29   :  { %602 = vmatprep.mubr.f32.mxu0 %v511_v31 }
  0x2c   :  { %603 = vmatmul.mubr.f32.gmra.mrb[4].mxu0 %v512_v33 }
  0x2d   :  { %605 = vmatprep.mubr.f32.mxu0 %v515_v34 }
  0x30   :  { %606 = vmatmul.mubr.f32.gmra.mrb[6].mxu0 %v516_v35 }
  0xf7   :  { %v598_v43 = vpop.f32.mrb[0].mxu0 }
  0xf8   :  { %v143_v44 = vadd.f32 %v598_v43, %v482_v42  ;;  %v137_v45 = vpop.f32.mrb[1].mxu0 }
  0xf9   :  { %v138_v46 = vadd.f32 %v482_v42, %v137_v45 }
  0xfa   :  { %v177_v49 = vmax.f32 %v143_v44, 0.0 }
  0xfb   :  { %v176_v47 = vmax.f32 %v138_v46, 0.0  ;;  %v601_v48 = vpop.f32.mrb[2].mxu0 }
  0xfc   :  { %v153_v50 = vadd.f32 %v601_v48, %v482_v42  ;;  %v147_v51 = vpop.f32.mrb[3].mxu0 }
  0xfd   :  { %v148_v52 = vadd.f32 %v482_v42, %v147_v51  ;;  %612 = vmatprep.mubr.msk.f32.mxu1 %vm193_vm0, %v176_v47 }
  0xfe   :  { %613 = vmatmul.mubr.msk.f32.vlgmr.msra.gmra.mrb[0].mxu1 %vm193_vm0, %v177_v49  ;;  %v179_v55 = vmax.f32 %v153_v50, 0.0 }
  0xff   :  { %v178_v53 = vmax.f32 %v148_v52, 0.0  ;;  %v604_v54 = vpop.f32.mrb[4].mxu0  ;;  %679 = vmatpush3.bf16.msra.mxu1 %v676_v41 }
 0x100   :  { %v163_v56 = vadd.f32 %v604_v54, %v482_v42  ;;  %v157_v57 = vpop.f32.mrb[5].mxu0 }
 0x101   :  { %v158_v58 = vadd.f32 %v482_v42, %v157_v57  ;;  %615 = vmatprep.mubr.msk.f32.mxu1 %vm193_vm0, %v178_v53 }
 0x102   :  { %616 = vmatmul.mubr.msk.f32.gmra.mrb[2].mxu1 %vm193_vm0, %v179_v55  ;;  %v181_v61 = vmax.f32 %v163_v56, 0.0 }
 0x103   :  { %v180_v59 = vmax.f32 %v158_v58, 0.0  ;;  %v607_v60 = vpop.f32.mrb[6].mxu0 }
 0x104   :  { %v173_v62 = vadd.f32 %v607_v60, %v482_v42  ;;  %v167_v63 = vpop.f32.mrb[7].mxu0 }
 0x105   :  { %v168_v0 = vadd.f32 %v482_v42, %v167_v63  ;;  %618 = vmatprep.mubr.msk.f32.mxu1 %vm193_vm0, %v180_v59 }
 0x106   :  { %619 = vmatmul.mubr.msk.f32.gmra.mrb[4].mxu1 %vm193_vm0, %v181_v61  ;;  %v183_v2 = vmax.f32 %v173_v62, 0.0 }
 0x107   :  { %v182_v1 = vmax.f32 %v168_v0, 0.0 }
 0x109   :  { %621 = vmatprep.mubr.msk.f32.mxu1 %vm193_vm0, %v182_v1 }
 0x10a   :  { %622 = vmatmul.mubr.msk.f32.gmra.mrb[6].mxu1 %vm193_vm0, %v183_v2 }
 0x1d1   :  { %v614_v4 = vpop.f32.mrb[0].mxu1 }
 0x1d2   :  { %v290_v5 = vadd.f32 %v614_v4, %v483_v3  ;;  %v284_v6 = vpop.f32.mrb[1].mxu1 }
 0x1d3   :  { %v285_v7 = vadd.f32 %v483_v3, %v284_v6 }
 0x1d4   :  { %v324_v10 = vmax.f32 %v290_v5, 0.0 }
 0x1d5   :  { %v323_v8 = vmax.f32 %v285_v7, 0.0  ;;  %v617_v9 = vpop.f32.mrb[2].mxu1 }
 0x1d6   :  { %v300_v11 = vadd.f32 %v617_v9, %v483_v3  ;;  %v294_v12 = vpop.f32.mrb[3].mxu1 }
 0x1d7   :  { %v295_v13 = vadd.f32 %v483_v3, %v294_v12  ;;  %628 = vmatprep.mubr.msk.f32.mxu1 %vm193_vm0, %v323_v8 }
 0x1d8   :  { %629 = vmatmul.mubr.msk.f32.vlgmr.msra.gmra.mrb[8].mxu1 %vm193_vm0, %v324_v10  ;;  %v326_v16 = vmax.f32 %v300_v11, 0.0 }
 0x1d9   :  { %v325_v14 = vmax.f32 %v295_v13, 0.0  ;;  %v620_v15 = vpop.f32.mrb[4].mxu1 }
 0x1da   :  { %v310_v17 = vadd.f32 %v620_v15, %v483_v3  ;;  %v304_v18 = vpop.f32.mrb[5].mxu1 }
 0x1db   :  { %v305_v19 = vadd.f32 %v483_v3, %v304_v18  ;;  %631 = vmatprep.mubr.msk.f32.mxu1 %vm193_vm0, %v325_v14 }
 0x1dc   :  { %632 = vmatmul.mubr.msk.f32.gmra.mrb[10].mxu1 %vm193_vm0, %v326_v16  ;;  %v328_v22 = vmax.f32 %v310_v17, 0.0 }
 0x1dd   :  { %v327_v20 = vmax.f32 %v305_v19, 0.0  ;;  %v623_v21 = vpop.f32.mrb[6].mxu1 }
 0x1de   :  { %v320_v23 = vadd.f32 %v623_v21, %v483_v3  ;;  %v314_v24 = vpop.f32.mrb[7].mxu1 }
 0x1df   :  { %v315_v25 = vadd.f32 %v483_v3, %v314_v24  ;;  %634 = vmatprep.mubr.msk.f32.mxu1 %vm193_vm0, %v327_v20 }
 0x1e0   :  { %635 = vmatmul.mubr.msk.f32.gmra.mrb[12].mxu1 %vm193_vm0, %v328_v22  ;;  %v330_v27 = vmax.f32 %v320_v23, 0.0 }
 0x1e1   :  { %v329_v26 = vmax.f32 %v315_v25, 0.0 }
 0x1e3   :  { %637 = vmatprep.mubr.msk.f32.mxu1 %vm193_vm0, %v329_v26 }
 0x1e4   :  { %638 = vmatmul.mubr.msk.f32.gmra.mrb[14].mxu1 %vm193_vm0, %v330_v27 }
 0x2ab   :  { %v630_v29 = vpop.f32.mrb[8].mxu1 }
 0x2ac   :  { %v436_v30 = vadd.f32 %v630_v29, %v492_v28  ;;  %v430_v31 = vpop.f32.mrb[9].mxu1 }
 0x2ad   :  { %v431_v32 = vadd.f32 %v492_v28, %v430_v31 }
 0x2ae   :  { %471 = vst.msk [vmem:[%s868_s9 + $0x8] sm:$0xff] %vm469_vm1, %v436_v30 }
 0x2af   :  { %470 = vst.msk [vmem:[%s868_s9] sm:$0xff] %vm469_vm1, %v431_v32  ;;  %v633_v33 = vpop.f32.mrb[10].mxu1 }
 0x2b0   :  { %v446_v34 = vadd.f32 %v633_v33, %v492_v28  ;;  %v440_v35 = vpop.f32.mrb[11].mxu1 }
 0x2b1   :  { %v441_v36 = vadd.f32 %v492_v28, %v440_v35 }
 0x2b2   :  { %473 = vst.msk [vmem:[%s868_s9 + $0x18] sm:$0xff] %vm469_vm1, %v446_v34 }
 0x2b3   :  { %472 = vst.msk [vmem:[%s868_s9 + $0x10] sm:$0xff] %vm469_vm1, %v441_v36  ;;  %v636_v37 = vpop.f32.mrb[12].mxu1 }
 0x2b4   :  { %v456_v38 = vadd.f32 %v636_v37, %v492_v28  ;;  %v450_v39 = vpop.f32.mrb[13].mxu1 }
 0x2b5   :  { %v451_v40 = vadd.f32 %v492_v28, %v450_v39 }
 0x2b6   :  { %475 = vst.msk [vmem:[%s868_s9 + $0x28] sm:$0xff] %vm469_vm1, %v456_v38 }
 0x2b7   :  { %474 = vst.msk [vmem:[%s868_s9 + $0x20] sm:$0xff] %vm469_vm1, %v451_v40  ;;  %v639_v41 = vpop.f32.mrb[14].mxu1 }
 0x2b8   :  { %v466_v42 = vadd.f32 %v639_v41, %v492_v28  ;;  %v460_v43 = vpop.f32.mrb[15].mxu1 }
 0x2b9   :  { %v461_v44 = vadd.f32 %v492_v28, %v460_v43 }
 0x2ba   :  { %477 = vst.msk [vmem:[%s868_s9 + $0x38] sm:$0xff] %vm469_vm1, %v466_v42 }
 0x2bb   :  { %476 = vst.msk [vmem:[%s868_s9 + $0x30] sm:$0xff] %vm469_vm1, %v461_v44 }

// kernel: _lambda_.13
= control target key start
LH: loop header
LB: loop body
LE: loop exit
PB: predicated region body
PF: predicated region fallthrough
CT: control target
= control target key end

     0   :  { %s1382_s3 = inlined_call_operand.vmem [shape: bf16[128,128], index: 3, kind: input, shape index: {}]   ;;  %s1383_s1 = inlined_call_operand.vmem [shape: bf16[64,128], index: 1, kind: input, shape index: {}]   ;;  %s1384_s2 = inlined_call_operand.vmem [shape: bf16[128,128], index: 2, kind: input, shape index: {}]   ;;  %s1385_s0 = inlined_call_operand.vmem [shape: bf16[64,128], index: 0, kind: input, shape index: {}]   ;;  %s1386_s5 = inlined_call_operand.vmem [shape: bf16[128,128], index: 5, kind: input, shape index: {}]   ;;  %s1387_s7 = inlined_call_operand.vmem [shape: bf16[128,128], index: 7, kind: input, shape index: {}]   ;;  %s1388_s4 = inlined_call_operand.vmem [shape: f32[1,128], index: 4, kind: input, shape index: {}]   ;;  %s1389_s6 = inlined_call_operand.vmem [shape: f32[1,128], index: 6, kind: input, shape index: {}]   ;;  %s1390_s8 = inlined_call_operand.vmem [shape: f32[1,128], index: 8, kind: input, shape index: {}]   ;;  %s1391_s9 = inlined_call_operand.vmem [shape: f32[1,128], index: 9, kind: input, shape index: {}]   ;;  %s1392_s10 = inlined_call_operand.vmem [shape: f32[1,128], index: 10, kind: input, shape index: {}]   ;;  %s1393_s11 = inlined_call_operand.vmem [shape: bf16[64,128], index: 11, kind: output, shape index: {}]  }
   0x1   :  { %v1079_v0 = vld [vmem:[%s1382_s3] sm:$0xff]   ;;  %v1080_v1 = vld [vmem:[%s1382_s3 + $0x8] sm:$0xff]   ;;  %v1081_v2 = vld [vmem:[%s1382_s3 + $0x10] sm:$0xff]  }
   0x2   :  { %975 = vmatprep.subr.bf16.mxu0 %v1079_v0  ;;  %v1082_v3 = vld [vmem:[%s1382_s3 + $0x18] sm:$0xff]   ;;  %v1087_v4 = vld [vmem:[%s1383_s1] sm:$0xff]   ;;  %v1084_v6 = vld [vmem:[%s1382_s3 + $0x28] sm:$0xff]  }
   0x3   :  { %976 = vmatpush3.bf16.msra.mxu0 %v1079_v0  ;;  %991 = vmatprep.mubr.bf16.mxu0 %v1087_v4  ;;  %v1083_v5 = vld [vmem:[%s1382_s3 + $0x20] sm:$0xff]   ;;  %v1085_v7 = vld [vmem:[%s1382_s3 + $0x30] sm:$0xff]   ;;  %v1086_v8 = vld [vmem:[%s1382_s3 + $0x38] sm:$0xff]  }
   0x4   :  { %977 = vmatprep.subr.bf16.mxu0 %v1080_v1  ;;  %v1103_v9 = vld [vmem:[%s1386_s5] sm:$0xff]   ;;  %v1104_v10 = vld [vmem:[%s1386_s5 + $0x8] sm:$0xff]   ;;  %v1105_v12 = vld [vmem:[%s1386_s5 + $0x10] sm:$0xff]  }
   0x5   :  { %1023 = vmatprep.subr.bf16.mxu1 %v1103_v9  ;;  %v1088_v11 = vld [vmem:[%s1384_s2] sm:$0xff]   ;;  %v1089_v13 = vld [vmem:[%s1383_s1 + $0x8] sm:$0xff]   ;;  %v1095_v14 = vld [vmem:[%s1383_s1 + $0x10] sm:$0xff]  }
   0x6   :  { %1024 = vmatpush3.bf16.msra.mxu1 %v1103_v9  ;;  %v1090_v15 = vld [vmem:[%s1384_s2 + $0x8] sm:$0xff]   ;;  %v1106_v16 = vld [vmem:[%s1386_s5 + $0x18] sm:$0xff]   ;;  %v1091_v17 = vld [vmem:[%s1384_s2 + $0x10] sm:$0xff]  }
   0x7   :  { %978 = vmatpush3.bf16.msra.mxu0 %v1080_v1  ;;  %1025 = vmatprep.subr.bf16.mxu1 %v1104_v10  ;;  %v1107_v18 = vld [vmem:[%s1386_s5 + $0x20] sm:$0xff]   ;;  %v1096_v19 = vld [vmem:[%s1383_s1 + $0x18] sm:$0xff]   ;;  %v1108_v22 = vld [vmem:[%s1386_s5 + $0x28] sm:$0xff]  }
   0x8   :  { %979 = vmatprep.subr.bf16.mxu0 %v1081_v2  ;;  %v1099_v20 = vld [vmem:[%s1385_s0] sm:$0xff]   ;;  %v1092_v21 = vld [vmem:[%s1384_s2 + $0x18] sm:$0xff]   ;;  %v1094_v24 = vld [vmem:[%s1384_s2 + $0x28] sm:$0xff]  }
   0x9   :  { %v1093_v23 = vld [vmem:[%s1384_s2 + $0x20] sm:$0xff]   ;;  %v1097_v25 = vld [vmem:[%s1384_s2 + $0x30] sm:$0xff]   ;;  %v1098_v26 = vld [vmem:[%s1384_s2 + $0x38] sm:$0xff]  }
   0xa   :  { %1026 = vmatpush3.bf16.msra.mxu1 %v1104_v10  ;;  %v1100_v27 = vld [vmem:[%s1385_s0 + $0x8] sm:$0xff]   ;;  %v1101_v28 = vld [vmem:[%s1385_s0 + $0x10] sm:$0xff]   ;;  %v1102_v29 = vld [vmem:[%s1385_s0 + $0x18] sm:$0xff]  }
   0xb   :  { %980 = vmatpush3.bf16.msra.mxu0 %v1081_v2  ;;  %1027 = vmatprep.subr.bf16.mxu1 %v1105_v12  ;;  %v1109_v30 = vld [vmem:[%s1386_s5 + $0x30] sm:$0xff]   ;;  %v1110_v31 = vld [vmem:[%s1386_s5 + $0x38] sm:$0xff]   ;;  %v1111_v32 = vld [vmem:[%s1387_s7] sm:$0xff]  }
   0xc   :  { %981 = vmatprep.subr.bf16.mxu0 %v1082_v3  ;;  %v867_v33 = vld [vmem:[%s1388_s4] ss:$0 sm:$0xff]  ;;  %v1112_v51 = vld [vmem:[%s1387_s7 + $0x8] sm:$0xff]   ;;  %v1113_v59 = vld [vmem:[%s1387_s7 + $0x10] sm:$0xff]  }
   0xd   :  { %v1114_v0 = vld [vmem:[%s1387_s7 + $0x18] sm:$0xff]   ;;  %v1115_v1 = vld [vmem:[%s1387_s7 + $0x20] sm:$0xff]   ;;  %v1116_v2 = vld [vmem:[%s1387_s7 + $0x28] sm:$0xff]  }
   0xe   :  { %1028 = vmatpush3.bf16.msra.mxu1 %v1105_v12  ;;  %v1118_v4 = vld [vmem:[%s1387_s7 + $0x38] sm:$0xff]  }
   0xf   :  { %982 = vmatpush3.bf16.msra.mxu0 %v1082_v3  ;;  %1029 = vmatprep.subr.bf16.mxu1 %v1106_v16  ;;  %v1117_v3 = vld [vmem:[%s1387_s7 + $0x30] sm:$0xff]  }
  0x10   :  { %983 = vmatprep.subr.bf16.mxu0 %v1083_v5 }
  0x12   :  { %1030 = vmatpush3.bf16.msra.mxu1 %v1106_v16 }
  0x13   :  { %984 = vmatpush3.bf16.msra.mxu0 %v1083_v5  ;;  %1031 = vmatprep.subr.bf16.mxu1 %v1107_v18  ;;  %v868_v5 = vld [vmem:[%s1389_s6] ss:$0 sm:$0xff] }
  0x14   :  { %985 = vmatprep.subr.bf16.mxu0 %v1084_v6 }
  0x16   :  { %1032 = vmatpush3.bf16.msra.mxu1 %v1107_v18 }
  0x17   :  { %986 = vmatpush3.bf16.msra.mxu0 %v1084_v6  ;;  %1033 = vmatprep.subr.bf16.mxu1 %v1108_v22 }
  0x18   :  { %987 = vmatprep.subr.bf16.mxu0 %v1085_v7 }
  0x1a   :  { %1034 = vmatpush3.bf16.msra.mxu1 %v1108_v22 }
  0x1b   :  { %988 = vmatpush3.bf16.msra.mxu0 %v1085_v7  ;;  %1035 = vmatprep.subr.bf16.mxu1 %v1109_v30 }
  0x1c   :  { %989 = vmatprep.subr.bf16.mxu0 %v1086_v8 }
  0x1e   :  { %1036 = vmatpush3.bf16.msra.mxu1 %v1109_v30 }
  0x1f   :  { %990 = vmatpush3.bf16.msra.mxu0 %v1086_v8  ;;  %1037 = vmatprep.subr.bf16.mxu1 %v1110_v31 }
  0x20   :  { %999 = vmatprep.subr.bf16.mxu0 %v1088_v11 }
  0x22   :  { %992 = vmatmul.mubr.bf16.vlgmr.msra.gmra.mrb[0].mxu0 %v1089_v13  ;;  %1038 = vmatpush3.bf16.msra.mxu1 %v1110_v31 }
  0x23   :  { %1000 = vmatpush3.bf16.msra.mxu0 %v1088_v11  ;;  %995 = vmatprep.mubr.bf16.mxu0 %v1095_v14 }
  0x24   :  { %1001 = vmatprep.subr.bf16.mxu0 %v1090_v15  ;;  %1047 = vmatprep.subr.bf16.mxu1 %v1111_v32 }
  0x27   :  { %1002 = vmatpush3.bf16.msra.mxu0 %v1090_v15 }
  0x28   :  { %1003 = vmatprep.subr.bf16.mxu0 %v1091_v17 }
  0x2a   :  { %996 = vmatmul.mubr.bf16.gmra.mrb[4].mxu0 %v1096_v19 }
  0x2b   :  { %1004 = vmatpush3.bf16.msra.mxu0 %v1091_v17  ;;  %1015 = vmatprep.mubr.bf16.mxu0 %v1099_v20 }
  0x2c   :  { %1005 = vmatprep.subr.bf16.mxu0 %v1092_v21 }
  0x2f   :  { %1006 = vmatpush3.bf16.msra.mxu0 %v1092_v21 }
  0x30   :  { %1007 = vmatprep.subr.bf16.mxu0 %v1093_v23 }
  0x33   :  { %1008 = vmatpush3.bf16.msra.mxu0 %v1093_v23 }
  0x34   :  { %1009 = vmatprep.subr.bf16.mxu0 %v1094_v24 }
  0x37   :  { %1010 = vmatpush3.bf16.msra.mxu0 %v1094_v24 }
  0x38   :  { %1011 = vmatprep.subr.bf16.mxu0 %v1097_v25 }
  0x3b   :  { %1012 = vmatpush3.bf16.msra.mxu0 %v1097_v25 }
  0x3c   :  { %1013 = vmatprep.subr.bf16.mxu0 %v1098_v26 }
  0x3f   :  { %1014 = vmatpush3.bf16.msra.mxu0 %v1098_v26 }
  0x42   :  { %1016 = vmatmul.mubr.bf16.vlgmr.msra.gmra.mrb[0].mxu0 %v1100_v27 }
  0x43   :  { %1019 = vmatprep.mubr.bf16.mxu0 %v1101_v28 }
  0x4a   :  { %1020 = vmatmul.mubr.bf16.gmra.mrb[4].mxu0 %v1102_v29 }
 0x115   :  { %v1017_v34 = vpop.f32.mrb[0].mxu0 }
 0x116   :  { %v370_v35 = vadd.f32 %v1017_v34, %v867_v33  ;;  %v330_v36 = vpop.f32.mrb[1].mxu0  ;;  %v877_v34 = vld [vmem:[%s1390_s8] ss:$0 sm:$0xff] }
 0x117   :  { %v368_v37 = vadd.f32 %v867_v33, %v330_v36  ;;  %v1018_v38 = vpop.f32.mrb[2].mxu0 }
 0x118   :  { %v371_v39 = vadd.f32 %v1018_v38, %v867_v33  ;;  %v333_v40 = vpop.f32.mrb[3].mxu0  ;;  %v378_v42 = vmax.f32 %v370_v35, 0.0 }
 0x119   :  { %v369_v41 = vadd.f32 %v867_v33, %v333_v40  ;;  %v376_v44 = vmax.f32 %v368_v37, 0.0 }
 0x11a   :  { %v379_v43 = vmax.f32 %v371_v39, 0.0 }
 0x11b   :  { %v377_v45 = vmax.f32 %v369_v41, 0.0 }
 0x11c   :  { %v385_v46 = vpack.c.bf16 %v379_v43, %v378_v42 }
 0x11d   :  { %v1021_v47 = vpop.f32.mrb[4].mxu0  ;;  %v384_v48 = vpack.c.bf16 %v377_v45, %v376_v44 }
 0x11e   :  { %v374_v49 = vadd.f32 %v1021_v47, %v867_v33  ;;  %v346_v50 = vpop.f32.mrb[5].mxu0 }
 0x11f   :  { %v372_v52 = vadd.f32 %v867_v33, %v346_v50  ;;  %v1022_v53 = vpop.f32.mrb[6].mxu0  ;;  %1039 = vmatprep.mubr.bf16.mxu1 %v384_v48 }
 0x120   :  { %v375_v54 = vadd.f32 %v1022_v53, %v867_v33  ;;  %v349_v55 = vpop.f32.mrb[7].mxu0  ;;  %1040 = vmatmul.mubr.bf16.vlgmr.msra.gmra.mrb[0].mxu1 %v385_v46  ;;  %v382_v57 = vmax.f32 %v374_v49, 0.0 }
 0x121   :  { %v373_v56 = vadd.f32 %v867_v33, %v349_v55  ;;  %1048 = vmatpush3.bf16.msra.mxu1 %v1111_v32  ;;  %v380_v60 = vmax.f32 %v372_v52, 0.0 }
 0x122   :  { %v383_v58 = vmax.f32 %v375_v54, 0.0  ;;  %1049 = vmatprep.subr.bf16.mxu1 %v1112_v51 }
 0x123   :  { %v381_v61 = vmax.f32 %v373_v56, 0.0 }
 0x124   :  { %v387_v62 = vpack.c.bf16 %v383_v58, %v382_v57 }
 0x125   :  { %v386_v63 = vpack.c.bf16 %v381_v61, %v380_v60  ;;  %1050 = vmatpush3.bf16.msra.mxu1 %v1112_v51 }
 0x126   :  { %1051 = vmatprep.subr.bf16.mxu1 %v1113_v59 }
 0x127   :  { %1043 = vmatprep.mubr.bf16.mxu1 %v386_v63 }
 0x128   :  { %1044 = vmatmul.mubr.bf16.gmra.mrb[4].mxu1 %v387_v62 }
 0x129   :  { %1052 = vmatpush3.bf16.msra.mxu1 %v1113_v59 }
 0x12a   :  { %1053 = vmatprep.subr.bf16.mxu1 %v1114_v0 }
 0x12d   :  { %1054 = vmatpush3.bf16.msra.mxu1 %v1114_v0 }
 0x12e   :  { %1055 = vmatprep.subr.bf16.mxu1 %v1115_v1 }
 0x131   :  { %1056 = vmatpush3.bf16.msra.mxu1 %v1115_v1 }
 0x132   :  { %1057 = vmatprep.subr.bf16.mxu1 %v1116_v2 }
 0x135   :  { %1058 = vmatpush3.bf16.msra.mxu1 %v1116_v2 }
 0x136   :  { %1059 = vmatprep.subr.bf16.mxu1 %v1117_v3 }
 0x139   :  { %1060 = vmatpush3.bf16.msra.mxu1 %v1117_v3 }
 0x13a   :  { %1061 = vmatprep.subr.bf16.mxu1 %v1118_v4 }
 0x13d   :  { %1062 = vmatpush3.bf16.msra.mxu1 %v1118_v4 }
 0x1f3   :  { %v1041_v6 = vpop.f32.mrb[0].mxu1 }
 0x1f4   :  { %v502_v7 = vadd.f32 %v1041_v6, %v868_v5  ;;  %v493_v8 = vpop.f32.mrb[1].mxu1 }
 0x1f5   :  { %v494_v9 = vadd.f32 %v868_v5, %v493_v8  ;;  %v1042_v10 = vpop.f32.mrb[2].mxu1 }
 0x1f6   :  { %v505_v11 = vadd.f32 %v1042_v10, %v868_v5  ;;  %v496_v12 = vpop.f32.mrb[3].mxu1  ;;  %v526_v14 = vmax.f32 %v502_v7, 0.0 }
 0x1f7   :  { %v497_v13 = vadd.f32 %v868_v5, %v496_v12  ;;  %v524_v16 = vmax.f32 %v494_v9, 0.0 }
 0x1f8   :  { %v527_v15 = vmax.f32 %v505_v11, 0.0 }
 0x1f9   :  { %v525_v17 = vmax.f32 %v497_v13, 0.0 }
 0x1fa   :  { %v533_v18 = vpack.c.bf16 %v527_v15, %v526_v14 }
 0x1fb   :  { %v532_v19 = vpack.c.bf16 %v525_v17, %v524_v16  ;;  %v1045_v20 = vpop.f32.mrb[4].mxu1 }
 0x1fc   :  { %v518_v21 = vadd.f32 %v1045_v20, %v868_v5  ;;  %v509_v22 = vpop.f32.mrb[5].mxu1 }
 0x1fd   :  { %v510_v23 = vadd.f32 %v868_v5, %v509_v22  ;;  %v1046_v24 = vpop.f32.mrb[6].mxu1  ;;  %1063 = vmatprep.mubr.bf16.mxu1 %v532_v19 }
 0x1fe   :  { %v521_v25 = vadd.f32 %v1046_v24, %v868_v5  ;;  %v512_v26 = vpop.f32.mrb[7].mxu1  ;;  %1064 = vmatmul.mubr.bf16.vlgmr.msra.gmra.mrb[8].mxu1 %v533_v18  ;;  %v530_v28 = vmax.f32 %v518_v21, 0.0 }
 0x1ff   :  { %v513_v27 = vadd.f32 %v868_v5, %v512_v26  ;;  %v528_v30 = vmax.f32 %v510_v23, 0.0 }
 0x200   :  { %v531_v29 = vmax.f32 %v521_v25, 0.0 }
 0x201   :  { %v529_v31 = vmax.f32 %v513_v27, 0.0 }
 0x202   :  { %v535_v32 = vpack.c.bf16 %v531_v29, %v530_v28 }
 0x203   :  { %v534_v33 = vpack.c.bf16 %v529_v31, %v528_v30 }
 0x205   :  { %1067 = vmatprep.mubr.bf16.mxu1 %v534_v33 }
 0x206   :  { %1068 = vmatmul.mubr.bf16.gmra.mrb[12].mxu1 %v535_v32 }
 0x2d1   :  { %v1065_v35 = vpop.f32.mrb[8].mxu1 }
 0x2d2   :  { %v650_v36 = vadd.f32 %v1065_v35, %v877_v34  ;;  %v641_v37 = vpop.f32.mrb[9].mxu1 }
 0x2d3   :  { %v642_v38 = vadd.f32 %v877_v34, %v641_v37  ;;  %v1066_v39 = vpop.f32.mrb[10].mxu1 }
 0x2d4   :  { %676 = vadd.xlane.f32.xlu1 %v650_v36  ;;  %v644_v40 = vpop.f32.mrb[11].mxu1  ;;  %v653_v41 = vadd.f32 %v1066_v39, %v877_v34  ;;  %v886_v39 = vld [vmem:[%s1391_s9] ss:$0 sm:$0xff] }
 0x2d5   :  { %672 = vadd.xlane.f32.xlu0 %v642_v38  ;;  %v645_v42 = vadd.f32 %v877_v34, %v644_v40 }
 0x2d8   :  { %678 = vadd.xlane.f32.xlu1 %v653_v41 }
 0x2d9   :  { %674 = vadd.xlane.f32.xlu0 %v645_v42  ;;  %v1069_v43 = vpop.f32.mrb[12].mxu1 }
 0x2da   :  { %v657_v44 = vpop.f32.mrb[13].mxu1  ;;  %v666_v49 = vadd.f32 %v1069_v43, %v877_v34 }
 0x2db   :  { %v658_v45 = vadd.f32 %v877_v34, %v657_v44  ;;  %v1070_v46 = vpop.f32.mrb[14].mxu1 }
 0x2dc   :  { %v660_v47 = vpop.f32.mrb[15].mxu1  ;;  %v669_v50 = vadd.f32 %v1070_v46, %v877_v34 }
 0x2dd   :  { %v661_v48 = vadd.f32 %v877_v34, %v660_v47  ;;  %680 = vadd.xlane.f32.xlu0 %v658_v45  ;;  %v887_v47 = vld [vmem:[%s1392_s10] ss:$0 sm:$0xff] }
 0x2df   :  { %682 = vadd.xlane.f32.xlu1 %v661_v48 }
 0x2e1   :  { %684 = vadd.xlane.f32.xlu0 %v666_v49 }
 0x2e3   :  { %686 = vadd.xlane.f32.xlu1 %v669_v50 }
 0x361   :  { %v677_v51 = vpop.xlane.xlu1 %676 }
 0x362   :  { %v691_v52 = vmul.f32 0.0078125, %v677_v51  ;;  %v673_v53 = vpop.xlane.xlu0 %672 }
 0x363   :  { %v689_v54 = vmul.f32 0.0078125, %v673_v53 }
 0x364   :  { %v1324_v55 = vsub.f32 %v650_v36, %v691_v52 }
 0x365   :  { %v679_v56 = vpop.xlane.xlu1 %678  ;;  %v1326_v57 = vsub.f32 %v642_v38, %v689_v54 }
 0x366   :  { %v692_v58 = vmul.f32 0.0078125, %v679_v56  ;;  %v675_v59 = vpop.xlane.xlu0 %674  ;;  %v707_v60 = vmul.f32 %v1324_v55, %v1324_v55 }
 0x367   :  { %v690_v61 = vmul.f32 0.0078125, %v675_v59  ;;  %v705_v2 = vmul.f32 %v1326_v57, %v1326_v57 }
 0x368   :  { %v1330_v62 = vsub.f32 %v653_v41, %v692_v58  ;;  %717 = vadd.xlane.f32.xlu0 %v707_v60 }
 0x369   :  { %v1332_v63 = vsub.f32 %v645_v42, %v690_v61 }
 0x36a   :  { %v681_v0 = vpop.xlane.xlu0 %680  ;;  %v708_v1 = vmul.f32 %v1330_v62, %v1330_v62 }
 0x36b   :  { %v693_v3 = vmul.f32 0.0078125, %v681_v0  ;;  %v706_v8 = vmul.f32 %v1332_v63, %v1332_v63 }
 0x36c   :  { %719 = vadd.xlane.f32.xlu1 %v708_v1  ;;  %v683_v4 = vpop.xlane.xlu1 %682  ;;  %713 = vadd.xlane.f32.xlu0 %v705_v2 }
 0x36d   :  { %v1338_v5 = vsub.f32 %v658_v45, %v693_v3  ;;  %v694_v6 = vmul.f32 0.0078125, %v683_v4 }
 0x36e   :  { %v685_v7 = vpop.xlane.xlu0 %684 }
 0x36f   :  { %v1342_v9 = vsub.f32 %v661_v48, %v694_v6  ;;  %v695_v10 = vmul.f32 0.0078125, %v685_v7  ;;  %v709_v11 = vmul.f32 %v1338_v5, %v1338_v5 }
 0x370   :  { %715 = vadd.xlane.f32.xlu1 %v706_v8  ;;  %v687_v12 = vpop.xlane.xlu1 %686 }
 0x371   :  { %v1346_v13 = vsub.f32 %v666_v49, %v695_v10  ;;  %v696_v14 = vmul.f32 0.0078125, %v687_v12  ;;  %721 = vadd.xlane.f32.xlu0 %v709_v11  ;;  %v710_v15 = vmul.f32 %v1342_v9, %v1342_v9 }
 0x373   :  { %v1350_v16 = vsub.f32 %v669_v50, %v696_v14  ;;  %v711_v17 = vmul.f32 %v1346_v13, %v1346_v13 }
 0x374   :  { %723 = vadd.xlane.f32.xlu1 %v710_v15 }
 0x375   :  { %725 = vadd.xlane.f32.xlu0 %v711_v17  ;;  %v712_v18 = vmul.f32 %v1350_v16, %v1350_v16 }
 0x378   :  { %727 = vadd.xlane.f32.xlu1 %v712_v18 }
 0x3f5   :  { %v718_v19 = vpop.xlane.xlu0 %717 }
 0x3f6   :  { %v731_v20 = vmul.f32 0.0078125, %v718_v19 }
 0x3f8   :  { %v739_v21 = vadd.f32 1e-05, %v731_v20 }
 0x3f9   :  { %v720_v22 = vpop.xlane.xlu1 %719  ;;  %v714_v23 = vpop.xlane.xlu0 %713 }
 0x3fa   :  { %1119 = vrsqrt.f32 %v739_v21  ;;  %v732_v24 = vmul.f32 0.0078125, %v720_v22  ;;  %v729_v25 = vmul.f32 0.0078125, %v714_v23 }
 0x3fc   :  { %v740_v26 = vadd.f32 1e-05, %v732_v24  ;;  %v737_v27 = vadd.f32 1e-05, %v729_v25 }
 0x3fd   :  { %v716_v28 = vpop.xlane.xlu1 %715 }
 0x3fe   :  { %1121 = vrsqrt.f32 %v740_v26  ;;  %v730_v29 = vmul.f32 0.0078125, %v716_v28  ;;  %v722_v30 = vpop.xlane.xlu0 %721 }
 0x3ff   :  { %1123 = vrsqrt.f32 %v737_v27  ;;  %v733_v31 = vmul.f32 0.0078125, %v722_v30 }
 0x400   :  { %v738_v32 = vadd.f32 1e-05, %v730_v29 }
 0x401   :  { %v741_v33 = vadd.f32 1e-05, %v733_v31  ;;  %v724_v34 = vpop.xlane.xlu1 %723 }
 0x402   :  { %1125 = vrsqrt.f32 %v738_v32  ;;  %v734_v35 = vmul.f32 0.0078125, %v724_v34  ;;  %v726_v36 = vpop.xlane.xlu0 %725 }
 0x403   :  { %1127 = vrsqrt.f32 %v741_v33  ;;  %v735_v37 = vmul.f32 0.0078125, %v726_v36 }
 0x404   :  { %v1120_v38 = vpop.eup %1119  ;;  %v742_v40 = vadd.f32 1e-05, %v734_v35 }
 0x405   :  { %v755_v41 = vmul.f32 %v1120_v38, %v1324_v55  ;;  %v743_v42 = vadd.f32 1e-05, %v735_v37  ;;  %v728_v43 = vpop.xlane.xlu1 %727 }
 0x406   :  { %1129 = vrsqrt.f32 %v742_v40  ;;  %v736_v44 = vmul.f32 0.0078125, %v728_v43 }
 0x407   :  { %v770_v45 = vmul.f32 %v886_v39, %v755_v41  ;;  %1131 = vrsqrt.f32 %v743_v42 }
 0x408   :  { %v1122_v46 = vpop.eup %1121  ;;  %v744_v48 = vadd.f32 1e-05, %v736_v44 }
 0x409   :  { %v1124_v49 = vpop.eup %1123  ;;  %v756_v50 = vmul.f32 %v1122_v46, %v1330_v62  ;;  %v785_v52 = vadd.f32 %v887_v47, %v770_v45 }
 0x40a   :  { %v753_v51 = vmul.f32 %v1124_v49, %v1326_v57  ;;  %1133 = vrsqrt.f32 %v744_v48 }
 0x40b   :  { %v771_v53 = vmul.f32 %v886_v39, %v756_v50  ;;  %v793_v61 = vmul.f32 2.0, %v785_v52 }
 0x40c   :  { %v1126_v54 = vpop.eup %1125  ;;  %v768_v55 = vmul.f32 %v886_v39, %v753_v51 }
 0x40d   :  { %v1128_v56 = vpop.eup %1127  ;;  %v786_v58 = vadd.f32 %v887_v47, %v771_v53  ;;  %v754_v59 = vmul.f32 %v1126_v54, %v1332_v63 }
 0x40e   :  { %v757_v60 = vmul.f32 %v1128_v56, %v1338_v5  ;;  %v783_v1 = vadd.f32 %v887_v47, %v768_v55 }
 0x40f   :  { %v794_v0 = vmul.f32 2.0, %v786_v58  ;;  %v769_v2 = vmul.f32 %v886_v39, %v754_v59 }
 0x410   :  { %v1130_v3 = vpop.eup %1129  ;;  %v772_v4 = vmul.f32 %v886_v39, %v757_v60  ;;  %v791_v63 = vmul.f32 2.0, %v783_v1 }
 0x411   :  { %v1132_v62 = vpop.eup %1131  ;;  %v912_v6 = vpack.c.bf16 %v794_v0, %v793_v61  ;;  %v784_v57 = vadd.f32 %v887_v47, %v769_v2  ;;  %v758_v7 = vmul.f32 %v1130_v3, %v1342_v9 }
 0x412   :  { %v759_v8 = vmul.f32 %v1132_v62, %v1346_v13  ;;  %v787_v5 = vadd.f32 %v887_v47, %v772_v4 }
 0x413   :  { %924 = vst [vmem:[%s1393_s11 + $0x8] sm:$0xff] %v912_v6   ;;  %v792_v10 = vmul.f32 2.0, %v784_v57  ;;  %v773_v11 = vmul.f32 %v886_v39, %v758_v7 }
 0x414   :  { %v1134_v12 = vpop.eup %1133  ;;  %v774_v14 = vmul.f32 %v886_v39, %v759_v8  ;;  %v795_v9 = vmul.f32 2.0, %v787_v5 }
 0x415   :  { %v907_v15 = vpack.c.bf16 %v792_v10, %v791_v63  ;;  %v788_v17 = vadd.f32 %v887_v47, %v773_v11  ;;  %v760_v18 = vmul.f32 %v1134_v12, %v1350_v16 }
 0x416   :  { %v789_v19 = vadd.f32 %v887_v47, %v774_v14 }
 0x417   :  { %908 = vst [vmem:[%s1393_s11] sm:$0xff] %v907_v15   ;;  %v796_v13 = vmul.f32 2.0, %v788_v17  ;;  %v775_v20 = vmul.f32 %v886_v39, %v760_v18 }
 0x418   :  { %v797_v23 = vmul.f32 2.0, %v789_v19 }
 0x419   :  { %v917_v21 = vpack.c.bf16 %v796_v13, %v795_v9  ;;  %v790_v22 = vadd.f32 %v887_v47, %v775_v20 }
 0x41b   :  { %925 = vst [vmem:[%s1393_s11 + $0x10] sm:$0xff] %v917_v21   ;;  %v798_v24 = vmul.f32 2.0, %v790_v22 }
 0x41d   :  { %v922_v25 = vpack.c.bf16 %v798_v24, %v797_v23 }
 0x41f   :  { %926 = vst [vmem:[%s1393_s11 + $0x18] sm:$0xff] %v922_v25  }

</bundles_post_ra>
